<compile_context>
chip_gen: v6e
topology: v6e:2x2x1
jax: 0.10.0
libtpu: 0.0.40
codegen_flags: <defaults>
</compile_context>

<pallas_src>
import jax
import jax.numpy as jnp
from jax import lax
from jax.experimental import pallas as pl
from jax.experimental.pallas import tpu as pltpu


# --------------------------------------------------------------------------
# small helpers
# --------------------------------------------------------------------------
def _round_up(n, m):
    return ((n + m - 1) // m) * m


def _row_tile(r, target):
    """Largest divisor of r that is <= target and (multiple of 8 or == r)."""
    t = min(r, target)
    while t > 1:
        if r % t == 0 and (t % 8 == 0 or t == r):
            return t
        t -= 1
    return r


def _time_chunk(L, target):
    """Largest divisor of L that is <= target (recurrence unroll window)."""
    t = min(L, target)
    while L % t:
        t -= 1
    return t


def _to_time_major_padded(x_bf, b_pad):
    """(B, L, D) batch-first -> (L, B_pad, D) time-major, zero-padded batch rows."""
    B, _, _ = x_bf.shape
    x_tm = jnp.transpose(x_bf, (1, 0, 2))
    if b_pad > B:
        x_tm = jnp.pad(x_tm, ((0, 0), (0, b_pad - B), (0, 0)))
    return x_tm


def _mask_time_major_padded(m_bf, b_pad):
    """(B, L) float mask (1.0 = pad) -> (L, B_pad, 1); padded batch rows fully masked."""
    B, _ = m_bf.shape
    m_tm = jnp.transpose(m_bf, (1, 0))
    if b_pad > B:
        m_tm = jnp.pad(m_tm, ((0, 0), (0, b_pad - B)), constant_values=1.0)
    return m_tm[:, :, None]


# --------------------------------------------------------------------------
# Kernel 1: SeqAttnMatch — grid over batch ("parallel"), one example per step.
# --------------------------------------------------------------------------
def seq_attn_match(x1_emb, x2_emb, x2_mask, W, b):
    B, L1, E = x1_emb.shape
    L2 = x2_emb.shape[1]
    mask3 = x2_mask.reshape(B, 1, L2)

    def kernel(x_ref, y_ref, m_ref, w_ref, b_ref, o_ref):
        Wm = w_ref[...]                       # (E, E) bf16, pre-transposed -> x @ W
        bv = b_ref[...]                       # (1, E)  f32
        xp = jnp.maximum(jnp.dot(x_ref[...].astype(jnp.bfloat16), Wm,
                                 preferred_element_type=jnp.float32) + bv, 0.0)
        yp = jnp.maximum(jnp.dot(y_ref[...].astype(jnp.bfloat16), Wm,
                                 preferred_element_type=jnp.float32) + bv, 0.0)
        s = lax.dot_general(xp, yp, (((1,), (1,)), ((), ())),
                            preferred_element_type=jnp.float32)      # (L1, L2)
        s = jnp.where(m_ref[...] > 0.0, -1e30, s)                    # mask y padding
        s = s - jnp.max(s, axis=1, keepdims=True)
        e = jnp.exp(s)
        alpha = e / jnp.sum(e, axis=1, keepdims=True)
        o_ref[...] = jnp.dot(alpha, y_ref[...], preferred_element_type=jnp.float32)

    return pl.pallas_call(
        kernel,
        out_shape=jax.ShapeDtypeStruct((B, L1, E), jnp.float32),
        grid=(B,),
        in_specs=[
            pl.BlockSpec((None, L1, E), lambda bb: (bb, 0, 0)),
            pl.BlockSpec((None, L2, E), lambda bb: (bb, 0, 0)),
            pl.BlockSpec((None, 1, L2), lambda bb: (bb, 0, 0)),
            pl.BlockSpec((E, E), lambda bb: (0, 0)),
            pl.BlockSpec((1, E), lambda bb: (0, 0)),
        ],
        out_specs=pl.BlockSpec((None, L1, E), lambda bb: (bb, 0, 0)),
        compiler_params=pltpu.CompilerParams(
            dimension_semantics=("parallel",),
            vmem_limit_bytes=32 * 1024 * 1024),
    )(x1_emb, x2_emb, mask3, W, b)


# --------------------------------------------------------------------------
# Kernel 2a: streaming input projection (the only bandwidth-heavy matmul).
#   flat (R, D) @ (D, 2H) tiled over rows, "parallel", bf16 in / f32 out.
# --------------------------------------------------------------------------
def _input_projection(x_flat, wih, b):
    R, D = x_flat.shape
    H2 = wih.shape[1]
    TR = _row_tile(R, 512)        # big pipelined row tiles at realistic sizes
    grid_r = R // TR

    def kernel(x_ref, w_ref, b_ref, o_ref):
        o_ref[...] = (jnp.dot(x_ref[...].astype(jnp.bfloat16), w_ref[...],
                              preferred_element_type=jnp.float32) + b_ref[...])

    return pl.pallas_call(
        kernel,
        out_shape=jax.ShapeDtypeStruct((R, H2), jnp.float32),
        grid=(grid_r,),
        in_specs=[pl.BlockSpec((TR, D), lambda r: (r, 0)),
                  pl.BlockSpec((D, H2), lambda r: (0, 0)),
                  pl.BlockSpec((1, H2), lambda r: (0, 0))],
        out_specs=pl.BlockSpec((TR, H2), lambda r: (r, 0)),
        compiler_params=pltpu.CompilerParams(
            dimension_semantics=("parallel",),
            vmem_limit_bytes=64 * 1024 * 1024),
    )(x_flat, wih, b)


# --------------------------------------------------------------------------
# Kernel 2b: bidirectional tanh-RNN recurrence, tiled over batch groups.
#   Carries [h_fwd | h_bwd] as one (8, 2H) value; one fused block-diagonal
#   (2H, 2H) recurrent dot per step; chunked sublane-aligned stores.
# --------------------------------------------------------------------------
def _recurrence(pre, whh_bd):
    L, Bp, H2 = pre.shape
    H = H2 // 2
    BB = 8                                     # batch tile (sublane aligned)
    nb = Bp // BB
    CH = _time_chunk(L, 8)                     # partial-unroll window & store chunk
    nchunks = L // CH

    def kernel(pre_ref, whh_ref, out_ref):
        whh = whh_ref[...]                     # (2H, 2H) block-diag [W_hh_f^T, W_hh_b^T]
        # lane selector: first H lanes take the fwd pre-activation, last H the bwd one
        lane = lax.broadcasted_iota(jnp.int32, (BB, H2), 1)
        fwd_lane = lane < H

        def chunk_body(c, hcat):
            fb = pl.multiple_of(c * CH, CH)                    # fwd time base
            bb = pl.multiple_of((nchunks - 1 - c) * CH, CH)    # bwd time base
            pf_ch = pre_ref[pl.ds(fb, CH)]                     # (CH, BB, 2H)
            pb_ch = pre_ref[pl.ds(bb, CH)]                     # (CH, BB, 2H)
            hs = []
            for j in range(CH):                                # unrolled window
                # [pre_fwd(t=fb+j) | pre_bwd(t=L-1-fb-j)] via one lane select
                p = jnp.where(fwd_lane, pf_ch[j], pb_ch[CH - 1 - j])
                hcat = jnp.tanh(p + jnp.dot(hcat, whh,
                                            preferred_element_type=jnp.float32))
                hs.append(hcat)
            fwd = jnp.stack([h[:, 0:H] for h in hs], axis=0)          # (CH, BB, H)
            bwd = jnp.stack([h[:, H:H2] for h in hs[::-1]], axis=0)   # (CH, BB, H)
            out_ref[pl.ds(fb, CH), :, 0:H] = fwd
            out_ref[pl.ds(bb, CH), :, H:H2] = bwd
            return hcat

        h0 = jnp.zeros((BB, H2), jnp.float32)
        lax.fori_loop(0, nchunks, chunk_body, h0)

    return pl.pallas_call(
        kernel,
        out_shape=jax.ShapeDtypeStruct((L, Bp, H2), jnp.float32),
        grid=(nb,),
        in_specs=[pl.BlockSpec((L, BB, H2), lambda bi: (0, bi, 0)),
                  pl.BlockSpec((H2, H2), lambda bi: (0, 0))],
        out_specs=pl.BlockSpec((L, BB, H2), lambda bi: (0, bi, 0)),
        compiler_params=pltpu.CompilerParams(
            dimension_semantics=("parallel",),       # batch groups -> megacore
            vmem_limit_bytes=64 * 1024 * 1024),
    )(pre, whh_bd)


def birnn_layer(x_slab, p):
    """One bidirectional tanh-RNN layer: (L, Bp, D) -> (L, Bp, 2H)."""
    L, Bp, D = x_slab.shape
    H2 = p['whh_bd'].shape[0]
    pre = _input_projection(x_slab.reshape(L * Bp, D), p['wih'], p['b'])   # (L*Bp, 2H)
    return _recurrence(pre.reshape(L, Bp, H2), p['whh_bd'])


def stacked_brnn(slab, layer_params, concat_layers):
    outs, inp = [], slab
    for p in layer_params:
        out = birnn_layer(inp, p)
        outs.append(out)
        inp = out
    return jnp.concatenate(outs, axis=-1) if concat_layers else outs[-1]


# --------------------------------------------------------------------------
# Kernel 3: fused LinearSeqAttn(q) + LinearSeqAttn(d) + weighted_avg
#           + Binary_Softmax head, fully batched, padded time-major inputs.
# --------------------------------------------------------------------------
def merge_and_classify(q_hiddens, d_hiddens, q_mask, d_mask, params):
    L2, Bp, Hq = q_hiddens.shape
    L1, _, Hd = d_hiddens.shape
    HD1 = params['bin_w1_q'].shape[1]

    def kernel(qh_ref, dh_ref, qm_ref, dm_ref, qw_ref, qb_ref, dw_ref, db_ref,
               w1q_ref, w1d_ref, b1_ref, w2_ref, b2_ref, out_ref):
        qh = qh_ref[...]                                 # (L2, Bp, Hq)
        dh = dh_ref[...]                                 # (L1, Bp, Hd)
        # attention logits: VPU broadcast-mul + lane reduce (no N=1 MXU dots)
        qs = jnp.sum(qh * qw_ref[...], axis=-1, keepdims=True) + qb_ref[...]
        ds = jnp.sum(dh * dw_ref[...], axis=-1, keepdims=True) + db_ref[...]
        qs = jnp.where(qm_ref[...] > 0.0, -1e30, qs)
        ds = jnp.where(dm_ref[...] > 0.0, -1e30, ds)
        qa = jnp.exp(qs - jnp.max(qs, axis=0, keepdims=True))
        qa = qa / jnp.sum(qa, axis=0, keepdims=True)
        da = jnp.exp(ds - jnp.max(ds, axis=0, keepdims=True))
        da = da / jnp.sum(da, axis=0, keepdims=True)
        qv = jnp.sum(qa * qh, axis=0)                    # (Bp, Hq) weighted_avg
        dv = jnp.sum(da * dh, axis=0)                    # (Bp, Hd)
        # Binary_Softmax with bin_w1 split into q/d halves -> no z concat scratch
        h = jnp.maximum(
            jnp.dot(qv, w1q_ref[...], preferred_element_type=jnp.float32)
            + jnp.dot(dv, w1d_ref[...], preferred_element_type=jnp.float32)
            + b1_ref[...], 0.0)
        logits = jnp.dot(h, w2_ref[...], preferred_element_type=jnp.float32) + b2_ref[...]
        logits = logits - jnp.max(logits, axis=1, keepdims=True)
        e = jnp.exp(logits)
        out_ref[...] = e / jnp.sum(e, axis=1, keepdims=True)

    return pl.pallas_call(
        kernel,
        out_shape=jax.ShapeDtypeStruct((Bp, 2), jnp.float32),
        grid=(1,),
        in_specs=[
            pl.BlockSpec((L2, Bp, Hq), lambda i: (0, 0, 0)),
            pl.BlockSpec((L1, Bp, Hd), lambda i: (0, 0, 0)),
            pl.BlockSpec((L2, Bp, 1), lambda i: (0, 0, 0)),
            pl.BlockSpec((L1, Bp, 1), lambda i: (0, 0, 0)),
            pl.BlockSpec((1, Hq), lambda i: (0, 0)),
            pl.BlockSpec((1, 1), lambda i: (0, 0)),
            pl.BlockSpec((1, Hd), lambda i: (0, 0)),
            pl.BlockSpec((1, 1), lambda i: (0, 0)),
            pl.BlockSpec((Hq, HD1), lambda i: (0, 0)),
            pl.BlockSpec((Hd, HD1), lambda i: (0, 0)),
            pl.BlockSpec((1, HD1), lambda i: (0, 0)),
            pl.BlockSpec((HD1, 2), lambda i: (0, 0)),
            pl.BlockSpec((1, 2), lambda i: (0, 0)),
        ],
        out_specs=pl.BlockSpec((Bp, 2), lambda i: (0, 0)),
        compiler_params=pltpu.CompilerParams(
            dimension_semantics=("arbitrary",),
            vmem_limit_bytes=32 * 1024 * 1024),
    )(q_hiddens, d_hiddens, q_mask, d_mask,
      params['q_attn_w'], params['q_attn_b'],
      params['d_attn_w'], params['d_attn_b'],
      params['bin_w1_q'], params['bin_w1_d'], params['bin_b1'],
      params['bin_w2'], params['bin_b2'])


# --------------------------------------------------------------------------
# Plain-JAX fallback for question_merge == 'avg' (not the configured path)
# --------------------------------------------------------------------------
def _uniform_merge(x, mask):
    alpha = 1.0 - mask
    denom = jnp.maximum(jnp.sum(alpha, axis=1, keepdims=True), 1e-6)
    alpha = alpha / denom
    return jnp.einsum('bl,blh->bh', alpha, x)


# --------------------------------------------------------------------------
# Module config, parameters (stored pre-transposed / fused for the kernels)
# --------------------------------------------------------------------------
class Args:
    vocab_size = 100
    embedding_dim = 32
    num_features = 4
    use_qemb = True
    hidden_size = 32
    doc_layers = 1
    question_layers = 1
    dropout_rnn = 0.0
    dropout_rnn_output = False
    concat_rnn_layers = False
    rnn_type = 'rnn'          # tanh RNN cell
    rnn_padding = False
    question_merge = 'self_attn'
    dropout_emb = 0.0


def _init_rnn_layer_params(key, in_dim, hidden):
    k = 1.0 / float(hidden) ** 0.5
    keys = jax.random.split(key, 8)
    u = lambda kk, shape: jax.random.uniform(kk, shape, jnp.float32, -k, k)
    # PyTorch layout, then pre-transpose / fuse for the kernels.
    wih_f = u(keys[0], (hidden, in_dim))
    whh_f = u(keys[1], (hidden, hidden))
    b_f = u(keys[2], (1, hidden)) + u(keys[3], (1, hidden))     # b_ih + b_hh
    wih_b = u(keys[4], (hidden, in_dim))
    whh_b = u(keys[5], (hidden, hidden))
    b_b = u(keys[6], (1, hidden)) + u(keys[7], (1, hidden))
    H = hidden
    whh_bd = jnp.zeros((2 * H, 2 * H), jnp.float32)
    whh_bd = whh_bd.at[:H, :H].set(whh_f.T).at[H:, H:].set(whh_b.T)
    return dict(
        # streaming input-projection weight: bf16, pre-transposed, fwd|bwd fused
        wih=jnp.concatenate([wih_f.T, wih_b.T], axis=1).astype(jnp.bfloat16),  # (in, 2H)
        whh_bd=whh_bd,                                                         # (2H, 2H)
        b=jnp.concatenate([b_f, b_b], axis=1),                                 # (1, 2H)
    )


def init_params(key, args):
    keys = jax.random.split(key, 12)
    E, H = args.embedding_dim, args.hidden_size
    emb = jax.random.normal(keys[0], (args.vocab_size, E), jnp.float32)
    emb = emb.at[0].set(0.0)                   # padding_idx = 0
    params = {'embedding': emb}

    kE = 1.0 / float(E) ** 0.5
    params['qemb_W'] = (jax.random.uniform(keys[1], (E, E), jnp.float32, -kE, kE)
                        .T.astype(jnp.bfloat16))
    params['qemb_b'] = jax.random.uniform(keys[2], (1, E), jnp.float32, -kE, kE)

    doc_input = E + args.num_features + (E if args.use_qemb else 0)
    dkeys = jax.random.split(keys[3], args.doc_layers)
    doc_layers_p, in_dim = [], doc_input
    for l in range(args.doc_layers):
        doc_layers_p.append(_init_rnn_layer_params(dkeys[l], in_dim, H))
        in_dim = 2 * H
    params['doc_rnn'] = doc_layers_p

    qkeys = jax.random.split(keys[4], args.question_layers)
    q_layers_p, in_dim = [], E
    for l in range(args.question_layers):
        q_layers_p.append(_init_rnn_layer_params(qkeys[l], in_dim, H))
        in_dim = 2 * H
    params['question_rnn'] = q_layers_p

    doc_hid = 2 * H * (args.doc_layers if args.concat_rnn_layers else 1)
    q_hid = 2 * H * (args.question_layers if args.concat_rnn_layers else 1)
    kq = 1.0 / float(q_hid) ** 0.5
    kd = 1.0 / float(doc_hid) ** 0.5
    # attention weights stored as row vectors for VPU broadcast-mul + lane reduce
    params['q_attn_w'] = jax.random.uniform(keys[5], (1, q_hid), jnp.float32, -kq, kq)
    params['q_attn_b'] = jax.random.uniform(keys[6], (1, 1), jnp.float32, -kq, kq)
    params['d_attn_w'] = jax.random.uniform(keys[7], (1, doc_hid), jnp.float32, -kd, kd)
    params['d_attn_b'] = jax.random.uniform(keys[8], (1, 1), jnp.float32, -kd, kd)

    zdim = q_hid + doc_hid                       # == question_hidden_size * 2
    kz = 1.0 / float(zdim) ** 0.5
    kh = 1.0 / float(doc_hid) ** 0.5
    w1 = jax.random.uniform(keys[9], (doc_hid, zdim), jnp.float32, -kz, kz)
    params['bin_w1_q'] = w1[:, :q_hid].T         # (q_hid, doc_hid)   split halves ->
    params['bin_w1_d'] = w1[:, q_hid:].T         # (doc_hid, doc_hid)  no z concat
    params['bin_b1'] = jax.random.uniform(keys[10], (1, doc_hid), jnp.float32, -kz, kz)
    k2a, k2b = jax.random.split(keys[11])
    params['bin_w2'] = jax.random.uniform(k2a, (2, doc_hid), jnp.float32, -kh, kh).T
    params['bin_b2'] = jax.random.uniform(k2b, (1, 2), jnp.float32, -kh, kh)
    return params


# --------------------------------------------------------------------------
# Forward
# --------------------------------------------------------------------------
def rnn_similar_forward(params, args, x1, x1_f, x1_mask, x2, x2_mask):
    if args.rnn_type != 'rnn':
        raise NotImplementedError('only rnn_type="rnn" implemented')
    emb = params['embedding']
    x1_emb = emb[x1]                             # (B, L1, E)  gather left to XLA
    x2_emb = emb[x2]                             # (B, L2, E)
    x1m = x1_mask.astype(jnp.float32)
    x2m = x2_mask.astype(jnp.float32)
    # dropout_emb == 0 and eval mode -> identity

    drnn_in = [x1_emb]
    if args.use_qemb:
        drnn_in.append(seq_attn_match(x1_emb, x2_emb, x2m,
                                      params['qemb_W'], params['qemb_b']))
    if args.num_features > 0:
        drnn_in.append(x1_f)
    doc_in = jnp.concatenate(drnn_in, axis=2)    # (B, L1, Ddoc)

    # single layer-boundary relayout: time-major + batch padded to a multiple of 8
    B, L1 = x1.shape
    Bp = _round_up(B, 8)
    doc_slab = _to_time_major_padded(doc_in, Bp)       # (L1, Bp, Ddoc)
    q_slab = _to_time_major_padded(x2_emb, Bp)         # (L2, Bp, E)

    doc_hiddens = stacked_brnn(doc_slab, params['doc_rnn'], args.concat_rnn_layers)
    question_hiddens = stacked_brnn(q_slab, params['question_rnn'],
                                    args.concat_rnn_layers)

    if args.question_merge == 'self_attn':
        d_mask_tm = _mask_time_major_padded(x1m, Bp)   # padded batch rows fully masked
        q_mask_tm = _mask_time_major_padded(x2m, Bp)
        pred = merge_and_classify(question_hiddens, doc_hiddens,
                                  q_mask_tm, d_mask_tm, params)    # (Bp, 2)
        return pred[:B]

    # 'avg' path (uniform_weights + weighted_avg + binary head), plain-JAX fallback
    qh_bf = jnp.transpose(question_hiddens[:, :B], (1, 0, 2))
    dh_bf = jnp.transpose(doc_hiddens[:, :B], (1, 0, 2))
    qv = _uniform_merge(qh_bf, x2m)
    dv = _uniform_merge(dh_bf, x1m)
    h = jnp.maximum(qv @ params['bin_w1_q'] + dv @ params['bin_w1_d']
                    + params['bin_b1'], 0.0)
    return jax.nn.softmax(h @ params['bin_w2'] + params['bin_b2'], axis=1)


if __name__ == "__main__":
    args = Args()
    key = jax.random.PRNGKey(0)
    pkey, dkey = jax.random.split(key)
    params = init_params(pkey, args)

    B, L1, L2 = 2, 16, 8
    k1, k2, k3 = jax.random.split(dkey, 3)
    x1 = jax.random.randint(k1, (B, L1), 1, args.vocab_size)
    x2 = jax.random.randint(k2, (B, L2), 1, args.vocab_size)
    # pad the tail of the second example (token id 0 == padding_idx)
    x1 = x1.at[1, -4:].set(0)
    x2 = x2.at[1, -2:].set(0)
    x1_mask = (x1 == 0)
    x2_mask = (x2 == 0)
    x1_f = jax.random.normal(k3, (B, L1, args.num_features), jnp.float32)

    fwd = jax.jit(lambda p, a1, a1f, a1m, a2, a2m:
                  rnn_similar_forward(p, args, a1, a1f, a1m, a2, a2m))
    pred = fwd(params, x1, x1_f, x1_mask, x2, x2_mask)
    pred = jax.block_until_ready(pred)
    assert pred.shape == (B, 2)
    assert bool(jnp.all(jnp.isfinite(pred)))
    assert bool(jnp.all(jnp.abs(jnp.sum(pred, axis=1) - 1.0) < 1e-4))
    print("KERNEL_OK")
</pallas_src>

<mosaic_0001>
module attributes {stable_mosaic.version = 11 : i64} {
  func.func @kernel(%arg0: i32, %arg1: memref<1x16x32xf32, #tpu.memory_space<vmem>>, %arg2: memref<1x8x32xf32, #tpu.memory_space<vmem>>, %arg3: memref<1x1x8xf32, #tpu.memory_space<vmem>>, %arg4: memref<32x32xbf16, #tpu.memory_space<vmem>>, %arg5: memref<1x32xf32, #tpu.memory_space<vmem>>, %arg6: memref<1x16x32xf32, #tpu.memory_space<vmem>>) attributes {dimension_semantics = [#tpu.dimension_semantics<parallel>], iteration_bounds = array<i64: 2>, scalar_prefetch = 0 : i64, scratch_operands = 0 : i64, tpu.core_type = #tpu.core_type<tc>, window_params = [{transform_indices = @transform_0, window_bounds = array<i64: 1, 16, 32>}, {transform_indices = @transform_1, window_bounds = array<i64: 1, 8, 32>}, {transform_indices = @transform_2, window_bounds = array<i64: 1, 1, 8>}, {pipeline_mode = #tpu.pipeline_mode<synchronous>, transform_indices = @transform_3, window_bounds = array<i64: 32, 32>}, {pipeline_mode = #tpu.pipeline_mode<synchronous>, transform_indices = @transform_4, window_bounds = array<i64: 1, 32>}, {transform_indices = @transform_5, window_bounds = array<i64: 1, 16, 32>}]} {
    %c0 = arith.constant 0 : index
    %c0_0 = arith.constant 0 : index
    %0 = vector.load %arg4[%c0, %c0_0] : memref<32x32xbf16, #tpu.memory_space<vmem>>, vector<32x32xbf16>
    %c0_1 = arith.constant 0 : index
    %c0_2 = arith.constant 0 : index
    %1 = vector.load %arg5[%c0_1, %c0_2] : memref<1x32xf32, #tpu.memory_space<vmem>>, vector<1x32xf32>
    %c0_3 = arith.constant 0 : index
    %c0_4 = arith.constant 0 : index
    %c0_5 = arith.constant 0 : index
    %2 = vector.load %arg1[%c0_3, %c0_4, %c0_5] : memref<1x16x32xf32, #tpu.memory_space<vmem>>, vector<1x16x32xf32>
    %3 = vector.shape_cast %2 : vector<1x16x32xf32> to vector<16x32xf32>
    %4 = arith.truncf %3 : vector<16x32xf32> to vector<16x32xbf16>
    %cst = arith.constant dense<0.000000e+00> : vector<16x32xf32>
    %5 = tpu.matmul %4, %0, %cst {dimension_numbers = #tpu.dot_dimension_numbers<[1], [0], [0], [1], [0, 0, 1, 1], [], []>} : vector<16x32xbf16>, vector<32x32xbf16>, vector<16x32xf32> -> vector<16x32xf32>
    %6 = vector.broadcast %1 : vector<1x32xf32> to vector<16x32xf32>
    %7 = arith.addf %5, %6 : vector<16x32xf32>
    %cst_6 = arith.constant 0.000000e+00 : f32
    %8 = vector.broadcast %cst_6 : f32 to vector<16x32xf32>
    %9 = arith.maximumf %7, %8 : vector<16x32xf32>
    %c0_7 = arith.constant 0 : index
    %c0_8 = arith.constant 0 : index
    %c0_9 = arith.constant 0 : index
    %10 = vector.load %arg2[%c0_7, %c0_8, %c0_9] : memref<1x8x32xf32, #tpu.memory_space<vmem>>, vector<1x8x32xf32>
    %11 = vector.shape_cast %10 : vector<1x8x32xf32> to vector<8x32xf32>
    %12 = arith.truncf %11 : vector<8x32xf32> to vector<8x32xbf16>
    %cst_10 = arith.constant dense<0.000000e+00> : vector<8x32xf32>
    %13 = tpu.matmul %12, %0, %cst_10 {dimension_numbers = #tpu.dot_dimension_numbers<[1], [0], [0], [1], [0, 0, 1, 1], [], []>} : vector<8x32xbf16>, vector<32x32xbf16>, vector<8x32xf32> -> vector<8x32xf32>
    %14 = vector.broadcast %1 : vector<1x32xf32> to vector<8x32xf32>
    %15 = arith.addf %13, %14 : vector<8x32xf32>
    %cst_11 = arith.constant 0.000000e+00 : f32
    %16 = vector.broadcast %cst_11 : f32 to vector<8x32xf32>
    %17 = arith.maximumf %15, %16 : vector<8x32xf32>
    %cst_12 = arith.constant dense<0.000000e+00> : vector<16x8xf32>
    %18 = tpu.matmul %9, %17, %cst_12 {dimension_numbers = #tpu.dot_dimension_numbers<[1], [1], [0], [0], [0, 0, 1, 0], [], []>} : vector<16x32xf32>, vector<8x32xf32>, vector<16x8xf32> -> vector<16x8xf32>
    %c0_13 = arith.constant 0 : index
    %c0_14 = arith.constant 0 : index
    %c0_15 = arith.constant 0 : index
    %19 = vector.load %arg3[%c0_13, %c0_14, %c0_15] : memref<1x1x8xf32, #tpu.memory_space<vmem>>, vector<1x1x8xf32>
    %20 = vector.shape_cast %19 : vector<1x1x8xf32> to vector<1x8xf32>
    %cst_16 = arith.constant 0.000000e+00 : f32
    %21 = vector.broadcast %cst_16 : f32 to vector<1x8xf32>
    %22 = arith.cmpf ogt, %20, %21 : vector<1x8xf32>
    %cst_17 = arith.constant -1.000000e+30 : f32
    %23 = vector.shape_cast %22 : vector<1x8xi1> to vector<1x8xi1>
    %24 = vector.broadcast %23 : vector<1x8xi1> to vector<16x8xi1>
    %25 = vector.broadcast %cst_17 : f32 to vector<16x8xf32>
    %26 = arith.select %24, %25, %18 : vector<16x8xi1>, vector<16x8xf32>
    %cst_18 = arith.constant dense<0xFF800000> : vector<16xf32>
    %27 = vector.multi_reduction <maximumf>, %26, %cst_18 [1] : vector<16x8xf32> to vector<16xf32>
    %28 = vector.shape_cast %27 : vector<16xf32> to vector<16x1xf32>
    %29 = vector.broadcast %28 : vector<16x1xf32> to vector<16x8xf32>
    %30 = arith.subf %26, %29 : vector<16x8xf32>
    %31 = math.exp %30 : vector<16x8xf32>
    %cst_19 = arith.constant dense<0.000000e+00> : vector<16xf32>
    %32 = vector.multi_reduction <add>, %31, %cst_19 [1] : vector<16x8xf32> to vector<16xf32>
    %33 = vector.shape_cast %32 : vector<16xf32> to vector<16x1xf32>
    %34 = vector.broadcast %33 : vector<16x1xf32> to vector<16x8xf32>
    %35 = arith.divf %31, %34 : vector<16x8xf32>
    %c0_20 = arith.constant 0 : index
    %c0_21 = arith.constant 0 : index
    %c0_22 = arith.constant 0 : index
    %36 = vector.load %arg2[%c0_20, %c0_21, %c0_22] : memref<1x8x32xf32, #tpu.memory_space<vmem>>, vector<1x8x32xf32>
    %37 = vector.shape_cast %36 : vector<1x8x32xf32> to vector<8x32xf32>
    %cst_23 = arith.constant dense<0.000000e+00> : vector<16x32xf32>
    %38 = tpu.matmul %35, %37, %cst_23 {dimension_numbers = #tpu.dot_dimension_numbers<[1], [0], [0], [1], [0, 0, 1, 1], [], []>} : vector<16x8xf32>, vector<8x32xf32>, vector<16x32xf32> -> vector<16x32xf32>
    %c0_24 = arith.constant 0 : index
    %c0_25 = arith.constant 0 : index
    %c0_26 = arith.constant 0 : index
    %39 = vector.load %arg6[%c0_24, %c0_25, %c0_26] : memref<1x16x32xf32, #tpu.memory_space<vmem>>, vector<1x16x32xf32>
    %40 = vector.shape_cast %39 : vector<1x16x32xf32> to vector<16x32xf32>
    %41 = vector.shape_cast %38 : vector<16x32xf32> to vector<1x16x32xf32>
    tpu.vector_store %arg6[%c0_24, %c0_25, %c0_26], %41 {strides = array<i32>} : memref<1x16x32xf32, #tpu.memory_space<vmem>>, vector<1x16x32xf32>,
    return
  }
  func.func @transform_0(%arg0: i32) -> (i32, i32, i32) {
    %c0_i32 = arith.constant 0 : i32
    %c0_i32_0 = arith.constant 0 : i32
    %c0_i32_1 = arith.constant 0 : i32
    return %arg0, %c0_i32, %c0_i32_0 : i32, i32, i32
  }
  func.func @transform_1(%arg0: i32) -> (i32, i32, i32) {
    %c0_i32 = arith.constant 0 : i32
    %c0_i32_0 = arith.constant 0 : i32
    %c0_i32_1 = arith.constant 0 : i32
    return %arg0, %c0_i32, %c0_i32_0 : i32, i32, i32
  }
  func.func @transform_2(%arg0: i32) -> (i32, i32, i32) {
    %c0_i32 = arith.constant 0 : i32
    %c0_i32_0 = arith.constant 0 : i32
    %c0_i32_1 = arith.constant 0 : i32
    return %arg0, %c0_i32, %c0_i32_0 : i32, i32, i32
  }
  func.func @transform_3(%arg0: i32) -> (i32, i32) {
    %c0_i32 = arith.constant 0 : i32
    %c0_i32_0 = arith.constant 0 : i32
    %c0_i32_1 = arith.constant 0 : i32
    return %c0_i32, %c0_i32_0 : i32, i32
  }
  func.func @transform_4(%arg0: i32) -> (i32, i32) {
    %c0_i32 = arith.constant 0 : i32
    %c0_i32_0 = arith.constant 0 : i32
    %c0_i32_1 = arith.constant 0 : i32
    return %c0_i32, %c0_i32_0 : i32, i32
  }
  func.func @transform_5(%arg0: i32) -> (i32, i32, i32) {
    %c0_i32 = arith.constant 0 : i32
    %c0_i32_0 = arith.constant 0 : i32
    %c0_i32_1 = arith.constant 0 : i32
    return %arg0, %c0_i32, %c0_i32_0 : i32, i32, i32
  }
}

module attributes {stable_mosaic.version = 11 : i64} {
  func.func @kernel(%arg0: i32, %arg1: memref<64x32xf32, #tpu.memory_space<vmem>>, %arg2: memref<32x64xbf16, #tpu.memory_space<vmem>>, %arg3: memref<1x64xf32, #tpu.memory_space<vmem>>, %arg4: memref<64x64xf32, #tpu.memory_space<vmem>>) attributes {dimension_semantics = [#tpu.dimension_semantics<parallel>], iteration_bounds = array<i64: 1>, scalar_prefetch = 0 : i64, scratch_operands = 0 : i64, tpu.core_type = #tpu.core_type<tc>, window_params = [{transform_indices = @transform_0, window_bounds = array<i64: 64, 32>}, {pipeline_mode = #tpu.pipeline_mode<synchronous>, transform_indices = @transform_1, window_bounds = array<i64: 32, 64>}, {pipeline_mode = #tpu.pipeline_mode<synchronous>, transform_indices = @transform_2, window_bounds = array<i64: 1, 64>}, {transform_indices = @transform_3, window_bounds = array<i64: 64, 64>}]} {
    %c0 = arith.constant 0 : index
    %c0_0 = arith.constant 0 : index
    %0 = vector.load %arg1[%c0, %c0_0] : memref<64x32xf32, #tpu.memory_space<vmem>>, vector<64x32xf32>
    %1 = arith.truncf %0 : vector<64x32xf32> to vector<64x32xbf16>
    %c0_1 = arith.constant 0 : index
    %c0_2 = arith.constant 0 : index
    %2 = vector.load %arg2[%c0_1, %c0_2] : memref<32x64xbf16, #tpu.memory_space<vmem>>, vector<32x64xbf16>
    %cst = arith.constant dense<0.000000e+00> : vector<64x64xf32>
    %3 = tpu.matmul %1, %2, %cst {dimension_numbers = #tpu.dot_dimension_numbers<[1], [0], [0], [1], [0, 0, 1, 1], [], []>} : vector<64x32xbf16>, vector<32x64xbf16>, vector<64x64xf32> -> vector<64x64xf32>
    %c0_3 = arith.constant 0 : index
    %c0_4 = arith.constant 0 : index
    %4 = vector.load %arg3[%c0_3, %c0_4] : memref<1x64xf32, #tpu.memory_space<vmem>>, vector<1x64xf32>
    %5 = vector.broadcast %4 : vector<1x64xf32> to vector<64x64xf32>
    %6 = arith.addf %3, %5 : vector<64x64xf32>
    %c0_5 = arith.constant 0 : index
    %c0_6 = arith.constant 0 : index
    %7 = vector.load %arg4[%c0_5, %c0_6] : memref<64x64xf32, #tpu.memory_space<vmem>>, vector<64x64xf32>
    tpu.vector_store %arg4[%c0_5, %c0_6], %6 {strides = array<i32>} : memref<64x64xf32, #tpu.memory_space<vmem>>, vector<64x64xf32>,
    return
  }
  func.func @transform_0(%arg0: i32) -> (i32, i32) {
    %c0_i32 = arith.constant 0 : i32
    %c0_i32_0 = arith.constant 0 : i32
    return %arg0, %c0_i32 : i32, i32
  }
  func.func @transform_1(%arg0: i32) -> (i32, i32) {
    %c0_i32 = arith.constant 0 : i32
    %c0_i32_0 = arith.constant 0 : i32
    %c0_i32_1 = arith.constant 0 : i32
    return %c0_i32, %c0_i32_0 : i32, i32
  }
  func.func @transform_2(%arg0: i32) -> (i32, i32) {
    %c0_i32 = arith.constant 0 : i32
    %c0_i32_0 = arith.constant 0 : i32
    %c0_i32_1 = arith.constant 0 : i32
    return %c0_i32, %c0_i32_0 : i32, i32
  }
  func.func @transform_3(%arg0: i32) -> (i32, i32) {
    %c0_i32 = arith.constant 0 : i32
    %c0_i32_0 = arith.constant 0 : i32
    return %arg0, %c0_i32 : i32, i32
  }
}

module attributes {stable_mosaic.version = 11 : i64} {
  func.func @kernel(%arg0: i32, %arg1: memref<128x68xf32, #tpu.memory_space<vmem>>, %arg2: memref<68x64xbf16, #tpu.memory_space<vmem>>, %arg3: memref<1x64xf32, #tpu.memory_space<vmem>>, %arg4: memref<128x64xf32, #tpu.memory_space<vmem>>) attributes {dimension_semantics = [#tpu.dimension_semantics<parallel>], iteration_bounds = array<i64: 1>, scalar_prefetch = 0 : i64, scratch_operands = 0 : i64, tpu.core_type = #tpu.core_type<tc>, window_params = [{transform_indices = @transform_0, window_bounds = array<i64: 128, 68>}, {pipeline_mode = #tpu.pipeline_mode<synchronous>, transform_indices = @transform_1, window_bounds = array<i64: 68, 64>}, {pipeline_mode = #tpu.pipeline_mode<synchronous>, transform_indices = @transform_2, window_bounds = array<i64: 1, 64>}, {transform_indices = @transform_3, window_bounds = array<i64: 128, 64>}]} {
    %c0 = arith.constant 0 : index
    %c0_0 = arith.constant 0 : index
    %0 = vector.load %arg1[%c0, %c0_0] : memref<128x68xf32, #tpu.memory_space<vmem>>, vector<128x68xf32>
    %1 = arith.truncf %0 : vector<128x68xf32> to vector<128x68xbf16>
    %c0_1 = arith.constant 0 : index
    %c0_2 = arith.constant 0 : index
    %2 = vector.load %arg2[%c0_1, %c0_2] : memref<68x64xbf16, #tpu.memory_space<vmem>>, vector<68x64xbf16>
    %cst = arith.constant dense<0.000000e+00> : vector<128x64xf32>
    %3 = tpu.matmul %1, %2, %cst {dimension_numbers = #tpu.dot_dimension_numbers<[1], [0], [0], [1], [0, 0, 1, 1], [], []>} : vector<128x68xbf16>, vector<68x64xbf16>, vector<128x64xf32> -> vector<128x64xf32>
    %c0_3 = arith.constant 0 : index
    %c0_4 = arith.constant 0 : index
    %4 = vector.load %arg3[%c0_3, %c0_4] : memref<1x64xf32, #tpu.memory_space<vmem>>, vector<1x64xf32>
    %5 = vector.broadcast %4 : vector<1x64xf32> to vector<128x64xf32>
    %6 = arith.addf %3, %5 : vector<128x64xf32>
    %c0_5 = arith.constant 0 : index
    %c0_6 = arith.constant 0 : index
    %7 = vector.load %arg4[%c0_5, %c0_6] : memref<128x64xf32, #tpu.memory_space<vmem>>, vector<128x64xf32>
    tpu.vector_store %arg4[%c0_5, %c0_6], %6 {strides = array<i32>} : memref<128x64xf32, #tpu.memory_space<vmem>>, vector<128x64xf32>,
    return
  }
  func.func @transform_0(%arg0: i32) -> (i32, i32) {
    %c0_i32 = arith.constant 0 : i32
    %c0_i32_0 = arith.constant 0 : i32
    return %arg0, %c0_i32 : i32, i32
  }
  func.func @transform_1(%arg0: i32) -> (i32, i32) {
    %c0_i32 = arith.constant 0 : i32
    %c0_i32_0 = arith.constant 0 : i32
    %c0_i32_1 = arith.constant 0 : i32
    return %c0_i32, %c0_i32_0 : i32, i32
  }
  func.func @transform_2(%arg0: i32) -> (i32, i32) {
    %c0_i32 = arith.constant 0 : i32
    %c0_i32_0 = arith.constant 0 : i32
    %c0_i32_1 = arith.constant 0 : i32
    return %c0_i32, %c0_i32_0 : i32, i32
  }
  func.func @transform_3(%arg0: i32) -> (i32, i32) {
    %c0_i32 = arith.constant 0 : i32
    %c0_i32_0 = arith.constant 0 : i32
    return %arg0, %c0_i32 : i32, i32
  }
}

module attributes {stable_mosaic.version = 11 : i64} {
  func.func @kernel(%arg0: i32, %arg1: memref<16x8x64xf32, #tpu.memory_space<vmem>>, %arg2: memref<64x64xf32, #tpu.memory_space<vmem>>, %arg3: memref<16x8x64xf32, #tpu.memory_space<vmem>>) attributes {dimension_semantics = [#tpu.dimension_semantics<parallel>], iteration_bounds = array<i64: 1>, scalar_prefetch = 0 : i64, scratch_operands = 0 : i64, tpu.core_type = #tpu.core_type<tc>, window_params = [{transform_indices = @transform_0, window_bounds = array<i64: 16, 8, 64>}, {pipeline_mode = #tpu.pipeline_mode<synchronous>, transform_indices = @transform_1, window_bounds = array<i64: 64, 64>}, {transform_indices = @transform_2, window_bounds = array<i64: 16, 8, 64>}]} {
    %c0 = arith.constant 0 : index
    %c0_0 = arith.constant 0 : index
    %0 = vector.load %arg2[%c0, %c0_0] : memref<64x64xf32, #tpu.memory_space<vmem>>, vector<64x64xf32>
    %1 = tpu.iota {dimensions = array<i32: 1>} : vector<8x64xi32>
    %c32_i32 = arith.constant 32 : i32
    %2 = vector.broadcast %c32_i32 : i32 to vector<8x64xi32>
    %3 = arith.cmpi slt, %1, %2 : vector<8x64xi32>
    %cst = arith.constant 0.000000e+00 : f32
    %4 = vector.broadcast %cst : f32 to vector<8x64xf32>
    %c0_i32 = arith.constant 0 : i32
    %c2_i32 = arith.constant 2 : i32
    %5 = arith.addi %c0_i32, %c2_i32 : i32
    %c1_i32 = arith.constant 1 : i32
    %6 = scf.for %arg4 = %c0_i32 to %5 step %c1_i32 iter_args(%arg5 = %4) -> (vector<8x64xf32>)  : i32 {
      %c8_i32 = arith.constant 8 : i32
      %7 = arith.muli %arg4, %c8_i32 : i32
      %8 = tpu.assume_multiple %7, 8 : i32
      %c1_i32_2 = arith.constant 1 : i32
      %9 = arith.subi %c1_i32_2, %arg4 : i32
      %c8_i32_3 = arith.constant 8 : i32
      %10 = arith.muli %9, %c8_i32_3 : i32
      %11 = tpu.assume_multiple %10, 8 : i32
      %12 = arith.index_cast %8 : i32 to index
      %c0_4 = arith.constant 0 : index
      %c0_5 = arith.constant 0 : index
      %13 = vector.load %arg1[%12, %c0_4, %c0_5] : memref<16x8x64xf32, #tpu.memory_space<vmem>>, vector<8x8x64xf32>
      %14 = arith.index_cast %11 : i32 to index
      %c0_6 = arith.constant 0 : index
      %c0_7 = arith.constant 0 : index
      %15 = vector.load %arg1[%14, %c0_6, %c0_7] : memref<16x8x64xf32, #tpu.memory_space<vmem>>, vector<8x8x64xf32>
      %16 = vector.extract_strided_slice %13 {offsets = [0, 0, 0], sizes = [1, 8, 64], strides = [1, 1, 1]} : vector<8x8x64xf32> to vector<1x8x64xf32>
      %17 = vector.shape_cast %16 : vector<1x8x64xf32> to vector<8x64xf32>
      %18 = vector.extract_strided_slice %15 {offsets = [7, 0, 0], sizes = [1, 8, 64], strides = [1, 1, 1]} : vector<8x8x64xf32> to vector<1x8x64xf32>
      %19 = vector.shape_cast %18 : vector<1x8x64xf32> to vector<8x64xf32>
      %20 = arith.select %3, %17, %19 : vector<8x64xi1>, vector<8x64xf32>
      %cst_8 = arith.constant dense<0.000000e+00> : vector<8x64xf32>
      %21 = tpu.matmul %arg5, %0, %cst_8 {dimension_numbers = #tpu.dot_dimension_numbers<[1], [0], [0], [1], [0, 0, 1, 1], [], []>} : vector<8x64xf32>, vector<64x64xf32>, vector<8x64xf32> -> vector<8x64xf32>
      %22 = arith.addf %20, %21 : vector<8x64xf32>
      %23 = math.tanh %22 : vector<8x64xf32>
      %24 = vector.extract_strided_slice %13 {offsets = [1, 0, 0], sizes = [1, 8, 64], strides = [1, 1, 1]} : vector<8x8x64xf32> to vector<1x8x64xf32>
      %25 = vector.shape_cast %24 : vector<1x8x64xf32> to vector<8x64xf32>
      %26 = vector.extract_strided_slice %15 {offsets = [6, 0, 0], sizes = [1, 8, 64], strides = [1, 1, 1]} : vector<8x8x64xf32> to vector<1x8x64xf32>
      %27 = vector.shape_cast %26 : vector<1x8x64xf32> to vector<8x64xf32>
      %28 = arith.select %3, %25, %27 : vector<8x64xi1>, vector<8x64xf32>
      %cst_9 = arith.constant dense<0.000000e+00> : vector<8x64xf32>
      %29 = tpu.matmul %23, %0, %cst_9 {dimension_numbers = #tpu.dot_dimension_numbers<[1], [0], [0], [1], [0, 0, 1, 1], [], []>} : vector<8x64xf32>, vector<64x64xf32>, vector<8x64xf32> -> vector<8x64xf32>
      %30 = arith.addf %28, %29 : vector<8x64xf32>
      %31 = math.tanh %30 : vector<8x64xf32>
      %32 = vector.extract_strided_slice %13 {offsets = [2, 0, 0], sizes = [1, 8, 64], strides = [1, 1, 1]} : vector<8x8x64xf32> to vector<1x8x64xf32>
      %33 = vector.shape_cast %32 : vector<1x8x64xf32> to vector<8x64xf32>
      %34 = vector.extract_strided_slice %15 {offsets = [5, 0, 0], sizes = [1, 8, 64], strides = [1, 1, 1]} : vector<8x8x64xf32> to vector<1x8x64xf32>
      %35 = vector.shape_cast %34 : vector<1x8x64xf32> to vector<8x64xf32>
      %36 = arith.select %3, %33, %35 : vector<8x64xi1>, vector<8x64xf32>
      %cst_10 = arith.constant dense<0.000000e+00> : vector<8x64xf32>
      %37 = tpu.matmul %31, %0, %cst_10 {dimension_numbers = #tpu.dot_dimension_numbers<[1], [0], [0], [1], [0, 0, 1, 1], [], []>} : vector<8x64xf32>, vector<64x64xf32>, vector<8x64xf32> -> vector<8x64xf32>
      %38 = arith.addf %36, %37 : vector<8x64xf32>
      %39 = math.tanh %38 : vector<8x64xf32>
      %40 = vector.extract_strided_slice %13 {offsets = [3, 0, 0], sizes = [1, 8, 64], strides = [1, 1, 1]} : vector<8x8x64xf32> to vector<1x8x64xf32>
      %41 = vector.shape_cast %40 : vector<1x8x64xf32> to vector<8x64xf32>
      %42 = vector.extract_strided_slice %15 {offsets = [4, 0, 0], sizes = [1, 8, 64], strides = [1, 1, 1]} : vector<8x8x64xf32> to vector<1x8x64xf32>
      %43 = vector.shape_cast %42 : vector<1x8x64xf32> to vector<8x64xf32>
      %44 = arith.select %3, %41, %43 : vector<8x64xi1>, vector<8x64xf32>
      %cst_11 = arith.constant dense<0.000000e+00> : vector<8x64xf32>
      %45 = tpu.matmul %39, %0, %cst_11 {dimension_numbers = #tpu.dot_dimension_numbers<[1], [0], [0], [1], [0, 0, 1, 1], [], []>} : vector<8x64xf32>, vector<64x64xf32>, vector<8x64xf32> -> vector<8x64xf32>
      %46 = arith.addf %44, %45 : vector<8x64xf32>
      %47 = math.tanh %46 : vector<8x64xf32>
      %48 = vector.extract_strided_slice %13 {offsets = [4, 0, 0], sizes = [1, 8, 64], strides = [1, 1, 1]} : vector<8x8x64xf32> to vector<1x8x64xf32>
      %49 = vector.shape_cast %48 : vector<1x8x64xf32> to vector<8x64xf32>
      %50 = vector.extract_strided_slice %15 {offsets = [3, 0, 0], sizes = [1, 8, 64], strides = [1, 1, 1]} : vector<8x8x64xf32> to vector<1x8x64xf32>
      %51 = vector.shape_cast %50 : vector<1x8x64xf32> to vector<8x64xf32>
      %52 = arith.select %3, %49, %51 : vector<8x64xi1>, vector<8x64xf32>
      %cst_12 = arith.constant dense<0.000000e+00> : vector<8x64xf32>
      %53 = tpu.matmul %47, %0, %cst_12 {dimension_numbers = #tpu.dot_dimension_numbers<[1], [0], [0], [1], [0, 0, 1, 1], [], []>} : vector<8x64xf32>, vector<64x64xf32>, vector<8x64xf32> -> vector<8x64xf32>
      %54 = arith.addf %52, %53 : vector<8x64xf32>
      %55 = math.tanh %54 : vector<8x64xf32>
      %56 = vector.extract_strided_slice %13 {offsets = [5, 0, 0], sizes = [1, 8, 64], strides = [1, 1, 1]} : vector<8x8x64xf32> to vector<1x8x64xf32>
      %57 = vector.shape_cast %56 : vector<1x8x64xf32> to vector<8x64xf32>
      %58 = vector.extract_strided_slice %15 {offsets = [2, 0, 0], sizes = [1, 8, 64], strides = [1, 1, 1]} : vector<8x8x64xf32> to vector<1x8x64xf32>
      %59 = vector.shape_cast %58 : vector<1x8x64xf32> to vector<8x64xf32>
      %60 = arith.select %3, %57, %59 : vector<8x64xi1>, vector<8x64xf32>
      %cst_13 = arith.constant dense<0.000000e+00> : vector<8x64xf32>
      %61 = tpu.matmul %55, %0, %cst_13 {dimension_numbers = #tpu.dot_dimension_numbers<[1], [0], [0], [1], [0, 0, 1, 1], [], []>} : vector<8x64xf32>, vector<64x64xf32>, vector<8x64xf32> -> vector<8x64xf32>
      %62 = arith.addf %60, %61 : vector<8x64xf32>
      %63 = math.tanh %62 : vector<8x64xf32>
      %64 = vector.extract_strided_slice %13 {offsets = [6, 0, 0], sizes = [1, 8, 64], strides = [1, 1, 1]} : vector<8x8x64xf32> to vector<1x8x64xf32>
      %65 = vector.shape_cast %64 : vector<1x8x64xf32> to vector<8x64xf32>
      %66 = vector.extract_strided_slice %15 {offsets = [1, 0, 0], sizes = [1, 8, 64], strides = [1, 1, 1]} : vector<8x8x64xf32> to vector<1x8x64xf32>
      %67 = vector.shape_cast %66 : vector<1x8x64xf32> to vector<8x64xf32>
      %68 = arith.select %3, %65, %67 : vector<8x64xi1>, vector<8x64xf32>
      %cst_14 = arith.constant dense<0.000000e+00> : vector<8x64xf32>
      %69 = tpu.matmul %63, %0, %cst_14 {dimension_numbers = #tpu.dot_dimension_numbers<[1], [0], [0], [1], [0, 0, 1, 1], [], []>} : vector<8x64xf32>, vector<64x64xf32>, vector<8x64xf32> -> vector<8x64xf32>
      %70 = arith.addf %68, %69 : vector<8x64xf32>
      %71 = math.tanh %70 : vector<8x64xf32>
      %72 = vector.extract_strided_slice %13 {offsets = [7, 0, 0], sizes = [1, 8, 64], strides = [1, 1, 1]} : vector<8x8x64xf32> to vector<1x8x64xf32>
      %73 = vector.shape_cast %72 : vector<1x8x64xf32> to vector<8x64xf32>
      %74 = vector.extract_strided_slice %15 {offsets = [0, 0, 0], sizes = [1, 8, 64], strides = [1, 1, 1]} : vector<8x8x64xf32> to vector<1x8x64xf32>
      %75 = vector.shape_cast %74 : vector<1x8x64xf32> to vector<8x64xf32>
      %76 = arith.select %3, %73, %75 : vector<8x64xi1>, vector<8x64xf32>
      %cst_15 = arith.constant dense<0.000000e+00> : vector<8x64xf32>
      %77 = tpu.matmul %71, %0, %cst_15 {dimension_numbers = #tpu.dot_dimension_numbers<[1], [0], [0], [1], [0, 0, 1, 1], [], []>} : vector<8x64xf32>, vector<64x64xf32>, vector<8x64xf32> -> vector<8x64xf32>
      %78 = arith.addf %76, %77 : vector<8x64xf32>
      %79 = math.tanh %78 : vector<8x64xf32>
      %80 = vector.extract_strided_slice %23 {offsets = [0, 0], sizes = [8, 32], strides = [1, 1]} : vector<8x64xf32> to vector<8x32xf32>
      %81 = vector.extract_strided_slice %31 {offsets = [0, 0], sizes = [8, 32], strides = [1, 1]} : vector<8x64xf32> to vector<8x32xf32>
      %82 = vector.extract_strided_slice %39 {offsets = [0, 0], sizes = [8, 32], strides = [1, 1]} : vector<8x64xf32> to vector<8x32xf32>
      %83 = vector.extract_strided_slice %47 {offsets = [0, 0], sizes = [8, 32], strides = [1, 1]} : vector<8x64xf32> to vector<8x32xf32>
      %84 = vector.extract_strided_slice %55 {offsets = [0, 0], sizes = [8, 32], strides = [1, 1]} : vector<8x64xf32> to vector<8x32xf32>
      %85 = vector.extract_strided_slice %63 {offsets = [0, 0], sizes = [8, 32], strides = [1, 1]} : vector<8x64xf32> to vector<8x32xf32>
      %86 = vector.extract_strided_slice %71 {offsets = [0, 0], sizes = [8, 32], strides = [1, 1]} : vector<8x64xf32> to vector<8x32xf32>
      %87 = vector.extract_strided_slice %79 {offsets = [0, 0], sizes = [8, 32], strides = [1, 1]} : vector<8x64xf32> to vector<8x32xf32>
      %88 = vector.shape_cast %80 : vector<8x32xf32> to vector<1x8x32xf32>
      %89 = vector.shape_cast %81 : vector<8x32xf32> to vector<1x8x32xf32>
      %90 = vector.shape_cast %82 : vector<8x32xf32> to vector<1x8x32xf32>
      %91 = vector.shape_cast %83 : vector<8x32xf32> to vector<1x8x32xf32>
      %92 = vector.shape_cast %84 : vector<8x32xf32> to vector<1x8x32xf32>
      %93 = vector.shape_cast %85 : vector<8x32xf32> to vector<1x8x32xf32>
      %94 = vector.shape_cast %86 : vector<8x32xf32> to vector<1x8x32xf32>
      %95 = vector.shape_cast %87 : vector<8x32xf32> to vector<1x8x32xf32>
      %96 = tpu.concatenate %88, %89, %90, %91, %92, %93, %94, %95 in 0 : vector<1x8x32xf32>, vector<1x8x32xf32>, vector<1x8x32xf32>, vector<1x8x32xf32>, vector<1x8x32xf32>, vector<1x8x32xf32>, vector<1x8x32xf32>, vector<1x8x32xf32> -> vector<8x8x32xf32>
      %97 = vector.extract_strided_slice %79 {offsets = [0, 32], sizes = [8, 32], strides = [1, 1]} : vector<8x64xf32> to vector<8x32xf32>
      %98 = vector.extract_strided_slice %71 {offsets = [0, 32], sizes = [8, 32], strides = [1, 1]} : vector<8x64xf32> to vector<8x32xf32>
      %99 = vector.extract_strided_slice %63 {offsets = [0, 32], sizes = [8, 32], strides = [1, 1]} : vector<8x64xf32> to vector<8x32xf32>
      %100 = vector.extract_strided_slice %55 {offsets = [0, 32], sizes = [8, 32], strides = [1, 1]} : vector<8x64xf32> to vector<8x32xf32>
      %101 = vector.extract_strided_slice %47 {offsets = [0, 32], sizes = [8, 32], strides = [1, 1]} : vector<8x64xf32> to vector<8x32xf32>
      %102 = vector.extract_strided_slice %39 {offsets = [0, 32], sizes = [8, 32], strides = [1, 1]} : vector<8x64xf32> to vector<8x32xf32>
      %103 = vector.extract_strided_slice %31 {offsets = [0, 32], sizes = [8, 32], strides = [1, 1]} : vector<8x64xf32> to vector<8x32xf32>
      %104 = vector.extract_strided_slice %23 {offsets = [0, 32], sizes = [8, 32], strides = [1, 1]} : vector<8x64xf32> to vector<8x32xf32>
      %105 = vector.shape_cast %97 : vector<8x32xf32> to vector<1x8x32xf32>
      %106 = vector.shape_cast %98 : vector<8x32xf32> to vector<1x8x32xf32>
      %107 = vector.shape_cast %99 : vector<8x32xf32> to vector<1x8x32xf32>
      %108 = vector.shape_cast %100 : vector<8x32xf32> to vector<1x8x32xf32>
      %109 = vector.shape_cast %101 : vector<8x32xf32> to vector<1x8x32xf32>
      %110 = vector.shape_cast %102 : vector<8x32xf32> to vector<1x8x32xf32>
      %111 = vector.shape_cast %103 : vector<8x32xf32> to vector<1x8x32xf32>
      %112 = vector.shape_cast %104 : vector<8x32xf32> to vector<1x8x32xf32>
      %113 = tpu.concatenate %105, %106, %107, %108, %109, %110, %111, %112 in 0 : vector<1x8x32xf32>, vector<1x8x32xf32>, vector<1x8x32xf32>, vector<1x8x32xf32>, vector<1x8x32xf32>, vector<1x8x32xf32>, vector<1x8x32xf32>, vector<1x8x32xf32> -> vector<8x8x32xf32>
      %114 = arith.index_cast %8 : i32 to index
      %c0_16 = arith.constant 0 : index
      %c0_17 = arith.constant 0 : index
      %115 = vector.load %arg3[%114, %c0_16, %c0_17] : memref<16x8x64xf32, #tpu.memory_space<vmem>>, vector<8x8x32xf32>
      tpu.vector_store %arg3[%114, %c0_16, %c0_17], %96 {strides = array<i32>} : memref<16x8x64xf32, #tpu.memory_space<vmem>>, vector<8x8x32xf32>,
      %116 = arith.index_cast %11 : i32 to index
      %c0_18 = arith.constant 0 : index
      %c32 = arith.constant 32 : index
      %117 = vector.load %arg3[%116, %c0_18, %c32] : memref<16x8x64xf32, #tpu.memory_space<vmem>>, vector<8x8x32xf32>
      tpu.vector_store %arg3[%116, %c0_18, %c32], %113 {strides = array<i32>} : memref<16x8x64xf32, #tpu.memory_space<vmem>>, vector<8x8x32xf32>,
      scf.yield %79 : vector<8x64xf32>
    }
    %c2_i32_1 = arith.constant 2 : i32
    return
  }
  func.func @transform_0(%arg0: i32) -> (i32, i32, i32) {
    %c0_i32 = arith.constant 0 : i32
    %c0_i32_0 = arith.constant 0 : i32
    %c0_i32_1 = arith.constant 0 : i32
    return %c0_i32, %arg0, %c0_i32_0 : i32, i32, i32
  }
  func.func @transform_1(%arg0: i32) -> (i32, i32) {
    %c0_i32 = arith.constant 0 : i32
    %c0_i32_0 = arith.constant 0 : i32
    %c0_i32_1 = arith.constant 0 : i32
    return %c0_i32, %c0_i32_0 : i32, i32
  }
  func.func @transform_2(%arg0: i32) -> (i32, i32, i32) {
    %c0_i32 = arith.constant 0 : i32
    %c0_i32_0 = arith.constant 0 : i32
    %c0_i32_1 = arith.constant 0 : i32
    return %c0_i32, %arg0, %c0_i32_0 : i32, i32, i32
  }
}

module attributes {stable_mosaic.version = 11 : i64} {
  func.func @kernel(%arg0: i32, %arg1: memref<8x8x64xf32, #tpu.memory_space<vmem>>, %arg2: memref<64x64xf32, #tpu.memory_space<vmem>>, %arg3: memref<8x8x64xf32, #tpu.memory_space<vmem>>) attributes {dimension_semantics = [#tpu.dimension_semantics<parallel>], iteration_bounds = array<i64: 1>, scalar_prefetch = 0 : i64, scratch_operands = 0 : i64, tpu.core_type = #tpu.core_type<tc>, window_params = [{transform_indices = @transform_0, window_bounds = array<i64: 8, 8, 64>}, {pipeline_mode = #tpu.pipeline_mode<synchronous>, transform_indices = @transform_1, window_bounds = array<i64: 64, 64>}, {transform_indices = @transform_2, window_bounds = array<i64: 8, 8, 64>}]} {
    %c0 = arith.constant 0 : index
    %c0_0 = arith.constant 0 : index
    %0 = vector.load %arg2[%c0, %c0_0] : memref<64x64xf32, #tpu.memory_space<vmem>>, vector<64x64xf32>
    %1 = tpu.iota {dimensions = array<i32: 1>} : vector<8x64xi32>
    %c32_i32 = arith.constant 32 : i32
    %2 = vector.broadcast %c32_i32 : i32 to vector<8x64xi32>
    %3 = arith.cmpi slt, %1, %2 : vector<8x64xi32>
    %cst = arith.constant 0.000000e+00 : f32
    %4 = vector.broadcast %cst : f32 to vector<8x64xf32>
    %c0_i32 = arith.constant 0 : i32
    %c8_i32 = arith.constant 8 : i32
    %5 = arith.muli %c0_i32, %c8_i32 : i32
    %6 = tpu.assume_multiple %5, 8 : i32
    %c0_i32_1 = arith.constant 0 : i32
    %7 = arith.subi %c0_i32_1, %c0_i32 : i32
    %c8_i32_2 = arith.constant 8 : i32
    %8 = arith.muli %7, %c8_i32_2 : i32
    %9 = tpu.assume_multiple %8, 8 : i32
    %10 = arith.index_cast %6 : i32 to index
    %c0_3 = arith.constant 0 : index
    %c0_4 = arith.constant 0 : index
    %11 = vector.load %arg1[%10, %c0_3, %c0_4] : memref<8x8x64xf32, #tpu.memory_space<vmem>>, vector<8x8x64xf32>
    %12 = arith.index_cast %9 : i32 to index
    %c0_5 = arith.constant 0 : index
    %c0_6 = arith.constant 0 : index
    %13 = vector.load %arg1[%12, %c0_5, %c0_6] : memref<8x8x64xf32, #tpu.memory_space<vmem>>, vector<8x8x64xf32>
    %14 = vector.extract_strided_slice %11 {offsets = [0, 0, 0], sizes = [1, 8, 64], strides = [1, 1, 1]} : vector<8x8x64xf32> to vector<1x8x64xf32>
    %15 = vector.shape_cast %14 : vector<1x8x64xf32> to vector<8x64xf32>
    %16 = vector.extract_strided_slice %13 {offsets = [7, 0, 0], sizes = [1, 8, 64], strides = [1, 1, 1]} : vector<8x8x64xf32> to vector<1x8x64xf32>
    %17 = vector.shape_cast %16 : vector<1x8x64xf32> to vector<8x64xf32>
    %18 = arith.select %3, %15, %17 : vector<8x64xi1>, vector<8x64xf32>
    %cst_7 = arith.constant dense<0.000000e+00> : vector<8x64xf32>
    %19 = tpu.matmul %4, %0, %cst_7 {dimension_numbers = #tpu.dot_dimension_numbers<[1], [0], [0], [1], [0, 0, 1, 1], [], []>} : vector<8x64xf32>, vector<64x64xf32>, vector<8x64xf32> -> vector<8x64xf32>
    %20 = arith.addf %18, %19 : vector<8x64xf32>
    %21 = math.tanh %20 : vector<8x64xf32>
    %22 = vector.extract_strided_slice %11 {offsets = [1, 0, 0], sizes = [1, 8, 64], strides = [1, 1, 1]} : vector<8x8x64xf32> to vector<1x8x64xf32>
    %23 = vector.shape_cast %22 : vector<1x8x64xf32> to vector<8x64xf32>
    %24 = vector.extract_strided_slice %13 {offsets = [6, 0, 0], sizes = [1, 8, 64], strides = [1, 1, 1]} : vector<8x8x64xf32> to vector<1x8x64xf32>
    %25 = vector.shape_cast %24 : vector<1x8x64xf32> to vector<8x64xf32>
    %26 = arith.select %3, %23, %25 : vector<8x64xi1>, vector<8x64xf32>
    %cst_8 = arith.constant dense<0.000000e+00> : vector<8x64xf32>
    %27 = tpu.matmul %21, %0, %cst_8 {dimension_numbers = #tpu.dot_dimension_numbers<[1], [0], [0], [1], [0, 0, 1, 1], [], []>} : vector<8x64xf32>, vector<64x64xf32>, vector<8x64xf32> -> vector<8x64xf32>
    %28 = arith.addf %26, %27 : vector<8x64xf32>
    %29 = math.tanh %28 : vector<8x64xf32>
    %30 = vector.extract_strided_slice %11 {offsets = [2, 0, 0], sizes = [1, 8, 64], strides = [1, 1, 1]} : vector<8x8x64xf32> to vector<1x8x64xf32>
    %31 = vector.shape_cast %30 : vector<1x8x64xf32> to vector<8x64xf32>
    %32 = vector.extract_strided_slice %13 {offsets = [5, 0, 0], sizes = [1, 8, 64], strides = [1, 1, 1]} : vector<8x8x64xf32> to vector<1x8x64xf32>
    %33 = vector.shape_cast %32 : vector<1x8x64xf32> to vector<8x64xf32>
    %34 = arith.select %3, %31, %33 : vector<8x64xi1>, vector<8x64xf32>
    %cst_9 = arith.constant dense<0.000000e+00> : vector<8x64xf32>
    %35 = tpu.matmul %29, %0, %cst_9 {dimension_numbers = #tpu.dot_dimension_numbers<[1], [0], [0], [1], [0, 0, 1, 1], [], []>} : vector<8x64xf32>, vector<64x64xf32>, vector<8x64xf32> -> vector<8x64xf32>
    %36 = arith.addf %34, %35 : vector<8x64xf32>
    %37 = math.tanh %36 : vector<8x64xf32>
    %38 = vector.extract_strided_slice %11 {offsets = [3, 0, 0], sizes = [1, 8, 64], strides = [1, 1, 1]} : vector<8x8x64xf32> to vector<1x8x64xf32>
    %39 = vector.shape_cast %38 : vector<1x8x64xf32> to vector<8x64xf32>
    %40 = vector.extract_strided_slice %13 {offsets = [4, 0, 0], sizes = [1, 8, 64], strides = [1, 1, 1]} : vector<8x8x64xf32> to vector<1x8x64xf32>
    %41 = vector.shape_cast %40 : vector<1x8x64xf32> to vector<8x64xf32>
    %42 = arith.select %3, %39, %41 : vector<8x64xi1>, vector<8x64xf32>
    %cst_10 = arith.constant dense<0.000000e+00> : vector<8x64xf32>
    %43 = tpu.matmul %37, %0, %cst_10 {dimension_numbers = #tpu.dot_dimension_numbers<[1], [0], [0], [1], [0, 0, 1, 1], [], []>} : vector<8x64xf32>, vector<64x64xf32>, vector<8x64xf32> -> vector<8x64xf32>
    %44 = arith.addf %42, %43 : vector<8x64xf32>
    %45 = math.tanh %44 : vector<8x64xf32>
    %46 = vector.extract_strided_slice %11 {offsets = [4, 0, 0], sizes = [1, 8, 64], strides = [1, 1, 1]} : vector<8x8x64xf32> to vector<1x8x64xf32>
    %47 = vector.shape_cast %46 : vector<1x8x64xf32> to vector<8x64xf32>
    %48 = vector.extract_strided_slice %13 {offsets = [3, 0, 0], sizes = [1, 8, 64], strides = [1, 1, 1]} : vector<8x8x64xf32> to vector<1x8x64xf32>
    %49 = vector.shape_cast %48 : vector<1x8x64xf32> to vector<8x64xf32>
    %50 = arith.select %3, %47, %49 : vector<8x64xi1>, vector<8x64xf32>
    %cst_11 = arith.constant dense<0.000000e+00> : vector<8x64xf32>
    %51 = tpu.matmul %45, %0, %cst_11 {dimension_numbers = #tpu.dot_dimension_numbers<[1], [0], [0], [1], [0, 0, 1, 1], [], []>} : vector<8x64xf32>, vector<64x64xf32>, vector<8x64xf32> -> vector<8x64xf32>
    %52 = arith.addf %50, %51 : vector<8x64xf32>
    %53 = math.tanh %52 : vector<8x64xf32>
    %54 = vector.extract_strided_slice %11 {offsets = [5, 0, 0], sizes = [1, 8, 64], strides = [1, 1, 1]} : vector<8x8x64xf32> to vector<1x8x64xf32>
    %55 = vector.shape_cast %54 : vector<1x8x64xf32> to vector<8x64xf32>
    %56 = vector.extract_strided_slice %13 {offsets = [2, 0, 0], sizes = [1, 8, 64], strides = [1, 1, 1]} : vector<8x8x64xf32> to vector<1x8x64xf32>
    %57 = vector.shape_cast %56 : vector<1x8x64xf32> to vector<8x64xf32>
    %58 = arith.select %3, %55, %57 : vector<8x64xi1>, vector<8x64xf32>
    %cst_12 = arith.constant dense<0.000000e+00> : vector<8x64xf32>
    %59 = tpu.matmul %53, %0, %cst_12 {dimension_numbers = #tpu.dot_dimension_numbers<[1], [0], [0], [1], [0, 0, 1, 1], [], []>} : vector<8x64xf32>, vector<64x64xf32>, vector<8x64xf32> -> vector<8x64xf32>
    %60 = arith.addf %58, %59 : vector<8x64xf32>
    %61 = math.tanh %60 : vector<8x64xf32>
    %62 = vector.extract_strided_slice %11 {offsets = [6, 0, 0], sizes = [1, 8, 64], strides = [1, 1, 1]} : vector<8x8x64xf32> to vector<1x8x64xf32>
    %63 = vector.shape_cast %62 : vector<1x8x64xf32> to vector<8x64xf32>
    %64 = vector.extract_strided_slice %13 {offsets = [1, 0, 0], sizes = [1, 8, 64], strides = [1, 1, 1]} : vector<8x8x64xf32> to vector<1x8x64xf32>
    %65 = vector.shape_cast %64 : vector<1x8x64xf32> to vector<8x64xf32>
    %66 = arith.select %3, %63, %65 : vector<8x64xi1>, vector<8x64xf32>
    %cst_13 = arith.constant dense<0.000000e+00> : vector<8x64xf32>
    %67 = tpu.matmul %61, %0, %cst_13 {dimension_numbers = #tpu.dot_dimension_numbers<[1], [0], [0], [1], [0, 0, 1, 1], [], []>} : vector<8x64xf32>, vector<64x64xf32>, vector<8x64xf32> -> vector<8x64xf32>
    %68 = arith.addf %66, %67 : vector<8x64xf32>
    %69 = math.tanh %68 : vector<8x64xf32>
    %70 = vector.extract_strided_slice %11 {offsets = [7, 0, 0], sizes = [1, 8, 64], strides = [1, 1, 1]} : vector<8x8x64xf32> to vector<1x8x64xf32>
    %71 = vector.shape_cast %70 : vector<1x8x64xf32> to vector<8x64xf32>
    %72 = vector.extract_strided_slice %13 {offsets = [0, 0, 0], sizes = [1, 8, 64], strides = [1, 1, 1]} : vector<8x8x64xf32> to vector<1x8x64xf32>
    %73 = vector.shape_cast %72 : vector<1x8x64xf32> to vector<8x64xf32>
    %74 = arith.select %3, %71, %73 : vector<8x64xi1>, vector<8x64xf32>
    %cst_14 = arith.constant dense<0.000000e+00> : vector<8x64xf32>
    %75 = tpu.matmul %69, %0, %cst_14 {dimension_numbers = #tpu.dot_dimension_numbers<[1], [0], [0], [1], [0, 0, 1, 1], [], []>} : vector<8x64xf32>, vector<64x64xf32>, vector<8x64xf32> -> vector<8x64xf32>
    %76 = arith.addf %74, %75 : vector<8x64xf32>
    %77 = math.tanh %76 : vector<8x64xf32>
    %78 = vector.extract_strided_slice %21 {offsets = [0, 0], sizes = [8, 32], strides = [1, 1]} : vector<8x64xf32> to vector<8x32xf32>
    %79 = vector.extract_strided_slice %29 {offsets = [0, 0], sizes = [8, 32], strides = [1, 1]} : vector<8x64xf32> to vector<8x32xf32>
    %80 = vector.extract_strided_slice %37 {offsets = [0, 0], sizes = [8, 32], strides = [1, 1]} : vector<8x64xf32> to vector<8x32xf32>
    %81 = vector.extract_strided_slice %45 {offsets = [0, 0], sizes = [8, 32], strides = [1, 1]} : vector<8x64xf32> to vector<8x32xf32>
    %82 = vector.extract_strided_slice %53 {offsets = [0, 0], sizes = [8, 32], strides = [1, 1]} : vector<8x64xf32> to vector<8x32xf32>
    %83 = vector.extract_strided_slice %61 {offsets = [0, 0], sizes = [8, 32], strides = [1, 1]} : vector<8x64xf32> to vector<8x32xf32>
    %84 = vector.extract_strided_slice %69 {offsets = [0, 0], sizes = [8, 32], strides = [1, 1]} : vector<8x64xf32> to vector<8x32xf32>
    %85 = vector.extract_strided_slice %77 {offsets = [0, 0], sizes = [8, 32], strides = [1, 1]} : vector<8x64xf32> to vector<8x32xf32>
    %86 = vector.shape_cast %78 : vector<8x32xf32> to vector<1x8x32xf32>
    %87 = vector.shape_cast %79 : vector<8x32xf32> to vector<1x8x32xf32>
    %88 = vector.shape_cast %80 : vector<8x32xf32> to vector<1x8x32xf32>
    %89 = vector.shape_cast %81 : vector<8x32xf32> to vector<1x8x32xf32>
    %90 = vector.shape_cast %82 : vector<8x32xf32> to vector<1x8x32xf32>
    %91 = vector.shape_cast %83 : vector<8x32xf32> to vector<1x8x32xf32>
    %92 = vector.shape_cast %84 : vector<8x32xf32> to vector<1x8x32xf32>
    %93 = vector.shape_cast %85 : vector<8x32xf32> to vector<1x8x32xf32>
    %94 = tpu.concatenate %86, %87, %88, %89, %90, %91, %92, %93 in 0 : vector<1x8x32xf32>, vector<1x8x32xf32>, vector<1x8x32xf32>, vector<1x8x32xf32>, vector<1x8x32xf32>, vector<1x8x32xf32>, vector<1x8x32xf32>, vector<1x8x32xf32> -> vector<8x8x32xf32>
    %95 = vector.extract_strided_slice %77 {offsets = [0, 32], sizes = [8, 32], strides = [1, 1]} : vector<8x64xf32> to vector<8x32xf32>
    %96 = vector.extract_strided_slice %69 {offsets = [0, 32], sizes = [8, 32], strides = [1, 1]} : vector<8x64xf32> to vector<8x32xf32>
    %97 = vector.extract_strided_slice %61 {offsets = [0, 32], sizes = [8, 32], strides = [1, 1]} : vector<8x64xf32> to vector<8x32xf32>
    %98 = vector.extract_strided_slice %53 {offsets = [0, 32], sizes = [8, 32], strides = [1, 1]} : vector<8x64xf32> to vector<8x32xf32>
    %99 = vector.extract_strided_slice %45 {offsets = [0, 32], sizes = [8, 32], strides = [1, 1]} : vector<8x64xf32> to vector<8x32xf32>
    %100 = vector.extract_strided_slice %37 {offsets = [0, 32], sizes = [8, 32], strides = [1, 1]} : vector<8x64xf32> to vector<8x32xf32>
    %101 = vector.extract_strided_slice %29 {offsets = [0, 32], sizes = [8, 32], strides = [1, 1]} : vector<8x64xf32> to vector<8x32xf32>
    %102 = vector.extract_strided_slice %21 {offsets = [0, 32], sizes = [8, 32], strides = [1, 1]} : vector<8x64xf32> to vector<8x32xf32>
    %103 = vector.shape_cast %95 : vector<8x32xf32> to vector<1x8x32xf32>
    %104 = vector.shape_cast %96 : vector<8x32xf32> to vector<1x8x32xf32>
    %105 = vector.shape_cast %97 : vector<8x32xf32> to vector<1x8x32xf32>
    %106 = vector.shape_cast %98 : vector<8x32xf32> to vector<1x8x32xf32>
    %107 = vector.shape_cast %99 : vector<8x32xf32> to vector<1x8x32xf32>
    %108 = vector.shape_cast %100 : vector<8x32xf32> to vector<1x8x32xf32>
    %109 = vector.shape_cast %101 : vector<8x32xf32> to vector<1x8x32xf32>
    %110 = vector.shape_cast %102 : vector<8x32xf32> to vector<1x8x32xf32>
    %111 = tpu.concatenate %103, %104, %105, %106, %107, %108, %109, %110 in 0 : vector<1x8x32xf32>, vector<1x8x32xf32>, vector<1x8x32xf32>, vector<1x8x32xf32>, vector<1x8x32xf32>, vector<1x8x32xf32>, vector<1x8x32xf32>, vector<1x8x32xf32> -> vector<8x8x32xf32>
    %112 = arith.index_cast %6 : i32 to index
    %c0_15 = arith.constant 0 : index
    %c0_16 = arith.constant 0 : index
    %113 = vector.load %arg3[%112, %c0_15, %c0_16] : memref<8x8x64xf32, #tpu.memory_space<vmem>>, vector<8x8x32xf32>
    tpu.vector_store %arg3[%112, %c0_15, %c0_16], %94 {strides = array<i32>} : memref<8x8x64xf32, #tpu.memory_space<vmem>>, vector<8x8x32xf32>,
    %114 = arith.index_cast %9 : i32 to index
    %c0_17 = arith.constant 0 : index
    %c32 = arith.constant 32 : index
    %115 = vector.load %arg3[%114, %c0_17, %c32] : memref<8x8x64xf32, #tpu.memory_space<vmem>>, vector<8x8x32xf32>
    tpu.vector_store %arg3[%114, %c0_17, %c32], %111 {strides = array<i32>} : memref<8x8x64xf32, #tpu.memory_space<vmem>>, vector<8x8x32xf32>,
    %c1_i32 = arith.constant 1 : i32
    return
  }
  func.func @transform_0(%arg0: i32) -> (i32, i32, i32) {
    %c0_i32 = arith.constant 0 : i32
    %c0_i32_0 = arith.constant 0 : i32
    %c0_i32_1 = arith.constant 0 : i32
    return %c0_i32, %arg0, %c0_i32_0 : i32, i32, i32
  }
  func.func @transform_1(%arg0: i32) -> (i32, i32) {
    %c0_i32 = arith.constant 0 : i32
    %c0_i32_0 = arith.constant 0 : i32
    %c0_i32_1 = arith.constant 0 : i32
    return %c0_i32, %c0_i32_0 : i32, i32
  }
  func.func @transform_2(%arg0: i32) -> (i32, i32, i32) {
    %c0_i32 = arith.constant 0 : i32
    %c0_i32_0 = arith.constant 0 : i32
    %c0_i32_1 = arith.constant 0 : i32
    return %c0_i32, %arg0, %c0_i32_0 : i32, i32, i32
  }
}

module attributes {stable_mosaic.version = 11 : i64} {
  func.func @kernel(%arg0: i32, %arg1: memref<8x8x64xf32, #tpu.memory_space<vmem>>, %arg2: memref<16x8x64xf32, #tpu.memory_space<vmem>>, %arg3: memref<8x8x1xf32, #tpu.memory_space<vmem>>, %arg4: memref<16x8x1xf32, #tpu.memory_space<vmem>>, %arg5: memref<1x64xf32, #tpu.memory_space<vmem>>, %arg6: memref<1x1xf32, #tpu.memory_space<vmem>>, %arg7: memref<1x64xf32, #tpu.memory_space<vmem>>, %arg8: memref<1x1xf32, #tpu.memory_space<vmem>>, %arg9: memref<64x64xf32, #tpu.memory_space<vmem>>, %arg10: memref<64x64xf32, #tpu.memory_space<vmem>>, %arg11: memref<1x64xf32, #tpu.memory_space<vmem>>, %arg12: memref<64x2xf32, #tpu.memory_space<vmem>>, %arg13: memref<1x2xf32, #tpu.memory_space<vmem>>, %arg14: memref<8x2xf32, #tpu.memory_space<vmem>>) attributes {dimension_semantics = [#tpu.dimension_semantics<arbitrary>], iteration_bounds = array<i64: 1>, scalar_prefetch = 0 : i64, scratch_operands = 0 : i64, tpu.core_type = #tpu.core_type<tc>, window_params = [{pipeline_mode = #tpu.pipeline_mode<synchronous>, transform_indices = @transform_0, window_bounds = array<i64: 8, 8, 64>}, {pipeline_mode = #tpu.pipeline_mode<synchronous>, transform_indices = @transform_1, window_bounds = array<i64: 16, 8, 64>}, {pipeline_mode = #tpu.pipeline_mode<synchronous>, transform_indices = @transform_2, window_bounds = array<i64: 8, 8, 1>}, {pipeline_mode = #tpu.pipeline_mode<synchronous>, transform_indices = @transform_3, window_bounds = array<i64: 16, 8, 1>}, {pipeline_mode = #tpu.pipeline_mode<synchronous>, transform_indices = @transform_4, window_bounds = array<i64: 1, 64>}, {pipeline_mode = #tpu.pipeline_mode<synchronous>, transform_indices = @transform_5, window_bounds = array<i64: 1, 1>}, {pipeline_mode = #tpu.pipeline_mode<synchronous>, transform_indices = @transform_6, window_bounds = array<i64: 1, 64>}, {pipeline_mode = #tpu.pipeline_mode<synchronous>, transform_indices = @transform_7, window_bounds = array<i64: 1, 1>}, {pipeline_mode = #tpu.pipeline_mode<synchronous>, transform_indices = @transform_8, window_bounds = array<i64: 64, 64>}, {pipeline_mode = #tpu.pipeline_mode<synchronous>, transform_indices = @transform_9, window_bounds = array<i64: 64, 64>}, {pipeline_mode = #tpu.pipeline_mode<synchronous>, transform_indices = @transform_10, window_bounds = array<i64: 1, 64>}, {pipeline_mode = #tpu.pipeline_mode<synchronous>, transform_indices = @transform_11, window_bounds = array<i64: 64, 2>}, {pipeline_mode = #tpu.pipeline_mode<synchronous>, transform_indices = @transform_12, window_bounds = array<i64: 1, 2>}, {pipeline_mode = #tpu.pipeline_mode<synchronous>, transform_indices = @transform_13, window_bounds = array<i64: 8, 2>}]} {
    %c0 = arith.constant 0 : index
    %c0_0 = arith.constant 0 : index
    %c0_1 = arith.constant 0 : index
    %0 = vector.load %arg1[%c0, %c0_0, %c0_1] : memref<8x8x64xf32, #tpu.memory_space<vmem>>, vector<8x8x64xf32>
    %c0_2 = arith.constant 0 : index
    %c0_3 = arith.constant 0 : index
    %c0_4 = arith.constant 0 : index
    %1 = vector.load %arg2[%c0_2, %c0_3, %c0_4] : memref<16x8x64xf32, #tpu.memory_space<vmem>>, vector<16x8x64xf32>
    %c0_5 = arith.constant 0 : index
    %c0_6 = arith.constant 0 : index
    %2 = vector.load %arg5[%c0_5, %c0_6] : memref<1x64xf32, #tpu.memory_space<vmem>>, vector<1x64xf32>
    %3 = vector.shape_cast %2 : vector<1x64xf32> to vector<1x1x64xf32>
    %4 = vector.broadcast %3 : vector<1x1x64xf32> to vector<8x8x64xf32>
    %5 = arith.mulf %0, %4 : vector<8x8x64xf32>
    %cst = arith.constant dense<0.000000e+00> : vector<8x8xf32>
    %6 = vector.multi_reduction <add>, %5, %cst [2] : vector<8x8x64xf32> to vector<8x8xf32>
    %7 = vector.shape_cast %6 : vector<8x8xf32> to vector<8x8x1xf32>
    %c0_7 = arith.constant 0 : index
    %c0_8 = arith.constant 0 : index
    %8 = vector.load %arg6[%c0_7, %c0_8] : memref<1x1xf32, #tpu.memory_space<vmem>>, vector<1x1xf32>
    %9 = vector.shape_cast %8 : vector<1x1xf32> to vector<1x1x1xf32>
    %10 = vector.broadcast %9 : vector<1x1x1xf32> to vector<8x8x1xf32>
    %11 = arith.addf %7, %10 : vector<8x8x1xf32>
    %c0_9 = arith.constant 0 : index
    %c0_10 = arith.constant 0 : index
    %12 = vector.load %arg7[%c0_9, %c0_10] : memref<1x64xf32, #tpu.memory_space<vmem>>, vector<1x64xf32>
    %13 = vector.shape_cast %12 : vector<1x64xf32> to vector<1x1x64xf32>
    %14 = vector.broadcast %13 : vector<1x1x64xf32> to vector<16x8x64xf32>
    %15 = arith.mulf %1, %14 : vector<16x8x64xf32>
    %cst_11 = arith.constant dense<0.000000e+00> : vector<16x8xf32>
    %16 = vector.multi_reduction <add>, %15, %cst_11 [2] : vector<16x8x64xf32> to vector<16x8xf32>
    %17 = vector.shape_cast %16 : vector<16x8xf32> to vector<16x8x1xf32>
    %c0_12 = arith.constant 0 : index
    %c0_13 = arith.constant 0 : index
    %18 = vector.load %arg8[%c0_12, %c0_13] : memref<1x1xf32, #tpu.memory_space<vmem>>, vector<1x1xf32>
    %19 = vector.shape_cast %18 : vector<1x1xf32> to vector<1x1x1xf32>
    %20 = vector.broadcast %19 : vector<1x1x1xf32> to vector<16x8x1xf32>
    %21 = arith.addf %17, %20 : vector<16x8x1xf32>
    %c0_14 = arith.constant 0 : index
    %c0_15 = arith.constant 0 : index
    %c0_16 = arith.constant 0 : index
    %22 = vector.load %arg3[%c0_14, %c0_15, %c0_16] : memref<8x8x1xf32, #tpu.memory_space<vmem>>, vector<8x8x1xf32>
    %cst_17 = arith.constant 0.000000e+00 : f32
    %23 = vector.broadcast %cst_17 : f32 to vector<8x8x1xf32>
    %24 = arith.cmpf ogt, %22, %23 : vector<8x8x1xf32>
    %cst_18 = arith.constant -1.000000e+30 : f32
    %25 = vector.broadcast %cst_18 : f32 to vector<8x8x1xf32>
    %26 = arith.select %24, %25, %11 : vector<8x8x1xi1>, vector<8x8x1xf32>
    %c0_19 = arith.constant 0 : index
    %c0_20 = arith.constant 0 : index
    %c0_21 = arith.constant 0 : index
    %27 = vector.load %arg4[%c0_19, %c0_20, %c0_21] : memref<16x8x1xf32, #tpu.memory_space<vmem>>, vector<16x8x1xf32>
    %cst_22 = arith.constant 0.000000e+00 : f32
    %28 = vector.broadcast %cst_22 : f32 to vector<16x8x1xf32>
    %29 = arith.cmpf ogt, %27, %28 : vector<16x8x1xf32>
    %cst_23 = arith.constant -1.000000e+30 : f32
    %30 = vector.broadcast %cst_23 : f32 to vector<16x8x1xf32>
    %31 = arith.select %29, %30, %21 : vector<16x8x1xi1>, vector<16x8x1xf32>
    %cst_24 = arith.constant dense<0xFF800000> : vector<8x1xf32>
    %32 = vector.multi_reduction <maximumf>, %26, %cst_24 [0] : vector<8x8x1xf32> to vector<8x1xf32>
    %33 = vector.shape_cast %32 : vector<8x1xf32> to vector<1x8x1xf32>
    %34 = vector.broadcast %33 : vector<1x8x1xf32> to vector<8x8x1xf32>
    %35 = arith.subf %26, %34 : vector<8x8x1xf32>
    %36 = math.exp %35 : vector<8x8x1xf32>
    %cst_25 = arith.constant dense<0.000000e+00> : vector<8x1xf32>
    %37 = vector.multi_reduction <add>, %36, %cst_25 [0] : vector<8x8x1xf32> to vector<8x1xf32>
    %38 = vector.shape_cast %37 : vector<8x1xf32> to vector<1x8x1xf32>
    %39 = vector.broadcast %38 : vector<1x8x1xf32> to vector<8x8x1xf32>
    %40 = arith.divf %36, %39 : vector<8x8x1xf32>
    %cst_26 = arith.constant dense<0xFF800000> : vector<8x1xf32>
    %41 = vector.multi_reduction <maximumf>, %31, %cst_26 [0] : vector<16x8x1xf32> to vector<8x1xf32>
    %42 = vector.shape_cast %41 : vector<8x1xf32> to vector<1x8x1xf32>
    %43 = vector.broadcast %42 : vector<1x8x1xf32> to vector<16x8x1xf32>
    %44 = arith.subf %31, %43 : vector<16x8x1xf32>
    %45 = math.exp %44 : vector<16x8x1xf32>
    %cst_27 = arith.constant dense<0.000000e+00> : vector<8x1xf32>
    %46 = vector.multi_reduction <add>, %45, %cst_27 [0] : vector<16x8x1xf32> to vector<8x1xf32>
    %47 = vector.shape_cast %46 : vector<8x1xf32> to vector<1x8x1xf32>
    %48 = vector.broadcast %47 : vector<1x8x1xf32> to vector<16x8x1xf32>
    %49 = arith.divf %45, %48 : vector<16x8x1xf32>
    %50 = vector.broadcast %40 : vector<8x8x1xf32> to vector<8x8x64xf32>
    %51 = arith.mulf %50, %0 : vector<8x8x64xf32>
    %cst_28 = arith.constant dense<0.000000e+00> : vector<8x64xf32>
    %52 = vector.multi_reduction <add>, %51, %cst_28 [0] : vector<8x8x64xf32> to vector<8x64xf32>
    %53 = vector.broadcast %49 : vector<16x8x1xf32> to vector<16x8x64xf32>
    %54 = arith.mulf %53, %1 : vector<16x8x64xf32>
    %cst_29 = arith.constant dense<0.000000e+00> : vector<8x64xf32>
    %55 = vector.multi_reduction <add>, %54, %cst_29 [0] : vector<16x8x64xf32> to vector<8x64xf32>
    %c0_30 = arith.constant 0 : index
    %c0_31 = arith.constant 0 : index
    %56 = vector.load %arg9[%c0_30, %c0_31] : memref<64x64xf32, #tpu.memory_space<vmem>>, vector<64x64xf32>
    %cst_32 = arith.constant dense<0.000000e+00> : vector<8x64xf32>
    %57 = tpu.matmul %52, %56, %cst_32 {dimension_numbers = #tpu.dot_dimension_numbers<[1], [0], [0], [1], [0, 0, 1, 1], [], []>} : vector<8x64xf32>, vector<64x64xf32>, vector<8x64xf32> -> vector<8x64xf32>
    %c0_33 = arith.constant 0 : index
    %c0_34 = arith.constant 0 : index
    %58 = vector.load %arg10[%c0_33, %c0_34] : memref<64x64xf32, #tpu.memory_space<vmem>>, vector<64x64xf32>
    %cst_35 = arith.constant dense<0.000000e+00> : vector<8x64xf32>
    %59 = tpu.matmul %55, %58, %cst_35 {dimension_numbers = #tpu.dot_dimension_numbers<[1], [0], [0], [1], [0, 0, 1, 1], [], []>} : vector<8x64xf32>, vector<64x64xf32>, vector<8x64xf32> -> vector<8x64xf32>
    %60 = arith.addf %57, %59 : vector<8x64xf32>
    %c0_36 = arith.constant 0 : index
    %c0_37 = arith.constant 0 : index
    %61 = vector.load %arg11[%c0_36, %c0_37] : memref<1x64xf32, #tpu.memory_space<vmem>>, vector<1x64xf32>
    %62 = vector.broadcast %61 : vector<1x64xf32> to vector<8x64xf32>
    %63 = arith.addf %60, %62 : vector<8x64xf32>
    %cst_38 = arith.constant 0.000000e+00 : f32
    %64 = vector.broadcast %cst_38 : f32 to vector<8x64xf32>
    %65 = arith.maximumf %63, %64 : vector<8x64xf32>
    %c0_39 = arith.constant 0 : index
    %c0_40 = arith.constant 0 : index
    %66 = vector.load %arg12[%c0_39, %c0_40] : memref<64x2xf32, #tpu.memory_space<vmem>>, vector<64x2xf32>
    %cst_41 = arith.constant dense<0.000000e+00> : vector<8x2xf32>
    %67 = tpu.matmul %65, %66, %cst_41 {dimension_numbers = #tpu.dot_dimension_numbers<[1], [0], [0], [1], [0, 0, 1, 1], [], []>} : vector<8x64xf32>, vector<64x2xf32>, vector<8x2xf32> -> vector<8x2xf32>
    %c0_42 = arith.constant 0 : index
    %c0_43 = arith.constant 0 : index
    %68 = vector.load %arg13[%c0_42, %c0_43] : memref<1x2xf32, #tpu.memory_space<vmem>>, vector<1x2xf32>
    %69 = vector.broadcast %68 : vector<1x2xf32> to vector<8x2xf32>
    %70 = arith.addf %67, %69 : vector<8x2xf32>
    %cst_44 = arith.constant dense<0xFF800000> : vector<8xf32>
    %71 = vector.multi_reduction <maximumf>, %70, %cst_44 [1] : vector<8x2xf32> to vector<8xf32>
    %72 = vector.shape_cast %71 : vector<8xf32> to vector<8x1xf32>
    %73 = vector.broadcast %72 : vector<8x1xf32> to vector<8x2xf32>
    %74 = arith.subf %70, %73 : vector<8x2xf32>
    %75 = math.exp %74 : vector<8x2xf32>
    %cst_45 = arith.constant dense<0.000000e+00> : vector<8xf32>
    %76 = vector.multi_reduction <add>, %75, %cst_45 [1] : vector<8x2xf32> to vector<8xf32>
    %77 = vector.shape_cast %76 : vector<8xf32> to vector<8x1xf32>
    %78 = vector.broadcast %77 : vector<8x1xf32> to vector<8x2xf32>
    %79 = arith.divf %75, %78 : vector<8x2xf32>
    %c0_46 = arith.constant 0 : index
    %c0_47 = arith.constant 0 : index
    %80 = vector.load %arg14[%c0_46, %c0_47] : memref<8x2xf32, #tpu.memory_space<vmem>>, vector<8x2xf32>
    tpu.vector_store %arg14[%c0_46, %c0_47], %79 {strides = array<i32>} : memref<8x2xf32, #tpu.memory_space<vmem>>, vector<8x2xf32>,
    return
  }
  func.func @transform_0(%arg0: i32) -> (i32, i32, i32) {
    %c0_i32 = arith.constant 0 : i32
    %c0_i32_0 = arith.constant 0 : i32
    %c0_i32_1 = arith.constant 0 : i32
    %c0_i32_2 = arith.constant 0 : i32
    return %c0_i32, %c0_i32_0, %c0_i32_1 : i32, i32, i32
  }
  func.func @transform_1(%arg0: i32) -> (i32, i32, i32) {
    %c0_i32 = arith.constant 0 : i32
    %c0_i32_0 = arith.constant 0 : i32
    %c0_i32_1 = arith.constant 0 : i32
    %c0_i32_2 = arith.constant 0 : i32
    return %c0_i32, %c0_i32_0, %c0_i32_1 : i32, i32, i32
  }
  func.func @transform_2(%arg0: i32) -> (i32, i32, i32) {
    %c0_i32 = arith.constant 0 : i32
    %c0_i32_0 = arith.constant 0 : i32
    %c0_i32_1 = arith.constant 0 : i32
    %c0_i32_2 = arith.constant 0 : i32
    return %c0_i32, %c0_i32_0, %c0_i32_1 : i32, i32, i32
  }
  func.func @transform_3(%arg0: i32) -> (i32, i32, i32) {
    %c0_i32 = arith.constant 0 : i32
    %c0_i32_0 = arith.constant 0 : i32
    %c0_i32_1 = arith.constant 0 : i32
    %c0_i32_2 = arith.constant 0 : i32
    return %c0_i32, %c0_i32_0, %c0_i32_1 : i32, i32, i32
  }
  func.func @transform_4(%arg0: i32) -> (i32, i32) {
    %c0_i32 = arith.constant 0 : i32
    %c0_i32_0 = arith.constant 0 : i32
    %c0_i32_1 = arith.constant 0 : i32
    return %c0_i32, %c0_i32_0 : i32, i32
  }
  func.func @transform_5(%arg0: i32) -> (i32, i32) {
    %c0_i32 = arith.constant 0 : i32
    %c0_i32_0 = arith.constant 0 : i32
    %c0_i32_1 = arith.constant 0 : i32
    return %c0_i32, %c0_i32_0 : i32, i32
  }
  func.func @transform_6(%arg0: i32) -> (i32, i32) {
    %c0_i32 = arith.constant 0 : i32
    %c0_i32_0 = arith.constant 0 : i32
    %c0_i32_1 = arith.constant 0 : i32
    return %c0_i32, %c0_i32_0 : i32, i32
  }
  func.func @transform_7(%arg0: i32) -> (i32, i32) {
    %c0_i32 = arith.constant 0 : i32
    %c0_i32_0 = arith.constant 0 : i32
    %c0_i32_1 = arith.constant 0 : i32
    return %c0_i32, %c0_i32_0 : i32, i32
  }
  func.func @transform_8(%arg0: i32) -> (i32, i32) {
    %c0_i32 = arith.constant 0 : i32
    %c0_i32_0 = arith.constant 0 : i32
    %c0_i32_1 = arith.constant 0 : i32
    return %c0_i32, %c0_i32_0 : i32, i32
  }
  func.func @transform_9(%arg0: i32) -> (i32, i32) {
    %c0_i32 = arith.constant 0 : i32
    %c0_i32_0 = arith.constant 0 : i32
    %c0_i32_1 = arith.constant 0 : i32
    return %c0_i32, %c0_i32_0 : i32, i32
  }
  func.func @transform_10(%arg0: i32) -> (i32, i32) {
    %c0_i32 = arith.constant 0 : i32
    %c0_i32_0 = arith.constant 0 : i32
    %c0_i32_1 = arith.constant 0 : i32
    return %c0_i32, %c0_i32_0 : i32, i32
  }
  func.func @transform_11(%arg0: i32) -> (i32, i32) {
    %c0_i32 = arith.constant 0 : i32
    %c0_i32_0 = arith.constant 0 : i32
    %c0_i32_1 = arith.constant 0 : i32
    return %c0_i32, %c0_i32_0 : i32, i32
  }
  func.func @transform_12(%arg0: i32) -> (i32, i32) {
    %c0_i32 = arith.constant 0 : i32
    %c0_i32_0 = arith.constant 0 : i32
    %c0_i32_1 = arith.constant 0 : i32
    return %c0_i32, %c0_i32_0 : i32, i32
  }
  func.func @transform_13(%arg0: i32) -> (i32, i32) {
    %c0_i32 = arith.constant 0 : i32
    %c0_i32_0 = arith.constant 0 : i32
    %c0_i32_1 = arith.constant 0 : i32
    return %c0_i32, %c0_i32_0 : i32, i32
  }
}

</mosaic_0001>

<bundles_post_ra>
// kernel: _lambda_.9
= control target key start
LH: loop header
LB: loop body
LE: loop exit
PB: predicated region body
PF: predicated region fallthrough
CT: control target
= control target key end

     0   :  { %vm50_vm0 = vcmask 261120   ;;  %vm128_vm1 = vcmask 523264   ;;  %s261_s1 = inlined_call_operand.vmem [shape: bf16[32,64], index: 1, kind: input, shape index: {}]   ;;  %s262_s0 = inlined_call_operand.vmem [shape: f32[64,32], index: 0, kind: input, shape index: {}]   ;;  %s263_s2 = inlined_call_operand.vmem [shape: f32[1,64], index: 2, kind: input, shape index: {}]   ;;  %s264_s3 = inlined_call_operand.vmem [shape: f32[64,64], index: 3, kind: output, shape index: {}]  }
   0x1   :  { %v170_v0 = vld [vmem:[%s261_s1 + $0x8] sm:$0xff]   ;;  %v171_v1 = vld [vmem:[%s261_s1] sm:$0xff]   ;;  %v17_v7 = vld [vmem:[%s262_s0 + $0x10] sm:$0xff] }
   0x2   :  { %154 = vmatprep.subr.bf16.mxu0 %v170_v0  ;;  %166 = vmatprep.subr.bf16.mxu1 %v170_v0  ;;  %v15_v2 = vld [vmem:[%s262_s0] sm:$0xff]  ;;  %v16_v3 = vld [vmem:[%s262_s0 + $0x8] sm:$0xff]  ;;  %v18_v8 = vld [vmem:[%s262_s0 + $0x18] sm:$0xff] }
   0x3   :  { %v19_v4 = vld [vmem:[%s262_s0 + $0x20] sm:$0xff]  ;;  %155 = vmatpush3.bf16.msra.mxu0 %v170_v0  ;;  %168 = vmatpush3.bf16.msra.mxu1 %v170_v0  ;;  %v23_v5 = vpack.c.bf16 %v16_v3, %v15_v2  ;;  %v20_v6 = vld [vmem:[%s262_s0 + $0x28] sm:$0xff]  ;;  %v21_v10 = vld [vmem:[%s262_s0 + $0x30] sm:$0xff]  ;;  %v24_v12 = vpack.c.bf16 %v18_v8, %v17_v7 }
   0x4   :  { %156 = vmatprep.subr.bf16.mxu0 %v171_v1  ;;  %167 = vmatprep.subr.bf16.mxu1 %v171_v1  ;;  %v25_v9 = vpack.c.bf16 %v20_v6, %v19_v4  ;;  %v22_v11 = vld [vmem:[%s262_s0 + $0x38] sm:$0xff]  ;;  %v141_v14 = vld [vmem:[%s263_s2] ss:$0 sm:$0xff] }
   0x5   :  { %158 = vmatprep.mubr.msk.bf16.mxu0 %vm50_vm0, %v23_v5  ;;  %v26_v13 = vpack.c.bf16 %v22_v11, %v21_v10 }
   0x6   :  { %162 = vmatprep.mubr.msk.bf16.mxu1 %vm50_vm0, %v25_v9 }
   0x7   :  { %157 = vmatpush3.bf16.msra.mxu0 %v171_v1  ;;  %169 = vmatpush3.bf16.msra.mxu1 %v171_v1 }
   0xa   :  { %159 = vmatmul.mubr.msk.bf16.vlgmr.msra.gmra.mxu0 %vm50_vm0, %v24_v12  ;;  %163 = vmatmul.mubr.msk.bf16.vlgmr.msra.gmra.mxu1 %vm50_vm0, %v26_v13 }
  0xca   :  { %v160_v15 = vpop.f32.mrf.mxu0  ;;  %v164_v16 = vpop.f32.mrf.mxu1 }
  0xcb   :  { %v106_v17 = vadd.f32 %v160_v15, %v141_v14  ;;  %v122_v18 = vadd.f32 %v164_v16, %v141_v14 }
  0xcc   :  { %v97_v19 = vpop.f32.mrf.mxu0  ;;  %v113_v20 = vpop.f32.mrf.mxu1 }
  0xcd   :  { %131 = vst.msk [vmem:[%s264_s3 + $0x10] sm:$0xff] %vm128_vm1, %v106_v17  ;;  %135 = vst.msk [vmem:[%s264_s3 + $0x30] sm:$0xff] %vm128_vm1, %v122_v18  ;;  %v98_v21 = vadd.f32 %v141_v14, %v97_v19  ;;  %v114_v22 = vadd.f32 %v141_v14, %v113_v20 }
  0xce   :  { %v161_v23 = vpop.f32.mrf.mxu0  ;;  %v165_v24 = vpop.f32.mrf.mxu1 }
  0xcf   :  { %129 = vst.msk [vmem:[%s264_s3] sm:$0xff] %vm128_vm1, %v98_v21  ;;  %133 = vst.msk [vmem:[%s264_s3 + $0x20] sm:$0xff] %vm128_vm1, %v114_v22  ;;  %v109_v25 = vadd.f32 %v161_v23, %v141_v14  ;;  %v125_v26 = vadd.f32 %v165_v24, %v141_v14 }
  0xd0   :  { %v100_v27 = vpop.f32.mrf.mxu0  ;;  %v116_v28 = vpop.f32.mrf.mxu1 }
  0xd1   :  { %132 = vst.msk [vmem:[%s264_s3 + $0x18] sm:$0xff] %vm128_vm1, %v109_v25  ;;  %136 = vst.msk [vmem:[%s264_s3 + $0x38] sm:$0xff] %vm128_vm1, %v125_v26  ;;  %v101_v29 = vadd.f32 %v141_v14, %v100_v27  ;;  %v117_v30 = vadd.f32 %v141_v14, %v116_v28 }
  0xd3   :  { %130 = vst.msk [vmem:[%s264_s3 + $0x8] sm:$0xff] %vm128_vm1, %v101_v29  ;;  %134 = vst.msk [vmem:[%s264_s3 + $0x28] sm:$0xff] %vm128_vm1, %v117_v30 }

// kernel: _lambda_.7
= control target key start
LH: loop header
LB: loop body
LE: loop exit
PB: predicated region body
PF: predicated region fallthrough
CT: control target
= control target key end

     0   :  { %vm107_vm0 = vcmask 1041408   ;;  %vm82_vm1 = vcmask 556032   ;;  %vm208_vm2 = vcmask 523264   ;;  %s457_s1 = inlined_call_operand.vmem [shape: bf16[68,64], index: 1, kind: input, shape index: {}]   ;;  %s458_s0 = inlined_call_operand.vmem [shape: f32[128,68], index: 0, kind: input, shape index: {}]   ;;  %s459_s2 = inlined_call_operand.vmem [shape: f32[1,64], index: 2, kind: input, shape index: {}]   ;;  %s460_s3 = inlined_call_operand.vmem [shape: f32[128,64], index: 3, kind: output, shape index: {}]  }
   0x1   :  { %v294_v0 = vld [vmem:[%s457_s1 + $0x20] ss:$0 sps:$4 sm:$0x33]   ;;  %v295_v1 = vld [vmem:[%s457_s1 + $0x18] sm:$0xff]   ;;  %v296_v3 = vld [vmem:[%s457_s1 + $0x10] sm:$0xff]  }
   0x2   :  { %292 = vmatprep.subr.msk.bf16.mxu0 %vm107_vm0, %v294_v0  ;;  %293 = vmatprep.subr.msk.bf16.mxu1 %vm107_vm0, %v294_v0  ;;  %v109_v2 = vsel %vm107_vm0, %v294_v0, 0  ;;  %v15_v4 = vld [vmem:[%s458_s0] sm:$0xff]  ;;  %v16_v5 = vld [vmem:[%s458_s0 + $0x8] sm:$0xff]  ;;  %v17_v12 = vld [vmem:[%s458_s0 + $0x10] sm:$0xff] }
   0x3   :  { %257 = vmatpush3.bf16.msra.mxu0 %v109_v2  ;;  %287 = vmatpush3.bf16.msra.mxu1 %v109_v2  ;;  %v23_v6 = vld [vmem:[%s458_s0 + $0x40] sm:$0xff]  ;;  %v24_v7 = vld [vmem:[%s458_s0 + $0x48] sm:$0xff]  ;;  %v31_v8 = vpack.c.bf16 %v16_v5, %v15_v4  ;;  %v18_v13 = vld [vmem:[%s458_s0 + $0x18] sm:$0xff] }
   0x4   :  { %258 = vmatprep.subr.bf16.mxu0 %v295_v1  ;;  %283 = vmatprep.subr.bf16.mxu1 %v295_v1  ;;  %v35_v9 = vpack.c.bf16 %v24_v7, %v23_v6  ;;  %v297_v10 = vld [vmem:[%s457_s1 + $0x8] sm:$0xff]   ;;  %v298_v11 = vld [vmem:[%s457_s1] sm:$0xff]   ;;  %v25_v14 = vld [vmem:[%s458_s0 + $0x50] sm:$0xff]  ;;  %v32_v20 = vpack.c.bf16 %v18_v13, %v17_v12 }
   0x5   :  { %266 = vmatprep.mubr.msk.bf16.mxu0 %vm82_vm1, %v31_v8  ;;  %v26_v15 = vld [vmem:[%s458_s0 + $0x58] sm:$0xff]  ;;  %v19_v16 = vld [vmem:[%s458_s0 + $0x20] sm:$0xff]  ;;  %v20_v17 = vld [vmem:[%s458_s0 + $0x28] sm:$0xff] }
   0x6   :  { %274 = vmatprep.mubr.msk.bf16.mxu1 %vm82_vm1, %v35_v9  ;;  %v27_v18 = vld [vmem:[%s458_s0 + $0x60] sm:$0xff]  ;;  %v28_v19 = vld [vmem:[%s458_s0 + $0x68] sm:$0xff]  ;;  %v36_v21 = vpack.c.bf16 %v26_v15, %v25_v14  ;;  %v33_v22 = vpack.c.bf16 %v20_v17, %v19_v16  ;;  %v21_v24 = vld [vmem:[%s458_s0 + $0x30] sm:$0xff] }
   0x7   :  { %259 = vmatpush3.bf16.msra.mxu0 %v295_v1  ;;  %288 = vmatpush3.bf16.msra.mxu1 %v295_v1  ;;  %v37_v23 = vpack.c.bf16 %v28_v19, %v27_v18  ;;  %v22_v25 = vld [vmem:[%s458_s0 + $0x38] sm:$0xff]  ;;  %v29_v26 = vld [vmem:[%s458_s0 + $0x70] sm:$0xff]  ;;  %v229_v30 = vld [vmem:[%s459_s2] ss:$0 sm:$0xff] }
   0x8   :  { %260 = vmatprep.subr.bf16.mxu0 %v296_v3  ;;  %284 = vmatprep.subr.bf16.mxu1 %v296_v3  ;;  %v30_v27 = vld [vmem:[%s458_s0 + $0x78] sm:$0xff]  ;;  %v34_v28 = vpack.c.bf16 %v22_v25, %v21_v24 }
   0x9   :  { %v38_v29 = vpack.c.bf16 %v30_v27, %v29_v26 }
   0xb   :  { %261 = vmatpush3.bf16.msra.mxu0 %v296_v3  ;;  %289 = vmatpush3.bf16.msra.mxu1 %v296_v3 }
   0xc   :  { %262 = vmatprep.subr.bf16.mxu0 %v297_v10  ;;  %285 = vmatprep.subr.bf16.mxu1 %v297_v10 }
   0xf   :  { %263 = vmatpush3.bf16.msra.mxu0 %v297_v10  ;;  %290 = vmatpush3.bf16.msra.mxu1 %v297_v10 }
  0x10   :  { %264 = vmatprep.subr.bf16.mxu0 %v298_v11  ;;  %286 = vmatprep.subr.bf16.mxu1 %v298_v11 }
  0x13   :  { %265 = vmatpush3.bf16.msra.mxu0 %v298_v11  ;;  %291 = vmatpush3.bf16.msra.mxu1 %v298_v11 }
  0x16   :  { %267 = vmatmul.mubr.msk.bf16.vlgmr.msra.gmra.mxu0 %vm82_vm1, %v32_v20  ;;  %275 = vmatmul.mubr.msk.bf16.vlgmr.msra.gmra.mxu1 %vm82_vm1, %v36_v21 }
  0x17   :  { %270 = vmatprep.mubr.msk.bf16.mxu0 %vm82_vm1, %v33_v22  ;;  %278 = vmatprep.mubr.msk.bf16.mxu1 %vm82_vm1, %v37_v23 }
  0x1e   :  { %271 = vmatmul.mubr.msk.bf16.gmra.mxu0 %vm82_vm1, %v34_v28  ;;  %279 = vmatmul.mubr.msk.bf16.gmra.mxu1 %vm82_vm1, %v38_v29 }
  0xd6   :  { %v268_v31 = vpop.f32.mrf.mxu0  ;;  %v276_v32 = vpop.f32.mrf.mxu1 }
  0xd7   :  { %v154_v33 = vadd.f32 %v268_v31, %v229_v30  ;;  %v186_v34 = vadd.f32 %v276_v32, %v229_v30 }
  0xd8   :  { %v145_v35 = vpop.f32.mrf.mxu0  ;;  %v177_v36 = vpop.f32.mrf.mxu1 }
  0xd9   :  { %211 = vst.msk [vmem:[%s460_s3 + $0x10] sm:$0xff] %vm208_vm2, %v154_v33  ;;  %219 = vst.msk [vmem:[%s460_s3 + $0x50] sm:$0xff] %vm208_vm2, %v186_v34  ;;  %v146_v37 = vadd.f32 %v229_v30, %v145_v35  ;;  %v178_v38 = vadd.f32 %v229_v30, %v177_v36 }
  0xda   :  { %v269_v39 = vpop.f32.mrf.mxu0  ;;  %v277_v40 = vpop.f32.mrf.mxu1 }
  0xdb   :  { %209 = vst.msk [vmem:[%s460_s3] sm:$0xff] %vm208_vm2, %v146_v37  ;;  %217 = vst.msk [vmem:[%s460_s3 + $0x40] sm:$0xff] %vm208_vm2, %v178_v38  ;;  %v157_v41 = vadd.f32 %v269_v39, %v229_v30  ;;  %v189_v42 = vadd.f32 %v277_v40, %v229_v30 }
  0xdc   :  { %v148_v43 = vpop.f32.mrf.mxu0  ;;  %v180_v44 = vpop.f32.mrf.mxu1 }
  0xdd   :  { %212 = vst.msk [vmem:[%s460_s3 + $0x18] sm:$0xff] %vm208_vm2, %v157_v41  ;;  %220 = vst.msk [vmem:[%s460_s3 + $0x58] sm:$0xff] %vm208_vm2, %v189_v42  ;;  %v149_v45 = vadd.f32 %v229_v30, %v148_v43  ;;  %v181_v46 = vadd.f32 %v229_v30, %v180_v44 }
  0xde   :  { %v272_v47 = vpop.f32.mrf.mxu0  ;;  %v280_v48 = vpop.f32.mrf.mxu1 }
  0xdf   :  { %210 = vst.msk [vmem:[%s460_s3 + $0x8] sm:$0xff] %vm208_vm2, %v149_v45  ;;  %218 = vst.msk [vmem:[%s460_s3 + $0x48] sm:$0xff] %vm208_vm2, %v181_v46  ;;  %v170_v49 = vadd.f32 %v272_v47, %v229_v30  ;;  %v202_v50 = vadd.f32 %v280_v48, %v229_v30 }
  0xe0   :  { %v161_v51 = vpop.f32.mrf.mxu0  ;;  %v193_v52 = vpop.f32.mrf.mxu1 }
  0xe1   :  { %215 = vst.msk [vmem:[%s460_s3 + $0x30] sm:$0xff] %vm208_vm2, %v170_v49  ;;  %223 = vst.msk [vmem:[%s460_s3 + $0x70] sm:$0xff] %vm208_vm2, %v202_v50  ;;  %v162_v53 = vadd.f32 %v229_v30, %v161_v51  ;;  %v194_v54 = vadd.f32 %v229_v30, %v193_v52 }
  0xe2   :  { %v273_v55 = vpop.f32.mrf.mxu0  ;;  %v281_v56 = vpop.f32.mrf.mxu1 }
  0xe3   :  { %213 = vst.msk [vmem:[%s460_s3 + $0x20] sm:$0xff] %vm208_vm2, %v162_v53  ;;  %221 = vst.msk [vmem:[%s460_s3 + $0x60] sm:$0xff] %vm208_vm2, %v194_v54  ;;  %v173_v57 = vadd.f32 %v273_v55, %v229_v30  ;;  %v205_v58 = vadd.f32 %v281_v56, %v229_v30 }
  0xe4   :  { %v164_v59 = vpop.f32.mrf.mxu0  ;;  %v196_v60 = vpop.f32.mrf.mxu1 }
  0xe5   :  { %216 = vst.msk [vmem:[%s460_s3 + $0x38] sm:$0xff] %vm208_vm2, %v173_v57  ;;  %224 = vst.msk [vmem:[%s460_s3 + $0x78] sm:$0xff] %vm208_vm2, %v205_v58  ;;  %v165_v61 = vadd.f32 %v229_v30, %v164_v59  ;;  %v197_v62 = vadd.f32 %v229_v30, %v196_v60 }
  0xe7   :  { %214 = vst.msk [vmem:[%s460_s3 + $0x28] sm:$0xff] %vm208_vm2, %v165_v61  ;;  %222 = vst.msk [vmem:[%s460_s3 + $0x68] sm:$0xff] %vm208_vm2, %v197_v62 }

// kernel: _lambda_.6
= control target key start
LH: loop header
LB: loop body
LE: loop exit
PB: predicated region body
PF: predicated region fallthrough
CT: control target
= control target key end

     0   :  { %s776_s18 = smov 0   ;;  %s831_s0 = inlined_call_operand.vmem [shape: f32[2,16,32], index: 0, kind: input, shape index: {}]   ;;  %s832_s1 = inlined_call_operand.vmem [shape: f32[2,8,32], index: 1, kind: input, shape index: {}]   ;;  %s833_s2 = inlined_call_operand.vmem [shape: f32[2,1,8], index: 2, kind: input, shape index: {}]   ;;  %s834_s3 = inlined_call_operand.vmem [shape: bf16[32,32], index: 3, kind: input, shape index: {}]   ;;  %s835_s4 = inlined_call_operand.vmem [shape: f32[1,32], index: 4, kind: input, shape index: {}]   ;;  %s836_s5 = inlined_call_operand.vmem [shape: f32[2,16,32], index: 5, kind: output, shape index: {}]  }
   0x1 LB: > { %s652_s19 = sadd.s32 4294967295, %s741_s18   ;;  %p656_p0 = scmp.ge.s32.totalorder %s741_s18, 1  ;;  %s741_s18 = sphi %s776_s18, %s15_s18  }
   0x2   : > { %p204_p1 = scmp.lt.s32.totalorder %s741_s18, 3 }
   0x4   : > { %p205_p2 = pnand %p656_p0, %p204_p1 }
   0x5   : > { %p239_p3 = scmp.lt.s32.totalorder (!%p205_p2), %s652_s19, 1 }
   0x6   : > { %208 = sbr.rel (%p205_p2) target bundleno = 929 (0x3a1), region = 40 }
   0xb   : > { %v725_v0 = vld [vmem:[%s834_s3 + $0x8] sm:$0xff]   ;;  %v743_v1 = vmov 0.0   ;;  %v726_v2 = vld [vmem:[%s834_s3] sm:$0xff]   ;;  %vm744_vm0 = vmmov 0   ;;  %s838_s19 = smov (!%p239_p3, %s652_s19), 1  ;;  %vm283_vm1 = vcmask 261120   ;;  %v463_v23 = vlaneseq }
   0xc   : > { %688 = vmatprep.subr.bf16.mxu0 %v743_v1  ;;  %696 = vmatprep.subr.bf16.mxu1 %v743_v1  ;;  %s674_s24 = sshll.u32 %s838_s19, 4  ;;  %s659_s25 = sshll.u32 %s838_s19, 3  ;;  %v662_v8 = vld [vmem:[%s835_s4] ss:$0 sm:$0xff]  ;;  %v745_v27 = vmov 0   ;;  %vm470_vm4 = vcmask 64512  }
   0xd   : > { %689 = vmatpush3.bf16.msra.mxu0 %v725_v0  ;;  %697 = vmatpush3.bf16.msra.mxu1 %v725_v0  ;;  %s243_s28 = scalar_lea.vmem %s831_s0, %s674_s24  ;;  %s247_s6 = scalar_lea.vmem %s832_s1, %s659_s25  ;;  %v464_v25 = vshrl.u32 %v463_v23, 7 }
   0xe   : > { %690 = vmatprep.subr.bf16.mxu0 %v743_v1  ;;  %698 = vmatprep.subr.bf16.mxu1 %v743_v1  ;;  %v262_v3 = vld [vmem:[%s243_s28] sm:$0xff]  ;;  %v263_v4 = vld [vmem:[%s243_s28 + $0x8] sm:$0xff]  ;;  %s250_s11 = scalar_lea.vmem %s833_s2, %s838_s19  ;;  %s255_s14 = scalar_lea.vmem %s836_s5, %s674_s24 }
   0xf   : > { %692 = vmatprep.mubr.msk.bf16.mxu0 %vm744_vm0, %v743_v1  ;;  %700 = vmatprep.mubr.msk.bf16.mxu1 %vm744_vm0, %v743_v1  ;;  %v330_v5 = vld [vmem:[%s247_s6] sm:$0xff]  ;;  %v264_v6 = vpack.c.bf16 %v263_v4, %v262_v3  ;;  %v465_v26 = vsub.s32 0, %v464_v25 }
  0x10   : > { %v331_v7 = vpack.c.bf16 %v330_v5, %v330_v5  ;;  %v460_v24 = vld [vmem:[%s250_s11] sm:$0x1] }
  0x11   : > { %691 = vmatpush3.bf16.msra.mxu0 %v726_v2  ;;  %699 = vmatpush3.bf16.msra.mxu1 %v726_v2  ;;  %vm461_vm2 = vcmp.gt.f32.partialorder %v460_v24, 0.0 }
  0x12   : > { %709 = vmatprep.subr.mxu1 %v330_v5  ;;  %v462_v28 = vsel %vm461_vm2, 1, %v745_v27 }
  0x13   : > { %v466_v29 = vrot.slane %v462_v28, %v465_v26 }
  0x14   : > { %693 = vmatmul.mubr.msk.bf16.vlgmr.msra.gmra.mxu0 %vm283_vm1, %v264_v6  ;;  %701 = vmatmul.mubr.msk.bf16.vlgmr.msra.gmra.mxu1 %vm283_vm1, %v331_v7 }
  0x15   : > { %710 = vmatpush3.msra.mxu1 %v330_v5  ;;  %vm467_vm3 = vcmp.eq.s32.totalorder %v466_v29, 1 }
  0xd4   : > { %v321_v9 = vpop.f32.mrf.mxu0  ;;  %v369_v10 = vpop.f32.mrf.mxu1 }
  0xd5   : > { %v322_v11 = vadd.f32 %v662_v8, %v321_v9  ;;  %v370_v12 = vadd.f32 %v662_v8, %v369_v10 }
  0xd6   : > { %v694_v13 = vpop.f32.mrf.mxu0  ;;  %v702_v14 = vpop.f32.mrf.mxu1 }
  0xd7   : > { %v328_v15 = vmax.f32 %v322_v11, 0.0  ;;  %v375_v16 = vmax.f32 %v370_v12, 0.0 }
  0xd8   : > { %v324_v17 = vpop.f32.mrf.mxu0  ;;  %v372_v18 = vpop.f32.mrf.mxu1 }
  0xd9   : > { %v325_v19 = vadd.f32 %v662_v8, %v324_v17  ;;  %704 = vmatprep.subr.msk.mxu0 %vm283_vm1, %v375_v16  ;;  %706 = vmatprep.mubr.msk.f32.mxu0 %vm283_vm1, %v328_v15 }
  0xda   : > { %v695_v20 = vpop.f32.mrf.mxu0  ;;  %v703_v21 = vpop.f32.mrf.mxu1  ;;  %705 = vmatpush3.xpose.msk.msra.mxu0 %vm283_vm1, %v375_v16 }
  0xdb   : > { %v329_v22 = vmax.f32 %v325_v19, 0.0 }
  0xdd   : > { %707 = vmatmul.mubr.msk.f32.vlgmr.msra.gmra.mxu0 %vm283_vm1, %v329_v22 }
 0x19d   : > { %v708_v30 = vpop.f32.mrf.mxu0 }
 0x19e   : > { %v469_v34 = vsel %vm467_vm3, -1e+30, %v708_v30 }
 0x19f   : > { %v451_v31 = vpop.f32.mrf.mxu0  ;;  %v474_v35 = vsel %vm470_vm4, %v469_v34, -inf }
 0x1a0   : > { %v468_v32 = vsel %vm467_vm3, -1e+30, %v451_v31 }
 0x1a1   : > { %v471_v33 = vsel %vm470_vm4, %v468_v32, -inf }
 0x1a2   : > { %472 = vmax.xlane.f32.xlu0 %v471_v33 }
 0x1a6   : > { %475 = vmax.xlane.f32.xlu0 %v474_v35 }
 0x22b   : > { %v473_v36 = vpop.xlane.xlu0 %472 }
 0x22c   : > { %v477_v37 = vsub.f32 %v468_v32, %v473_v36 }
 0x22e   : > { %v479_v38 = vmul.f32 1.442695, %v477_v37 }
 0x22f   : > { %v476_v39 = vpop.xlane.xlu0 %475 }
 0x230   : > { %727 = vpow2.f32 %v479_v38  ;;  %v478_v40 = vsub.f32 %v469_v34, %v476_v39 }
 0x232   : > { %v481_v41 = vmul.f32 1.442695, %v478_v40 }
 0x234   : > { %729 = vpow2.f32 %v481_v41 }
 0x23d   : > { %v728_v42 = vpop.eup %727 }
 0x23e   : > { %v483_v43 = vsel %vm470_vm4, %v728_v42, 0.0 }
 0x23f   : > { %484 = vadd.xlane.f32.xlu1 %v483_v43 }
 0x241   : > { %v730_v44 = vpop.eup %729 }
 0x242   : > { %v486_v45 = vsel %vm470_vm4, %v730_v44, 0.0 }
 0x243   : > { %487 = vadd.xlane.f32.xlu1 %v486_v45 }
 0x2c8   : > { %v485_v46 = vpop.xlane.xlu1 %484 }
 0x2c9   : > { %731 = vrcp.f32 %v485_v46 }
 0x2cc   : > { %v488_v47 = vpop.xlane.xlu1 %487 }
 0x2cd   : > { %733 = vrcp.f32 %v488_v47 }
 0x2d6   : > { %v732_v48 = vpop.eup %731 }
 0x2d7   : > { %v490_v49 = vmul.f32 %v732_v48, %v728_v42 }
 0x2d9   : > { %711 = vmatprep.mubr.msk.f32.mxu1 %vm470_vm4, %v490_v49 }
 0x2da   : > { %v734_v50 = vpop.eup %733 }
 0x2db   : > { %v492_v51 = vmul.f32 %v734_v50, %v730_v44 }
 0x2dd   : > { %712 = vmatmul.mubr.msk.f32.vlgmr.msra.gmra.mxu1 %vm470_vm4, %v492_v51 }
 0x39d   : > { %v713_v52 = vpop.f32.mrf.mxu1 }
 0x39e   : > { %575 = vst.msk [vmem:[%s255_s14 + $0x8] sm:$0xff] %vm283_vm1, %v713_v52 }
 0x39f   : > { %v565_v53 = vpop.f32.mrf.mxu1 }
 0x3a0   : > { %574 = vst.msk [vmem:[%s255_s14] sm:$0xff] %vm283_vm1, %v565_v53 }
 0x3a1 PF: > { %s15_s18 = sadd.s32 1, %s741_s18  }
 0x3a2   : > { %p12_p4 = scmp.ge.s32.totalorder %s15_s18, 4  }
 0x3a4   :  { %14 = sbr.rel (!%p12_p4) target bundleno = 1 (0x1), region = 76 }

// kernel: _lambda_.8
= control target key start
LH: loop header
LB: loop body
LE: loop exit
PB: predicated region body
PF: predicated region fallthrough
CT: control target
= control target key end

     0   :  { %v19_v0 = vlaneseq  ;;  %v1049_v10 = vmov 0.0   ;;  %s1051_s25 = smov 0   ;;  %s1306_s0 = inlined_call_operand.vmem [shape: f32[16,8,64], index: 0, kind: input, shape index: {}]   ;;  %s1307_s1 = inlined_call_operand.vmem [shape: f32[64,64], index: 1, kind: input, shape index: {}]   ;;  %s1308_s2 = inlined_call_operand.vmem [shape: f32[16,8,64], index: 2, kind: output, shape index: {}]  }
   0x1   :  { %v1009_v1 = vld [vmem:[%s1307_s1] sm:$0xff]  ;;  %v1014_v2 = vld [vmem:[%s1307_s1 + $0x8] sm:$0xff]  ;;  %v1019_v3 = vld [vmem:[%s1307_s1 + $0x10] sm:$0xff] }
   0x2   :  { %v1024_v4 = vld [vmem:[%s1307_s1 + $0x18] sm:$0xff]  ;;  %v1029_v5 = vld [vmem:[%s1307_s1 + $0x20] sm:$0xff]  ;;  %v1034_v6 = vld [vmem:[%s1307_s1 + $0x28] sm:$0xff]  ;;  %v1036_v7 = vand.u32 127, %v19_v0 }
   0x3   :  { %v1041_v8 = vld [vmem:[%s1307_s1 + $0x30] sm:$0xff]  ;;  %v1046_v9 = vld [vmem:[%s1307_s1 + $0x38] sm:$0xff] }
   0x4   :  { %vm21_vm0 = vcmp.lt.s32.totalorder %v1036_v7, 32 }
   0x5 LB: > { %v989_v11 = vmov 0.0   ;;  %vm990_vm1 = vmmov 0   ;;  %vm53_vm2 = vcmask 523264   ;;  %s30_s1 = ssub.s32 1, %s987_s25  ;;  %s713_s26 = sshll.u32 %s987_s25, 6  ;;  %vm662_vm3 = vcmask 261120   ;;  %s987_s25 = sphi %s1051_s25, %s27_s25   ;;  %v983_v10 = vphi %v1049_v10, %v972_v10  }
   0x6   : > { %787 = vmatprep.subr.mxu0 %v989_v11  ;;  %803 = vmatprep.mubr.msk.f32.mxu0 %vm990_vm1, %v989_v11  ;;  %s1116_s27 = sshll.u32 %s30_s1, 6  ;;  %s1121_s30 = scalar_lea.vmem %s1306_s0, %s713_s26  ;;  %vm672_vm4 = vcmask 523520  }
   0x7   : > { %788 = vmatpush3.msra.mxu0 %v1046_v9  ;;  %806 = vmatprep.subr.mxu1 %v989_v11  ;;  %s1127_s5 = scalar_lea.vmem %s1306_s0, %s1116_s27  ;;  %v34_v12 = vld [vmem:[%s1121_s30] sm:$0xff]  ;;  %s1136_s8 = scalar_lea.vmem %s1308_s2, %s713_s26  ;;  %v35_v19 = vld [vmem:[%s1121_s30 + $0x8] sm:$0xff]  ;;  %v36_v26 = vld [vmem:[%s1121_s30 + $0x10] sm:$0xff] }
   0x8   : > { %789 = vmatprep.subr.mxu0 %v989_v11  ;;  %807 = vmatpush3.msra.mxu1 %v1046_v9  ;;  %v51_v13 = vld [vmem:[%s1127_s5 + $0x38] sm:$0xff]  ;;  %v50_v20 = vld [vmem:[%s1127_s5 + $0x30] sm:$0xff]  ;;  %v49_v27 = vld [vmem:[%s1127_s5 + $0x28] sm:$0xff]  ;;  %s671_s11 = scalar_lea.vmem %s1308_s2, %s1116_s27  ;;  %s27_s25 = sadd.s32 1, %s987_s25  }
   0x9   : > { %790 = vmatpush3.msra.mxu0 %v1041_v8  ;;  %808 = vmatprep.subr.mxu1 %v989_v11  ;;  %v52_v14 = vsel %vm21_vm0, %v34_v12, %v51_v13  ;;  %v129_v21 = vsel %vm21_vm0, %v35_v19, %v50_v20  ;;  %v205_v28 = vsel %vm21_vm0, %v36_v26, %v49_v27  ;;  %v37_v33 = vld [vmem:[%s1121_s30 + $0x18] sm:$0xff]  ;;  %v48_v34 = vld [vmem:[%s1127_s5 + $0x20] sm:$0xff]  ;;  %v39_v47 = vld [vmem:[%s1121_s30 + $0x28] sm:$0xff]  ;;  %p24_p0 = scmp.ge.s32.totalorder %s27_s25, 2  }
   0xa   : > { %791 = vmatprep.subr.mxu0 %v989_v11  ;;  %809 = vmatpush3.msra.mxu1 %v1041_v8  ;;  %v281_v35 = vsel %vm21_vm0, %v37_v33, %v48_v34  ;;  %v38_v40 = vld [vmem:[%s1121_s30 + $0x20] sm:$0xff]  ;;  %v47_v41 = vld [vmem:[%s1127_s5 + $0x18] sm:$0xff]  ;;  %v46_v48 = vld [vmem:[%s1127_s5 + $0x10] sm:$0xff] }
   0xb   : > { %792 = vmatpush3.msra.mxu0 %v1034_v6  ;;  %810 = vmatprep.subr.mxu1 %v989_v11  ;;  %v357_v42 = vsel %vm21_vm0, %v38_v40, %v47_v41  ;;  %v433_v49 = vsel %vm21_vm0, %v39_v47, %v46_v48  ;;  %v40_v54 = vld [vmem:[%s1121_s30 + $0x30] sm:$0xff]  ;;  %v45_v55 = vld [vmem:[%s1127_s5 + $0x8] sm:$0xff]  ;;  %v41_v61 = vld [vmem:[%s1121_s30 + $0x38] sm:$0xff] }
   0xc   : > { %793 = vmatprep.subr.mxu0 %v989_v11  ;;  %811 = vmatpush3.msra.mxu1 %v1034_v6  ;;  %v509_v56 = vsel %vm21_vm0, %v40_v54, %v45_v55  ;;  %v44_v62 = vld [vmem:[%s1127_s5] sm:$0xff] }
   0xd   : > { %794 = vmatpush3.msra.mxu0 %v1029_v5  ;;  %812 = vmatprep.subr.mxu1 %v989_v11  ;;  %v585_v63 = vsel %vm21_vm0, %v41_v61, %v44_v62 }
   0xe   : > { %795 = vmatprep.subr.mxu0 %v989_v11  ;;  %813 = vmatpush3.msra.mxu1 %v1029_v5 }
   0xf   : > { %796 = vmatpush3.msra.mxu0 %v1024_v4  ;;  %814 = vmatprep.subr.mxu1 %v989_v11 }
  0x10   : > { %797 = vmatprep.subr.mxu0 %v989_v11  ;;  %815 = vmatpush3.msra.mxu1 %v1024_v4 }
  0x11   : > { %798 = vmatpush3.msra.mxu0 %v1019_v3  ;;  %816 = vmatprep.subr.mxu1 %v989_v11 }
  0x12   : > { %799 = vmatprep.subr.mxu0 %v989_v11  ;;  %817 = vmatpush3.msra.mxu1 %v1019_v3 }
  0x13   : > { %800 = vmatpush3.msra.mxu0 %v1014_v2  ;;  %818 = vmatprep.subr.mxu1 %v989_v11 }
  0x14   : > { %801 = vmatprep.subr.mxu0 %v989_v11  ;;  %819 = vmatpush3.msra.mxu1 %v1014_v2 }
  0x15   : > { %802 = vmatpush3.msra.mxu0 %v1009_v1  ;;  %820 = vmatprep.subr.mxu1 %v989_v11 }
  0x16   : > { %804 = vmatmul.mubr.msk.f32.vlgmr.msra.gmra.mxu0 %vm53_vm2, %v983_v10  ;;  %821 = vmatpush3.msra.mxu1 %v1009_v1 }
  0x17   : > { %822 = vmatprep.mubr.msk.f32.mxu1 %vm990_vm1, %v989_v11  ;;  %825 = vmatprep.subr.mxu0 %v989_v11 }
  0x18   : > { %826 = vmatpush3.msra.mxu0 %v1046_v9  ;;  %841 = vmatprep.mubr.msk.f32.mxu0 %vm990_vm1, %v989_v11 }
  0x19   : > { %827 = vmatprep.subr.mxu0 %v989_v11  ;;  %844 = vmatprep.subr.mxu1 %v989_v11 }
  0x1a   : > { %828 = vmatpush3.msra.mxu0 %v1041_v8 }
  0x1b   : > { %829 = vmatprep.subr.mxu0 %v989_v11 }
  0x1c   : > { %830 = vmatpush3.msra.mxu0 %v1034_v6 }
  0x1d   : > { %831 = vmatprep.subr.mxu0 %v989_v11 }
  0x1e   : > { %832 = vmatpush3.msra.mxu0 %v1029_v5 }
  0x1f   : > { %833 = vmatprep.subr.mxu0 %v989_v11 }
  0x20   : > { %834 = vmatpush3.msra.mxu0 %v1024_v4 }
  0x21   : > { %835 = vmatprep.subr.mxu0 %v989_v11 }
  0x22   : > { %836 = vmatpush3.msra.mxu0 %v1019_v3 }
  0x23   : > { %837 = vmatprep.subr.mxu0 %v989_v11 }
  0x24   : > { %838 = vmatpush3.msra.mxu0 %v1014_v2 }
  0x25   : > { %839 = vmatprep.subr.mxu0 %v989_v11 }
  0x26   : > { %840 = vmatpush3.msra.mxu0 %v1009_v1 }
  0x27   : > { %863 = vmatprep.subr.mxu0 %v989_v11 }
  0xd6   : > { %v123_v15 = vpop.f32.mrf.mxu0 }
  0xd7   : > { %v127_v16 = vadd.f32 %v123_v15, %v52_v14 }
  0xd8   : > { %v805_v17 = vpop.f32.mrf.mxu0 }
  0xd9   : > { %957 = vtanh.f32 %v127_v16 }
  0xe6   : > { %v1138_v18 = vpop.eup %957 }
  0xe7   : > { %663 = vst.msk [vmem:[%s1136_s8] sm:$0xff] %vm662_vm3, %v1138_v18  ;;  %823 = vmatmul.mubr.msk.f32.vlgmr.msra.gmra.mxu1 %vm53_vm2, %v1138_v18 }
  0xe8   : > { %845 = vmatpush3.msra.mxu1 %v1046_v9  ;;  %860 = vmatprep.mubr.msk.f32.mxu1 %vm990_vm1, %v989_v11 }
  0xe9   : > { %846 = vmatprep.subr.mxu1 %v989_v11 }
  0xea   : > { %847 = vmatpush3.msra.mxu1 %v1041_v8 }
  0xeb   : > { %848 = vmatprep.subr.mxu1 %v989_v11 }
  0xec   : > { %849 = vmatpush3.msra.mxu1 %v1034_v6 }
  0xed   : > { %850 = vmatprep.subr.mxu1 %v989_v11 }
  0xee   : > { %851 = vmatpush3.msra.mxu1 %v1029_v5 }
  0xef   : > { %852 = vmatprep.subr.mxu1 %v989_v11 }
  0xf0   : > { %853 = vmatpush3.msra.mxu1 %v1024_v4 }
  0xf1   : > { %854 = vmatprep.subr.mxu1 %v989_v11 }
  0xf2   : > { %855 = vmatpush3.msra.mxu1 %v1019_v3 }
  0xf3   : > { %856 = vmatprep.subr.mxu1 %v989_v11 }
  0xf4   : > { %857 = vmatpush3.msra.mxu1 %v1014_v2 }
  0xf5   : > { %858 = vmatprep.subr.mxu1 %v989_v11 }
  0xf6   : > { %859 = vmatpush3.msra.mxu1 %v1009_v1 }
  0xf7   : > { %882 = vmatprep.subr.mxu1 %v989_v11 }
 0x1a7   : > { %v199_v22 = vpop.f32.mrf.mxu1 }
 0x1a8   : > { %v203_v23 = vadd.f32 %v199_v22, %v129_v21 }
 0x1a9   : > { %v824_v24 = vpop.f32.mrf.mxu1 }
 0x1aa   : > { %959 = vtanh.f32 %v203_v23 }
 0x1b7   : > { %v1167_v25 = vpop.eup %959 }
 0x1b8   : > { %664 = vst.msk [vmem:[%s1136_s8 + $0x8] sm:$0xff] %vm662_vm3, %v1167_v25  ;;  %842 = vmatmul.mubr.msk.f32.vlgmr.msra.gmra.mxu0 %vm53_vm2, %v1167_v25 }
 0x1b9   : > { %864 = vmatpush3.msra.mxu0 %v1046_v9  ;;  %879 = vmatprep.mubr.msk.f32.mxu0 %vm990_vm1, %v989_v11 }
 0x1ba   : > { %865 = vmatprep.subr.mxu0 %v989_v11 }
 0x1bb   : > { %866 = vmatpush3.msra.mxu0 %v1041_v8 }
 0x1bc   : > { %867 = vmatprep.subr.mxu0 %v989_v11 }
 0x1bd   : > { %868 = vmatpush3.msra.mxu0 %v1034_v6 }
 0x1be   : > { %869 = vmatprep.subr.mxu0 %v989_v11 }
 0x1bf   : > { %870 = vmatpush3.msra.mxu0 %v1029_v5 }
 0x1c0   : > { %871 = vmatprep.subr.mxu0 %v989_v11 }
 0x1c1   : > { %872 = vmatpush3.msra.mxu0 %v1024_v4 }
 0x1c2   : > { %873 = vmatprep.subr.mxu0 %v989_v11 }
 0x1c3   : > { %874 = vmatpush3.msra.mxu0 %v1019_v3 }
 0x1c4   : > { %875 = vmatprep.subr.mxu0 %v989_v11 }
 0x1c5   : > { %876 = vmatpush3.msra.mxu0 %v1014_v2 }
 0x1c6   : > { %877 = vmatprep.subr.mxu0 %v989_v11 }
 0x1c7   : > { %878 = vmatpush3.msra.mxu0 %v1009_v1 }
 0x1c8   : > { %901 = vmatprep.subr.mxu0 %v989_v11 }
 0x278   : > { %v275_v29 = vpop.f32.mrf.mxu0 }
 0x279   : > { %v279_v30 = vadd.f32 %v275_v29, %v205_v28 }
 0x27a   : > { %v843_v31 = vpop.f32.mrf.mxu0 }
 0x27b   : > { %961 = vtanh.f32 %v279_v30 }
 0x288   : > { %v1196_v32 = vpop.eup %961 }
 0x289   : > { %665 = vst.msk [vmem:[%s1136_s8 + $0x10] sm:$0xff] %vm662_vm3, %v1196_v32  ;;  %861 = vmatmul.mubr.msk.f32.vlgmr.msra.gmra.mxu1 %vm53_vm2, %v1196_v32 }
 0x28a   : > { %883 = vmatpush3.msra.mxu1 %v1046_v9  ;;  %898 = vmatprep.mubr.msk.f32.mxu1 %vm990_vm1, %v989_v11 }
 0x28b   : > { %884 = vmatprep.subr.mxu1 %v989_v11 }
 0x28c   : > { %885 = vmatpush3.msra.mxu1 %v1041_v8 }
 0x28d   : > { %886 = vmatprep.subr.mxu1 %v989_v11 }
 0x28e   : > { %887 = vmatpush3.msra.mxu1 %v1034_v6 }
 0x28f   : > { %888 = vmatprep.subr.mxu1 %v989_v11 }
 0x290   : > { %889 = vmatpush3.msra.mxu1 %v1029_v5 }
 0x291   : > { %890 = vmatprep.subr.mxu1 %v989_v11 }
 0x292   : > { %891 = vmatpush3.msra.mxu1 %v1024_v4 }
 0x293   : > { %892 = vmatprep.subr.mxu1 %v989_v11 }
 0x294   : > { %893 = vmatpush3.msra.mxu1 %v1019_v3 }
 0x295   : > { %894 = vmatprep.subr.mxu1 %v989_v11 }
 0x296   : > { %895 = vmatpush3.msra.mxu1 %v1014_v2 }
 0x297   : > { %896 = vmatprep.subr.mxu1 %v989_v11 }
 0x298   : > { %897 = vmatpush3.msra.mxu1 %v1009_v1 }
 0x299   : > { %920 = vmatprep.subr.mxu1 %v989_v11 }
 0x349   : > { %v351_v36 = vpop.f32.mrf.mxu1 }
 0x34a   : > { %v355_v37 = vadd.f32 %v351_v36, %v281_v35 }
 0x34b   : > { %v862_v38 = vpop.f32.mrf.mxu1 }
 0x34c   : > { %963 = vtanh.f32 %v355_v37 }
 0x359   : > { %v1225_v39 = vpop.eup %963 }
 0x35a   : > { %666 = vst.msk [vmem:[%s1136_s8 + $0x18] sm:$0xff] %vm662_vm3, %v1225_v39  ;;  %880 = vmatmul.mubr.msk.f32.vlgmr.msra.gmra.mxu0 %vm53_vm2, %v1225_v39 }
 0x35b   : > { %902 = vmatpush3.msra.mxu0 %v1046_v9  ;;  %917 = vmatprep.mubr.msk.f32.mxu0 %vm990_vm1, %v989_v11 }
 0x35c   : > { %903 = vmatprep.subr.mxu0 %v989_v11 }
 0x35d   : > { %904 = vmatpush3.msra.mxu0 %v1041_v8 }
 0x35e   : > { %905 = vmatprep.subr.mxu0 %v989_v11 }
 0x35f   : > { %906 = vmatpush3.msra.mxu0 %v1034_v6 }
 0x360   : > { %907 = vmatprep.subr.mxu0 %v989_v11 }
 0x361   : > { %908 = vmatpush3.msra.mxu0 %v1029_v5 }
 0x362   : > { %909 = vmatprep.subr.mxu0 %v989_v11 }
 0x363   : > { %910 = vmatpush3.msra.mxu0 %v1024_v4 }
 0x364   : > { %911 = vmatprep.subr.mxu0 %v989_v11 }
 0x365   : > { %912 = vmatpush3.msra.mxu0 %v1019_v3 }
 0x366   : > { %913 = vmatprep.subr.mxu0 %v989_v11 }
 0x367   : > { %914 = vmatpush3.msra.mxu0 %v1014_v2 }
 0x368   : > { %915 = vmatprep.subr.mxu0 %v989_v11 }
 0x369   : > { %916 = vmatpush3.msra.mxu0 %v1009_v1 }
 0x41a   : > { %v427_v43 = vpop.f32.mrf.mxu0 }
 0x41b   : > { %v431_v44 = vadd.f32 %v427_v43, %v357_v42 }
 0x41c   : > { %v881_v45 = vpop.f32.mrf.mxu0 }
 0x41d   : > { %965 = vtanh.f32 %v431_v44 }
 0x42a   : > { %v966_v46 = vpop.eup %965 }
 0x42b   : > { %667 = vst.msk [vmem:[%s1136_s8 + $0x20] sm:$0xff] %vm662_vm3, %v966_v46  ;;  %899 = vmatmul.mubr.msk.f32.vlgmr.msra.gmra.mxu1 %vm53_vm2, %v966_v46 }
 0x42c   : > { %921 = vmatpush3.msra.mxu1 %v1046_v9  ;;  %936 = vmatprep.mubr.msk.f32.mxu1 %vm990_vm1, %v989_v11 }
 0x42d   : > { %922 = vmatprep.subr.mxu1 %v989_v11 }
 0x42e   : > { %923 = vmatpush3.msra.mxu1 %v1041_v8 }
 0x42f   : > { %924 = vmatprep.subr.mxu1 %v989_v11 }
 0x430   : > { %925 = vmatpush3.msra.mxu1 %v1034_v6 }
 0x431   : > { %926 = vmatprep.subr.mxu1 %v989_v11 }
 0x432   : > { %927 = vmatpush3.msra.mxu1 %v1029_v5 }
 0x433   : > { %928 = vmatprep.subr.mxu1 %v989_v11 }
 0x434   : > { %929 = vmatpush3.msra.mxu1 %v1024_v4 }
 0x435   : > { %930 = vmatprep.subr.mxu1 %v989_v11 }
 0x436   : > { %931 = vmatpush3.msra.mxu1 %v1019_v3 }
 0x437   : > { %932 = vmatprep.subr.mxu1 %v989_v11 }
 0x438   : > { %933 = vmatpush3.msra.mxu1 %v1014_v2 }
 0x439   : > { %934 = vmatprep.subr.mxu1 %v989_v11 }
 0x43a   : > { %935 = vmatpush3.msra.mxu1 %v1009_v1 }
 0x4eb   : > { %v503_v50 = vpop.f32.mrf.mxu1 }
 0x4ec   : > { %v507_v51 = vadd.f32 %v503_v50, %v433_v49 }
 0x4ed   : > { %v900_v52 = vpop.f32.mrf.mxu1 }
 0x4ee   : > { %967 = vtanh.f32 %v507_v51 }
 0x4fb   : > { %v968_v53 = vpop.eup %967 }
 0x4fc   : > { %668 = vst.msk [vmem:[%s1136_s8 + $0x28] sm:$0xff] %vm662_vm3, %v968_v53  ;;  %918 = vmatmul.mubr.msk.f32.vlgmr.msra.gmra.mxu0 %vm53_vm2, %v968_v53 }
 0x5bc   : > { %v579_v57 = vpop.f32.mrf.mxu0 }
 0x5bd   : > { %v583_v58 = vadd.f32 %v579_v57, %v509_v56 }
 0x5be   : > { %v919_v59 = vpop.f32.mrf.mxu0 }
 0x5bf   : > { %969 = vtanh.f32 %v583_v58 }
 0x5cc   : > { %v970_v60 = vpop.eup %969 }
 0x5cd   : > { %669 = vst.msk [vmem:[%s1136_s8 + $0x30] sm:$0xff] %vm662_vm3, %v970_v60  ;;  %937 = vmatmul.mubr.msk.f32.vlgmr.msra.gmra.mxu1 %vm53_vm2, %v970_v60 }
 0x68d   : > { %v655_v0 = vpop.f32.mrf.mxu1 }
 0x68e   : > { %v659_v10 = vadd.f32 %v655_v0, %v585_v63 }
 0x68f   : > { %v938_v11 = vpop.f32.mrf.mxu1 }
 0x690   : > { %971 = vtanh.f32 %v659_v10 }
 0x69d   : > { %v972_v10 = vpop.eup %971  }
 0x69e   : > { %670 = vst.msk [vmem:[%s1136_s8 + $0x38] sm:$0xff] %vm662_vm3, %v972_v10  ;;  %26 = sbr.rel (!%p24_p0) target bundleno = 5 (0x5), region = 39 }
 0x69f   : > { %673 = vst.msk [vmem:[%s671_s11] sm:$0xff] %vm672_vm4, %v972_v10  ;;  %674 = vst.msk [vmem:[%s671_s11 + $0x8] sm:$0xff] %vm672_vm4, %v970_v60 }
 0x6a0   : > { %675 = vst.msk [vmem:[%s671_s11 + $0x10] sm:$0xff] %vm672_vm4, %v968_v53  ;;  %676 = vst.msk [vmem:[%s671_s11 + $0x18] sm:$0xff] %vm672_vm4, %v966_v46 }
 0x6a1   : > { %677 = vst.msk [vmem:[%s671_s11 + $0x20] sm:$0xff] %vm672_vm4, %v1225_v39  ;;  %678 = vst.msk [vmem:[%s671_s11 + $0x28] sm:$0xff] %vm672_vm4, %v1196_v32 }
 0x6a2   : > { %679 = vst.msk [vmem:[%s671_s11 + $0x30] sm:$0xff] %vm672_vm4, %v1167_v25  ;;  %680 = vst.msk [vmem:[%s671_s11 + $0x38] sm:$0xff] %vm672_vm4, %v1138_v18 }

// kernel: _lambda_.10
= control target key start
LH: loop header
LB: loop body
LE: loop exit
PB: predicated region body
PF: predicated region fallthrough
CT: control target
= control target key end

     0   :  { %v913_v0 = vmov 0.0   ;;  %vm914_vm0 = vmmov 0   ;;  %v19_v9 = vlaneseq  ;;  %vm642_vm2 = vcmask 261120   ;;  %s1268_s1 = inlined_call_operand.vmem [shape: f32[64,64], index: 1, kind: input, shape index: {}]   ;;  %s1269_s0 = inlined_call_operand.vmem [shape: f32[8,8,64], index: 0, kind: input, shape index: {}]   ;;  %s1270_s2 = inlined_call_operand.vmem [shape: f32[8,8,64], index: 2, kind: output, shape index: {}]  }
   0x1   :  { %743 = vmatprep.subr.mxu0 %v913_v0  ;;  %v934_v1 = vld [vmem:[%s1268_s1 + $0x38] sm:$0xff]  ;;  %v939_v2 = vld [vmem:[%s1268_s1 + $0x30] sm:$0xff]  ;;  %759 = vmatprep.mubr.msk.f32.mxu0 %vm914_vm0, %v913_v0  ;;  %v949_v3 = vld [vmem:[%s1268_s1 + $0x28] sm:$0xff]  ;;  %vm33_vm3 = vcmask 523264   ;;  %vm651_vm4 = vcmask 523520  }
   0x2   :  { %744 = vmatpush3.msra.mxu0 %v934_v1  ;;  %762 = vmatprep.subr.mxu1 %v913_v0  ;;  %v958_v4 = vld [vmem:[%s1268_s1 + $0x20] sm:$0xff]  ;;  %v967_v5 = vld [vmem:[%s1268_s1 + $0x18] sm:$0xff]  ;;  %v976_v6 = vld [vmem:[%s1268_s1 + $0x10] sm:$0xff]  ;;  %v1027_v10 = vand.u32 127, %v19_v9 }
   0x3   :  { %745 = vmatprep.subr.mxu0 %v913_v0  ;;  %763 = vmatpush3.msra.mxu1 %v934_v1  ;;  %v985_v7 = vld [vmem:[%s1268_s1 + $0x8] sm:$0xff]  ;;  %v994_v8 = vld [vmem:[%s1268_s1] sm:$0xff]  ;;  %v1038_v12 = vld [vmem:[%s1269_s0 + $0x38] sm:$0xff] }
   0x4   :  { %746 = vmatpush3.msra.mxu0 %v939_v2  ;;  %764 = vmatprep.subr.mxu1 %v913_v0  ;;  %vm21_vm1 = vcmp.lt.s32.totalorder %v1027_v10, 32  ;;  %v1033_v11 = vld [vmem:[%s1269_s0] sm:$0xff]  ;;  %v1074_v18 = vld [vmem:[%s1269_s0 + $0x8] sm:$0xff]  ;;  %v1079_v19 = vld [vmem:[%s1269_s0 + $0x30] sm:$0xff] }
   0x5   :  { %747 = vmatprep.subr.mxu0 %v913_v0  ;;  %765 = vmatpush3.msra.mxu1 %v939_v2  ;;  %v32_v13 = vsel %vm21_vm1, %v1033_v11, %v1038_v12  ;;  %v109_v20 = vsel %vm21_vm1, %v1074_v18, %v1079_v19  ;;  %v1115_v25 = vld [vmem:[%s1269_s0 + $0x10] sm:$0xff]  ;;  %v1120_v26 = vld [vmem:[%s1269_s0 + $0x28] sm:$0xff]  ;;  %v27_v32 = vld [vmem:[%s1269_s0 + $0x18] sm:$0xff]  ;;  %v489_v49 = vsel %vm21_vm1, %v1079_v19, %v1074_v18 }
   0x6   :  { %748 = vmatpush3.msra.mxu0 %v949_v3  ;;  %766 = vmatprep.subr.mxu1 %v913_v0  ;;  %v185_v27 = vsel %vm21_vm1, %v1115_v25, %v1120_v26  ;;  %v28_v33 = vld [vmem:[%s1269_s0 + $0x20] sm:$0xff]  ;;  %v413_v44 = vsel %vm21_vm1, %v1120_v26, %v1115_v25  ;;  %v565_v54 = vsel %vm21_vm1, %v1038_v12, %v1033_v11 }
   0x7   :  { %749 = vmatprep.subr.mxu0 %v913_v0  ;;  %767 = vmatpush3.msra.mxu1 %v949_v3  ;;  %v261_v34 = vsel %vm21_vm1, %v27_v32, %v28_v33  ;;  %v337_v39 = vsel %vm21_vm1, %v28_v33, %v27_v32 }
   0x8   :  { %750 = vmatpush3.msra.mxu0 %v958_v4  ;;  %768 = vmatprep.subr.mxu1 %v913_v0 }
   0x9   :  { %751 = vmatprep.subr.mxu0 %v913_v0  ;;  %769 = vmatpush3.msra.mxu1 %v958_v4 }
   0xa   :  { %752 = vmatpush3.msra.mxu0 %v967_v5  ;;  %770 = vmatprep.subr.mxu1 %v913_v0 }
   0xb   :  { %753 = vmatprep.subr.mxu0 %v913_v0  ;;  %771 = vmatpush3.msra.mxu1 %v967_v5 }
   0xc   :  { %754 = vmatpush3.msra.mxu0 %v976_v6  ;;  %772 = vmatprep.subr.mxu1 %v913_v0 }
   0xd   :  { %755 = vmatprep.subr.mxu0 %v913_v0  ;;  %773 = vmatpush3.msra.mxu1 %v976_v6 }
   0xe   :  { %756 = vmatpush3.msra.mxu0 %v985_v7  ;;  %774 = vmatprep.subr.mxu1 %v913_v0 }
   0xf   :  { %757 = vmatprep.subr.mxu0 %v913_v0  ;;  %775 = vmatpush3.msra.mxu1 %v985_v7 }
  0x10   :  { %758 = vmatpush3.msra.mxu0 %v994_v8  ;;  %776 = vmatprep.subr.mxu1 %v913_v0 }
  0x11   :  { %760 = vmatmul.mubr.f32.vlgmr.msra.gmra.mxu0 %v913_v0  ;;  %777 = vmatpush3.msra.mxu1 %v994_v8 }
  0x12   :  { %778 = vmatprep.mubr.msk.f32.mxu1 %vm914_vm0, %v913_v0  ;;  %781 = vmatprep.subr.mxu0 %v913_v0 }
  0x13   :  { %782 = vmatpush3.msra.mxu0 %v934_v1  ;;  %797 = vmatprep.mubr.msk.f32.mxu0 %vm914_vm0, %v913_v0 }
  0x14   :  { %783 = vmatprep.subr.mxu0 %v913_v0  ;;  %800 = vmatprep.subr.mxu1 %v913_v0 }
  0x15   :  { %784 = vmatpush3.msra.mxu0 %v939_v2 }
  0x16   :  { %785 = vmatprep.subr.mxu0 %v913_v0 }
  0x17   :  { %786 = vmatpush3.msra.mxu0 %v949_v3 }
  0x18   :  { %787 = vmatprep.subr.mxu0 %v913_v0 }
  0x19   :  { %788 = vmatpush3.msra.mxu0 %v958_v4 }
  0x1a   :  { %789 = vmatprep.subr.mxu0 %v913_v0 }
  0x1b   :  { %790 = vmatpush3.msra.mxu0 %v967_v5 }
  0x1c   :  { %791 = vmatprep.subr.mxu0 %v913_v0 }
  0x1d   :  { %792 = vmatpush3.msra.mxu0 %v976_v6 }
  0x1e   :  { %793 = vmatprep.subr.mxu0 %v913_v0 }
  0x1f   :  { %794 = vmatpush3.msra.mxu0 %v985_v7 }
  0x20   :  { %795 = vmatprep.subr.mxu0 %v913_v0 }
  0x21   :  { %796 = vmatpush3.msra.mxu0 %v994_v8 }
  0x22   :  { %819 = vmatprep.subr.mxu0 %v913_v0 }
  0xd1   :  { %v103_v14 = vpop.f32.mrf.mxu0 }
  0xd2   :  { %v107_v15 = vadd.f32 %v103_v14, %v32_v13 }
  0xd3   :  { %v761_v16 = vpop.f32.mrf.mxu0 }
  0xd4   :  { %897 = vtanh.f32 %v107_v15 }
  0xe1   :  { %v1044_v17 = vpop.eup %897 }
  0xe2   :  { %643 = vst.msk [vmem:[%s1270_s2] sm:$0xff] %vm642_vm2, %v1044_v17  ;;  %779 = vmatmul.mubr.msk.f32.vlgmr.msra.gmra.mxu1 %vm33_vm3, %v1044_v17 }
  0xe3   :  { %801 = vmatpush3.msra.mxu1 %v934_v1  ;;  %816 = vmatprep.mubr.msk.f32.mxu1 %vm914_vm0, %v913_v0 }
  0xe4   :  { %802 = vmatprep.subr.mxu1 %v913_v0 }
  0xe5   :  { %803 = vmatpush3.msra.mxu1 %v939_v2 }
  0xe6   :  { %804 = vmatprep.subr.mxu1 %v913_v0 }
  0xe7   :  { %805 = vmatpush3.msra.mxu1 %v949_v3 }
  0xe8   :  { %806 = vmatprep.subr.mxu1 %v913_v0 }
  0xe9   :  { %807 = vmatpush3.msra.mxu1 %v958_v4 }
  0xea   :  { %808 = vmatprep.subr.mxu1 %v913_v0 }
  0xeb   :  { %809 = vmatpush3.msra.mxu1 %v967_v5 }
  0xec   :  { %810 = vmatprep.subr.mxu1 %v913_v0 }
  0xed   :  { %811 = vmatpush3.msra.mxu1 %v976_v6 }
  0xee   :  { %812 = vmatprep.subr.mxu1 %v913_v0 }
  0xef   :  { %813 = vmatpush3.msra.mxu1 %v985_v7 }
  0xf0   :  { %814 = vmatprep.subr.mxu1 %v913_v0 }
  0xf1   :  { %815 = vmatpush3.msra.mxu1 %v994_v8 }
  0xf2   :  { %838 = vmatprep.subr.mxu1 %v913_v0 }
 0x1a2   :  { %v179_v21 = vpop.f32.mrf.mxu1 }
 0x1a3   :  { %v183_v22 = vadd.f32 %v179_v21, %v109_v20 }
 0x1a4   :  { %v780_v23 = vpop.f32.mrf.mxu1 }
 0x1a5   :  { %899 = vtanh.f32 %v183_v22 }
 0x1b2   :  { %v1085_v24 = vpop.eup %899 }
 0x1b3   :  { %644 = vst.msk [vmem:[%s1270_s2 + $0x8] sm:$0xff] %vm642_vm2, %v1085_v24  ;;  %798 = vmatmul.mubr.msk.f32.vlgmr.msra.gmra.mxu0 %vm33_vm3, %v1085_v24 }
 0x1b4   :  { %820 = vmatpush3.msra.mxu0 %v934_v1  ;;  %835 = vmatprep.mubr.msk.f32.mxu0 %vm914_vm0, %v913_v0 }
 0x1b5   :  { %821 = vmatprep.subr.mxu0 %v913_v0 }
 0x1b6   :  { %822 = vmatpush3.msra.mxu0 %v939_v2 }
 0x1b7   :  { %823 = vmatprep.subr.mxu0 %v913_v0 }
 0x1b8   :  { %824 = vmatpush3.msra.mxu0 %v949_v3 }
 0x1b9   :  { %825 = vmatprep.subr.mxu0 %v913_v0 }
 0x1ba   :  { %826 = vmatpush3.msra.mxu0 %v958_v4 }
 0x1bb   :  { %827 = vmatprep.subr.mxu0 %v913_v0 }
 0x1bc   :  { %828 = vmatpush3.msra.mxu0 %v967_v5 }
 0x1bd   :  { %829 = vmatprep.subr.mxu0 %v913_v0 }
 0x1be   :  { %830 = vmatpush3.msra.mxu0 %v976_v6 }
 0x1bf   :  { %831 = vmatprep.subr.mxu0 %v913_v0 }
 0x1c0   :  { %832 = vmatpush3.msra.mxu0 %v985_v7 }
 0x1c1   :  { %833 = vmatprep.subr.mxu0 %v913_v0 }
 0x1c2   :  { %834 = vmatpush3.msra.mxu0 %v994_v8 }
 0x1c3   :  { %857 = vmatprep.subr.mxu0 %v913_v0 }
 0x273   :  { %v255_v28 = vpop.f32.mrf.mxu0 }
 0x274   :  { %v259_v29 = vadd.f32 %v255_v28, %v185_v27 }
 0x275   :  { %v799_v30 = vpop.f32.mrf.mxu0 }
 0x276   :  { %901 = vtanh.f32 %v259_v29 }
 0x283   :  { %v1126_v31 = vpop.eup %901 }
 0x284   :  { %645 = vst.msk [vmem:[%s1270_s2 + $0x10] sm:$0xff] %vm642_vm2, %v1126_v31  ;;  %817 = vmatmul.mubr.msk.f32.vlgmr.msra.gmra.mxu1 %vm33_vm3, %v1126_v31 }
 0x285   :  { %839 = vmatpush3.msra.mxu1 %v934_v1  ;;  %854 = vmatprep.mubr.msk.f32.mxu1 %vm914_vm0, %v913_v0 }
 0x286   :  { %840 = vmatprep.subr.mxu1 %v913_v0 }
 0x287   :  { %841 = vmatpush3.msra.mxu1 %v939_v2 }
 0x288   :  { %842 = vmatprep.subr.mxu1 %v913_v0 }
 0x289   :  { %843 = vmatpush3.msra.mxu1 %v949_v3 }
 0x28a   :  { %844 = vmatprep.subr.mxu1 %v913_v0 }
 0x28b   :  { %845 = vmatpush3.msra.mxu1 %v958_v4 }
 0x28c   :  { %846 = vmatprep.subr.mxu1 %v913_v0 }
 0x28d   :  { %847 = vmatpush3.msra.mxu1 %v967_v5 }
 0x28e   :  { %848 = vmatprep.subr.mxu1 %v913_v0 }
 0x28f   :  { %849 = vmatpush3.msra.mxu1 %v976_v6 }
 0x290   :  { %850 = vmatprep.subr.mxu1 %v913_v0 }
 0x291   :  { %851 = vmatpush3.msra.mxu1 %v985_v7 }
 0x292   :  { %852 = vmatprep.subr.mxu1 %v913_v0 }
 0x293   :  { %853 = vmatpush3.msra.mxu1 %v994_v8 }
 0x294   :  { %876 = vmatprep.subr.mxu1 %v913_v0 }
 0x344   :  { %v331_v35 = vpop.f32.mrf.mxu1 }
 0x345   :  { %v335_v36 = vadd.f32 %v331_v35, %v261_v34 }
 0x346   :  { %v818_v37 = vpop.f32.mrf.mxu1 }
 0x347   :  { %903 = vtanh.f32 %v335_v36 }
 0x354   :  { %v904_v38 = vpop.eup %903 }
 0x355   :  { %646 = vst.msk [vmem:[%s1270_s2 + $0x18] sm:$0xff] %vm642_vm2, %v904_v38  ;;  %836 = vmatmul.mubr.msk.f32.vlgmr.msra.gmra.mxu0 %vm33_vm3, %v904_v38 }
 0x356   :  { %858 = vmatpush3.msra.mxu0 %v934_v1  ;;  %873 = vmatprep.mubr.msk.f32.mxu0 %vm914_vm0, %v913_v0 }
 0x357   :  { %859 = vmatprep.subr.mxu0 %v913_v0 }
 0x358   :  { %860 = vmatpush3.msra.mxu0 %v939_v2 }
 0x359   :  { %861 = vmatprep.subr.mxu0 %v913_v0 }
 0x35a   :  { %862 = vmatpush3.msra.mxu0 %v949_v3 }
 0x35b   :  { %863 = vmatprep.subr.mxu0 %v913_v0 }
 0x35c   :  { %864 = vmatpush3.msra.mxu0 %v958_v4 }
 0x35d   :  { %865 = vmatprep.subr.mxu0 %v913_v0 }
 0x35e   :  { %866 = vmatpush3.msra.mxu0 %v967_v5 }
 0x35f   :  { %867 = vmatprep.subr.mxu0 %v913_v0 }
 0x360   :  { %868 = vmatpush3.msra.mxu0 %v976_v6 }
 0x361   :  { %869 = vmatprep.subr.mxu0 %v913_v0 }
 0x362   :  { %870 = vmatpush3.msra.mxu0 %v985_v7 }
 0x363   :  { %871 = vmatprep.subr.mxu0 %v913_v0 }
 0x364   :  { %872 = vmatpush3.msra.mxu0 %v994_v8 }
 0x415   :  { %v407_v40 = vpop.f32.mrf.mxu0 }
 0x416   :  { %v411_v41 = vadd.f32 %v407_v40, %v337_v39 }
 0x417   :  { %v837_v42 = vpop.f32.mrf.mxu0 }
 0x418   :  { %905 = vtanh.f32 %v411_v41 }
 0x425   :  { %v906_v43 = vpop.eup %905 }
 0x426   :  { %647 = vst.msk [vmem:[%s1270_s2 + $0x20] sm:$0xff] %vm642_vm2, %v906_v43  ;;  %855 = vmatmul.mubr.msk.f32.vlgmr.msra.gmra.mxu1 %vm33_vm3, %v906_v43 }
 0x427   :  { %655 = vst.msk [vmem:[%s1270_s2 + $0x18] sm:$0xff] %vm651_vm4, %v906_v43  ;;  %656 = vst.msk [vmem:[%s1270_s2 + $0x20] sm:$0xff] %vm651_vm4, %v904_v38  ;;  %877 = vmatpush3.msra.mxu1 %v934_v1  ;;  %892 = vmatprep.mubr.msk.f32.mxu1 %vm914_vm0, %v913_v0 }
 0x428   :  { %878 = vmatprep.subr.mxu1 %v913_v0 }
 0x429   :  { %879 = vmatpush3.msra.mxu1 %v939_v2 }
 0x42a   :  { %880 = vmatprep.subr.mxu1 %v913_v0 }
 0x42b   :  { %881 = vmatpush3.msra.mxu1 %v949_v3 }
 0x42c   :  { %882 = vmatprep.subr.mxu1 %v913_v0 }
 0x42d   :  { %883 = vmatpush3.msra.mxu1 %v958_v4 }
 0x42e   :  { %884 = vmatprep.subr.mxu1 %v913_v0 }
 0x42f   :  { %885 = vmatpush3.msra.mxu1 %v967_v5 }
 0x430   :  { %886 = vmatprep.subr.mxu1 %v913_v0 }
 0x431   :  { %887 = vmatpush3.msra.mxu1 %v976_v6 }
 0x432   :  { %888 = vmatprep.subr.mxu1 %v913_v0 }
 0x433   :  { %889 = vmatpush3.msra.mxu1 %v985_v7 }
 0x434   :  { %890 = vmatprep.subr.mxu1 %v913_v0 }
 0x435   :  { %891 = vmatpush3.msra.mxu1 %v994_v8 }
 0x4e6   :  { %v483_v45 = vpop.f32.mrf.mxu1 }
 0x4e7   :  { %v487_v46 = vadd.f32 %v483_v45, %v413_v44 }
 0x4e8   :  { %v856_v47 = vpop.f32.mrf.mxu1 }
 0x4e9   :  { %907 = vtanh.f32 %v487_v46 }
 0x4f6   :  { %v908_v48 = vpop.eup %907 }
 0x4f7   :  { %648 = vst.msk [vmem:[%s1270_s2 + $0x28] sm:$0xff] %vm642_vm2, %v908_v48  ;;  %874 = vmatmul.mubr.msk.f32.vlgmr.msra.gmra.mxu0 %vm33_vm3, %v908_v48 }
 0x4f8   :  { %654 = vst.msk [vmem:[%s1270_s2 + $0x10] sm:$0xff] %vm651_vm4, %v908_v48  ;;  %657 = vst.msk [vmem:[%s1270_s2 + $0x28] sm:$0xff] %vm651_vm4, %v1126_v31 }
 0x5b7   :  { %v559_v50 = vpop.f32.mrf.mxu0 }
 0x5b8   :  { %v563_v51 = vadd.f32 %v559_v50, %v489_v49 }
 0x5b9   :  { %v875_v52 = vpop.f32.mrf.mxu0 }
 0x5ba   :  { %909 = vtanh.f32 %v563_v51 }
 0x5c7   :  { %v910_v53 = vpop.eup %909 }
 0x5c8   :  { %649 = vst.msk [vmem:[%s1270_s2 + $0x30] sm:$0xff] %vm642_vm2, %v910_v53  ;;  %893 = vmatmul.mubr.msk.f32.vlgmr.msra.gmra.mxu1 %vm33_vm3, %v910_v53 }
 0x5c9   :  { %653 = vst.msk [vmem:[%s1270_s2 + $0x8] sm:$0xff] %vm651_vm4, %v910_v53  ;;  %658 = vst.msk [vmem:[%s1270_s2 + $0x30] sm:$0xff] %vm651_vm4, %v1085_v24 }
 0x688   :  { %v635_v55 = vpop.f32.mrf.mxu1 }
 0x689   :  { %v639_v56 = vadd.f32 %v635_v55, %v565_v54 }
 0x68a   :  { %v894_v57 = vpop.f32.mrf.mxu1 }
 0x68b   :  { %911 = vtanh.f32 %v639_v56 }
 0x698   :  { %v912_v58 = vpop.eup %911 }
 0x699   :  { %650 = vst.msk [vmem:[%s1270_s2 + $0x38] sm:$0xff] %vm642_vm2, %v912_v58 }
 0x69a   :  { %652 = vst.msk [vmem:[%s1270_s2] sm:$0xff] %vm651_vm4, %v912_v58  ;;  %659 = vst.msk [vmem:[%s1270_s2 + $0x38] sm:$0xff] %vm651_vm4, %v1044_v17 }

// kernel: _lambda_.11
= control target key start
LH: loop header
LB: loop body
LE: loop exit
PB: predicated region body
PF: predicated region fallthrough
CT: control target
= control target key end

     0   :  { %vm87_vm0 = vcmask 523264   ;;  %vm293_vm2 = vcmask 7168   ;;  %s1842_s1 = inlined_call_operand.vmem [shape: f32[16,8,64], index: 1, kind: input, shape index: {}]   ;;  %s1843_s6 = inlined_call_operand.vmem [shape: f32[1,64], index: 6, kind: input, shape index: {}]   ;;  %s1844_s7 = inlined_call_operand.<no memory space> [shape: f32[1,1], index: 7, kind: input, shape index: {}]   ;;  %s1845_s0 = inlined_call_operand.vmem [shape: f32[8,8,64], index: 0, kind: input, shape index: {}]   ;;  %s1846_s4 = inlined_call_operand.vmem [shape: f32[1,64], index: 4, kind: input, shape index: {}]   ;;  %s1847_s5 = inlined_call_operand.<no memory space> [shape: f32[1,1], index: 5, kind: input, shape index: {}]   ;;  %s1848_s3 = inlined_call_operand.vmem [shape: f32[16,8,1], index: 3, kind: input, shape index: {}]   ;;  %s1849_s2 = inlined_call_operand.vmem [shape: f32[8,8,1], index: 2, kind: input, shape index: {}]   ;;  %s1850_s9 = inlined_call_operand.vmem [shape: f32[64,64], index: 9, kind: input, shape index: {}]   ;;  %s1851_s8 = inlined_call_operand.vmem [shape: f32[64,64], index: 8, kind: input, shape index: {}]   ;;  %s1852_s11 = inlined_call_operand.vmem [shape: f32[64,2], index: 11, kind: input, shape index: {}]   ;;  %s1853_s10 = inlined_call_operand.vmem [shape: f32[1,64], index: 10, kind: input, shape index: {}]   ;;  %s1854_s12 = inlined_call_operand.vmem [shape: f32[1,2], index: 12, kind: input, shape index: {}]   ;;  %s1855_s13 = inlined_call_operand.vmem [shape: f32[8,2], index: 13, kind: output, shape index: {}]  }
   0x1   :  { %v58_v0 = vld [vmem:[%s1842_s1 + $0x10] sm:$0xff]  ;;  %v952_v1 = vld [vmem:[%s1843_s6] ss:$0 sm:$0xff]  ;;  %v20_v3 = vstv %s1844_s7  ;;  %v59_v6 = vld [vmem:[%s1842_s1 + $0x18] sm:$0xff] }
   0x2   :  { %v56_v2 = vld [vmem:[%s1842_s1] sm:$0xff]  ;;  %v136_v4 = vmul.f32 %v952_v1, %v58_v0  ;;  %v57_v7 = vld [vmem:[%s1842_s1 + $0x8] sm:$0xff]  ;;  %21 = vst [vmem:[#allocation3] sm:$0x1] %v20_v3  ;;  %v137_v8 = vmul.f32 %v952_v1, %v59_v6  ;;  %v63_v18 = vld [vmem:[%s1842_s1 + $0x38] sm:$0xff]  ;;  %v18_v3 = vstv %s1847_s5 }
   0x3   :  { %v134_v5 = vmul.f32 %v952_v1, %v56_v2  ;;  %v135_v9 = vmul.f32 %v952_v1, %v57_v7  ;;  %v61_v10 = vld [vmem:[%s1842_s1 + $0x28] sm:$0xff]  ;;  %v60_v11 = vld [vmem:[%s1842_s1 + $0x20] sm:$0xff]  ;;  %v62_v19 = vld [vmem:[%s1842_s1 + $0x30] sm:$0xff]  ;;  %v141_v22 = vmul.f32 %v952_v1, %v63_v18  ;;  %19 = vst [vmem:[#allocation2] sm:$0x1] %v18_v3 }
   0x4   :  { %v156_v12 = vsel %vm87_vm0, %v136_v4, 0.0  ;;  %v159_v14 = vsel %vm87_vm0, %v137_v8, 0.0  ;;  %v139_v16 = vmul.f32 %v952_v1, %v61_v10  ;;  %v138_v17 = vmul.f32 %v952_v1, %v60_v11  ;;  %v65_v24 = vld [vmem:[%s1842_s1 + $0x48] sm:$0xff]  ;;  %v64_v25 = vld [vmem:[%s1842_s1 + $0x40] sm:$0xff]  ;;  %v67_v30 = vld [vmem:[%s1842_s1 + $0x58] sm:$0xff] }
   0x5   :  { %v150_v13 = vsel %vm87_vm0, %v134_v5, 0.0  ;;  %157 = vadd.xlane.f32.xlu1 %v156_v12  ;;  %v153_v15 = vsel %vm87_vm0, %v135_v9, 0.0  ;;  %v140_v23 = vmul.f32 %v952_v1, %v62_v19  ;;  %v171_v26 = vsel %vm87_vm0, %v141_v22, 0.0  ;;  %v66_v31 = vld [vmem:[%s1842_s1 + $0x50] sm:$0xff]  ;;  %v69_v36 = vld [vmem:[%s1842_s1 + $0x68] sm:$0xff]  ;;  %v68_v37 = vld [vmem:[%s1842_s1 + $0x60] sm:$0xff] }
   0x6   :  { %151 = vadd.xlane.f32.xlu0 %v150_v13  ;;  %v165_v20 = vsel %vm87_vm0, %v139_v16, 0.0  ;;  %v162_v21 = vsel %vm87_vm0, %v138_v17, 0.0  ;;  %v143_v28 = vmul.f32 %v952_v1, %v65_v24  ;;  %v142_v29 = vmul.f32 %v952_v1, %v64_v25  ;;  %v71_v42 = vld [vmem:[%s1842_s1 + $0x78] sm:$0xff]  ;;  %v70_v43 = vld [vmem:[%s1842_s1 + $0x70] sm:$0xff]  ;;  %v1267_v48 = vld [vmem:[%s1845_s0 + $0x8] sm:$0xff] }
   0x7   :  { %v168_v27 = vsel %vm87_vm0, %v140_v23, 0.0  ;;  %v145_v34 = vmul.f32 %v952_v1, %v67_v30  ;;  %v144_v35 = vmul.f32 %v952_v1, %v66_v31  ;;  %v147_v40 = vmul.f32 %v952_v1, %v69_v36  ;;  %v950_v49 = vld [vmem:[%s1846_s4] ss:$0 sm:$0xff]  ;;  %v1284_v55 = vld [vmem:[%s1845_s0 + $0x18] sm:$0xff]  ;;  %v1289_v56 = vld [vmem:[%s1845_s0 + $0x10] sm:$0xff] }
   0x8   :  { %v177_v32 = vsel %vm87_vm0, %v143_v28, 0.0  ;;  %v174_v33 = vsel %vm87_vm0, %v142_v29, 0.0  ;;  %v146_v41 = vmul.f32 %v952_v1, %v68_v37  ;;  %v149_v46 = vmul.f32 %v952_v1, %v71_v42  ;;  %v1275_v50 = vld [vmem:[%s1845_s0] sm:$0xff]  ;;  %v53_v61 = vld [vmem:[%s1845_s0 + $0x28] sm:$0xff]  ;;  %v55_v4 = vld [vmem:[%s1845_s0 + $0x38] sm:$0xff] }
   0x9   :  { %160 = vadd.xlane.f32.xlu1 %v159_v14  ;;  %v183_v38 = vsel %vm87_vm0, %v145_v34, 0.0  ;;  %v180_v39 = vsel %vm87_vm0, %v144_v35, 0.0  ;;  %v189_v44 = vsel %vm87_vm0, %v147_v40, 0.0  ;;  %v148_v47 = vmul.f32 %v952_v1, %v70_v43  ;;  %v1301_v62 = vld [vmem:[%s1845_s0 + $0x20] sm:$0xff]  ;;  %v54_v5 = vld [vmem:[%s1845_s0 + $0x30] sm:$0xff]  ;;  %v248_v22 = vld [vmem:[%s1848_s3 + $0x18] sm:$0xff] }
   0xa   :  { %154 = vadd.xlane.f32.xlu0 %v153_v15  ;;  %v186_v45 = vsel %vm87_vm0, %v146_v41, 0.0  ;;  %v195_v51 = vsel %vm87_vm0, %v149_v46, 0.0  ;;  %v80_v53 = vmul.f32 %v950_v49, %v1267_v48  ;;  %v79_v54 = vmul.f32 %v950_v49, %v1275_v50  ;;  %v247_v19 = vld [vmem:[%s1848_s3 + $0x10] sm:$0xff]  ;;  %v246_v23 = vld [vmem:[%s1848_s3 + $0x8] sm:$0xff]  ;;  %v249_v25 = vld [vmem:[%s1848_s3 + $0x20] sm:$0xff] }
   0xb   :  { %v192_v52 = vsel %vm87_vm0, %v148_v47, 0.0  ;;  %v82_v59 = vmul.f32 %v950_v49, %v1284_v55  ;;  %v81_v60 = vmul.f32 %v950_v49, %v1289_v56  ;;  %v84_v63 = vmul.f32 %v950_v49, %v53_v61  ;;  %v250_v24 = vld [vmem:[%s1848_s3 + $0x28] sm:$0xff]  ;;  %v252_v28 = vld [vmem:[%s1848_s3 + $0x38] sm:$0xff]  ;;  %v251_v29 = vld [vmem:[%s1848_s3 + $0x30] sm:$0xff] }
   0xc   :  { %v91_v57 = vsel %vm87_vm0, %v80_v53, 0.0  ;;  %v88_v58 = vsel %vm87_vm0, %v79_v54, 0.0  ;;  %v83_v2 = vmul.f32 %v950_v49, %v1301_v62  ;;  %v86_v8 = vmul.f32 %v950_v49, %v55_v4  ;;  %v254_v30 = vld [vmem:[%s1848_s3 + $0x48] sm:$0xff]  ;;  %v255_v35 = vld [vmem:[%s1848_s3 + $0x50] sm:$0xff]  ;;  %v257_v41 = vld [vmem:[%s1848_s3 + $0x60] sm:$0xff] }
   0xd   :  { %166 = vadd.xlane.f32.xlu1 %v165_v20  ;;  %v97_v0 = vsel %vm87_vm0, %v82_v59, 0.0  ;;  %v94_v1 = vsel %vm87_vm0, %v81_v60, 0.0  ;;  %v103_v6 = vsel %vm87_vm0, %v84_v63, 0.0  ;;  %v85_v9 = vmul.f32 %v950_v49, %v54_v5  ;;  %v1322_v20 = vld [vmem:[#allocation3] ss:$0 sm:$0xff]  ;;  %v258_v36 = vld [vmem:[%s1848_s3 + $0x68] sm:$0xff] }
   0xe   :  { %163 = vadd.xlane.f32.xlu0 %v162_v21  ;;  %v100_v7 = vsel %vm87_vm0, %v83_v2, 0.0  ;;  %v109_v10 = vsel %vm87_vm0, %v86_v8, 0.0  ;;  %v1123_v12 = vmov 0   ;;  %v245_v21 = vld [vmem:[%s1848_s3] sm:$0xff]  ;;  %vm263_vm1 = vcmp.gt.f32.partialorder %v247_v19, 0.0  ;;  %v1370_v42 = vld [vmem:[%s1848_s3 + $0x78] sm:$0xff] }
   0xf   :  { %v106_v11 = vsel %vm87_vm0, %v85_v9, 0.0  ;;  %1047 = vset.pattern.permute.xlu1 %v1123_v12  ;;  %1046 = vset.pattern.permute.xlu0 %v1123_v12  ;;  %vm261_vm3 = vcmp.gt.f32.partialorder %v245_v21, 0.0  ;;  %vm264_vm4 = vcmp.gt.f32.partialorder %v248_v22, 0.0  ;;  %vm262_vm5 = vcmp.gt.f32.partialorder %v246_v23, 0.0 }
  0x10   :  { %vm266_vm6 = vcmp.gt.f32.partialorder %v250_v24, 0.0  ;;  %vm265_vm7 = vcmp.gt.f32.partialorder %v249_v25, 0.0  ;;  %vm268_vm8 = vcmp.gt.f32.partialorder %v252_v28, 0.0  ;;  %vm267_vm9 = vcmp.gt.f32.partialorder %v251_v29, 0.0 }
  0x11   :  { %172 = vadd.xlane.f32.xlu1 %v171_v26  ;;  %vm270_vm10 = vcmp.gt.f32.partialorder %v254_v30, 0.0  ;;  %vm271_vm13 = vcmp.gt.f32.partialorder %v255_v35, 0.0  ;;  %vm274_vm14 = vcmp.gt.f32.partialorder %v258_v36, 0.0  ;;  %vm273_vm15 = vcmp.gt.f32.partialorder %v257_v41, 0.0 }
  0x12   :  { %169 = vadd.xlane.f32.xlu0 %v168_v27 }
  0x15   :  { %178 = vadd.xlane.f32.xlu1 %v177_v32  ;;  %v253_v32 = vld [vmem:[%s1848_s3 + $0x40] sm:$0xff] }
  0x16   :  { %175 = vadd.xlane.f32.xlu0 %v174_v33  ;;  %v256_v33 = vld [vmem:[%s1848_s3 + $0x58] sm:$0xff]  ;;  %vm269_vm11 = vcmp.gt.f32.partialorder %v253_v32, 0.0 }
  0x17   :  { %vm272_vm12 = vcmp.gt.f32.partialorder %v256_v33, 0.0 }
  0x19   :  { %184 = vadd.xlane.f32.xlu1 %v183_v38 }
  0x1a   :  { %181 = vadd.xlane.f32.xlu0 %v180_v39 }
  0x1d   :  { %190 = vadd.xlane.f32.xlu1 %v189_v44 }
  0x1e   :  { %187 = vadd.xlane.f32.xlu0 %v186_v45 }
  0x21   :  { %196 = vadd.xlane.f32.xlu1 %v195_v51  ;;  %v259_v51 = vld [vmem:[%s1848_s3 + $0x70] sm:$0xff] }
  0x22   :  { %193 = vadd.xlane.f32.xlu0 %v192_v52 }
  0x25   :  { %92 = vadd.xlane.f32.xlu1 %v91_v57 }
  0x26   :  { %89 = vadd.xlane.f32.xlu0 %v88_v58 }
  0x29   :  { %98 = vadd.xlane.f32.xlu1 %v97_v0 }
  0x2a   :  { %95 = vadd.xlane.f32.xlu0 %v94_v1 }
  0x2d   :  { %104 = vadd.xlane.f32.xlu1 %v103_v6 }
  0x2e   :  { %101 = vadd.xlane.f32.xlu0 %v100_v7 }
  0x31   :  { %110 = vadd.xlane.f32.xlu1 %v109_v10 }
  0x32   :  { %107 = vadd.xlane.f32.xlu0 %v106_v11 }
  0x8e   :  { %v158_v13 = vpop.xlane.xlu1 %157 }
  0x8f   :  { %v152_v14 = vpop.xlane.xlu0 %151  ;;  %v207_v31 = vadd.f32 %v1322_v20, %v158_v13 }
  0x90   :  { %v205_v34 = vadd.f32 %v1322_v20, %v152_v14 }
  0x91   :  { %v1373_v43 = vsel %vm263_vm1, -1e+30, %v207_v31  ;;  %vm276_vm1 = vcmp.gt.f32.partialorder %v1370_v42, 0.0  ;;  %v222_v42 = vld [vmem:[%s1849_s2 + $0x8] sm:$0xff] }
  0x92   :  { %v161_v15 = vpop.xlane.xlu1 %160  ;;  %v1377_v45 = vsel %vm261_vm3, -1e+30, %v205_v34  ;;  %v359_v63 = vsel %vm293_vm2, %v1373_v43, -inf  ;;  %vm275_vm3 = vcmp.gt.f32.partialorder %v259_v51, 0.0  ;;  %v221_v51 = vld [vmem:[%s1849_s2] sm:$0xff] }
  0x93   :  { %v155_v16 = vpop.xlane.xlu0 %154  ;;  %v208_v44 = vadd.f32 %v1322_v20, %v161_v15  ;;  %v357_v0 = vsel %vm293_vm2, %v1377_v45, -inf }
  0x94   :  { %v206_v46 = vadd.f32 %v1322_v20, %v155_v16 }
  0x95   :  { %v1401_v1 = vsel %vm264_vm4, -1e+30, %v208_v44  ;;  %vm230_vm4 = vcmp.gt.f32.partialorder %v222_v42, 0.0 }
  0x96   :  { %v167_v17 = vpop.xlane.xlu1 %166  ;;  %v1404_v2 = vsel %vm262_vm5, -1e+30, %v206_v46  ;;  %v360_v15 = vsel %vm293_vm2, %v1401_v1, -inf  ;;  %v951_v46 = vld [vmem:[#allocation2] ss:$0 sm:$0xff]  ;;  %vm229_vm5 = vcmp.gt.f32.partialorder %v221_v51, 0.0 }
  0x97   :  { %v164_v18 = vpop.xlane.xlu0 %163  ;;  %v210_v39 = vadd.f32 %v1322_v20, %v167_v17  ;;  %v358_v16 = vsel %vm293_vm2, %v1404_v2, -inf }
  0x98   :  { %v209_v40 = vadd.f32 %v1322_v20, %v164_v18 }
  0x99   :  { %v1389_v58 = vsel %vm266_vm6, -1e+30, %v210_v39 }
  0x9a   :  { %v173_v26 = vpop.xlane.xlu1 %172  ;;  %v1392_v59 = vsel %vm265_vm7, -1e+30, %v209_v40  ;;  %v363_v5 = vsel %vm293_vm2, %v1389_v58, -inf }
  0x9b   :  { %v170_v27 = vpop.xlane.xlu0 %169  ;;  %v212_v47 = vadd.f32 %v1322_v20, %v173_v26  ;;  %v361_v6 = vsel %vm293_vm2, %v1392_v59, -inf  ;;  %v364_v24 = vmax.f32 %v358_v16, %v363_v5  ;;  %v228_v16 = vld [vmem:[%s1849_s2 + $0x38] sm:$0xff] }
  0x9c   :  { %v211_v49 = vadd.f32 %v1322_v20, %v170_v27  ;;  %v362_v25 = vmax.f32 %v357_v0, %v361_v6  ;;  %v224_v0 = vld [vmem:[%s1849_s2 + $0x18] sm:$0xff] }
  0x9d   :  { %v1407_v3 = vsel %vm268_vm8, -1e+30, %v212_v47  ;;  %vm232_vm6 = vcmp.gt.f32.partialorder %v224_v0, 0.0 }
  0x9e   :  { %v179_v37 = vpop.xlane.xlu1 %178  ;;  %v1410_v4 = vsel %vm267_vm9, -1e+30, %v211_v49  ;;  %v367_v17 = vsel %vm293_vm2, %v1407_v3, -inf }
  0x9f   :  { %v176_v38 = vpop.xlane.xlu0 %175  ;;  %v214_v52 = vadd.f32 %v1322_v20, %v179_v37  ;;  %v365_v18 = vsel %vm293_vm2, %v1410_v4, -inf  ;;  %v368_v30 = vmax.f32 %v360_v15, %v367_v17 }
  0xa0   :  { %v213_v53 = vadd.f32 %v1322_v20, %v176_v38  ;;  %v366_v31 = vmax.f32 %v359_v63, %v365_v18 }
  0xa1   :  { %v1417_v7 = vsel %vm270_vm10, -1e+30, %v214_v52  ;;  %vm236_vm10 = vcmp.gt.f32.partialorder %v228_v16, 0.0 }
  0xa2   :  { %v185_v54 = vpop.xlane.xlu1 %184  ;;  %v1420_v8 = vsel %vm269_vm11, -1e+30, %v213_v53  ;;  %v371_v19 = vsel %vm293_vm2, %v1417_v7, -inf }
  0xa3   :  { %v182_v57 = vpop.xlane.xlu0 %181  ;;  %v216_v60 = vadd.f32 %v1322_v20, %v185_v54  ;;  %v369_v21 = vsel %vm293_vm2, %v1420_v8, -inf  ;;  %v372_v34 = vmax.f32 %v364_v24, %v371_v19  ;;  %v227_v24 = vld [vmem:[%s1849_s2 + $0x30] sm:$0xff] }
  0xa4   :  { %v215_v61 = vadd.f32 %v1322_v20, %v182_v57  ;;  %v370_v35 = vmax.f32 %v362_v25, %v369_v21  ;;  %vm235_vm11 = vcmp.gt.f32.partialorder %v227_v24, 0.0 }
  0xa5   :  { %v1423_v11 = vsel %vm272_vm12, -1e+30, %v216_v60  ;;  %vm933_vm12 = vcmask 15360  }
  0xa6   :  { %v191_v9 = vpop.xlane.xlu1 %190  ;;  %v1426_v12 = vsel %vm271_vm13, -1e+30, %v215_v61  ;;  %v375_v26 = vsel %vm293_vm2, %v1423_v11, -inf }
  0xa7   :  { %v188_v10 = vpop.xlane.xlu0 %187  ;;  %v218_v13 = vadd.f32 %v1322_v20, %v191_v9  ;;  %v373_v27 = vsel %vm293_vm2, %v1426_v12, -inf  ;;  %v376_v38 = vmax.f32 %v368_v30, %v375_v26 }
  0xa8   :  { %v217_v14 = vadd.f32 %v1322_v20, %v188_v10  ;;  %v374_v39 = vmax.f32 %v366_v31, %v373_v27  ;;  %v223_v10 = vld [vmem:[%s1849_s2 + $0x10] sm:$0xff] }
  0xa9   :  { %v1443_v22 = vsel %vm274_vm14, -1e+30, %v218_v13  ;;  %v226_v13 = vld [vmem:[%s1849_s2 + $0x28] sm:$0xff]  ;;  %vm231_vm7 = vcmp.gt.f32.partialorder %v223_v10, 0.0 }
  0xaa   :  { %v1446_v23 = vsel %vm273_vm15, -1e+30, %v217_v14  ;;  %v197_v28 = vpop.xlane.xlu1 %196  ;;  %v379_v36 = vsel %vm293_vm2, %v1443_v22, -inf  ;;  %v225_v14 = vld [vmem:[%s1849_s2 + $0x20] sm:$0xff]  ;;  %vm234_vm8 = vcmp.gt.f32.partialorder %v226_v13, 0.0 }
  0xab   :  { %v194_v29 = vpop.xlane.xlu0 %193  ;;  %v220_v32 = vadd.f32 %v1322_v20, %v197_v28  ;;  %v377_v37 = vsel %vm293_vm2, %v1446_v23, -inf  ;;  %v380_v52 = vmax.f32 %v372_v34, %v379_v36  ;;  %vm233_vm9 = vcmp.gt.f32.partialorder %v225_v14, 0.0 }
  0xac   :  { %v219_v33 = vadd.f32 %v1322_v20, %v194_v29  ;;  %v378_v53 = vmax.f32 %v370_v35, %v377_v37 }
  0xad   :  { %v1460_v40 = vsel %vm276_vm1, -1e+30, %v220_v32 }
  0xae   :  { %v1463_v41 = vsel %vm275_vm3, -1e+30, %v219_v33  ;;  %v383_v20 = vsel %vm293_vm2, %v1460_v40, -inf  ;;  %v93_v47 = vpop.xlane.xlu1 %92  ;;  %v385_v9 = vmax.f32 %v378_v53, %v380_v52 }
  0xaf   :  { %v381_v44 = vsel %vm293_vm2, %v1463_v41, -inf  ;;  %v90_v49 = vpop.xlane.xlu0 %89  ;;  %v384_v54 = vmax.f32 %v376_v38, %v383_v20  ;;  %v120_v61 = vadd.f32 %v951_v46, %v93_v47 }
  0xb0   :  { %v382_v57 = vmax.f32 %v374_v39, %v381_v44  ;;  %v119_v63 = vadd.f32 %v951_v46, %v90_v49 }
  0xb1   :  { %v1492_v18 = vsel %vm230_vm4, -1e+30, %v120_v61 }
  0xb2   :  { %v386_v60 = vmax.f32 %v382_v57, %v384_v54  ;;  %v99_v5 = vpop.xlane.xlu1 %98  ;;  %v237_v19 = vsel %vm229_vm5, -1e+30, %v119_v63  ;;  %v295_v29 = vsel %vm293_vm2, %v1492_v18, -inf }
  0xb3   :  { %v96_v6 = vpop.xlane.xlu0 %95  ;;  %v122_v15 = vadd.f32 %v951_v46, %v99_v5  ;;  %v294_v30 = vsel %vm293_vm2, %v237_v19, -inf }
  0xb4   :  { %v1490_v17 = vmax.f32 %v385_v9, %v386_v60  ;;  %v121_v21 = vadd.f32 %v951_v46, %v96_v6 }
  0xb5   :  { %v240_v31 = vsel %vm232_vm6, -1e+30, %v122_v15 }
  0xb6   :  { %v105_v25 = vpop.xlane.xlu1 %104  ;;  %v239_v32 = vsel %vm231_vm7, -1e+30, %v121_v21  ;;  %v388_v35 = vsub.f32 %v1377_v45, %v1490_v17  ;;  %v389_v20 = vsub.f32 %v1404_v2, %v1490_v17  ;;  %v390_v44 = vsub.f32 %v1373_v43, %v1490_v17 }
  0xb7   :  { %v102_v26 = vpop.xlane.xlu0 %101  ;;  %v124_v27 = vadd.f32 %v951_v46, %v105_v25  ;;  %v297_v47 = vsel %vm293_vm2, %v240_v31, -inf  ;;  %v391_v45 = vsub.f32 %v1401_v1, %v1490_v17  ;;  %v296_v53 = vsel %vm293_vm2, %v239_v32, -inf }
  0xb8   :  { %v123_v28 = vadd.f32 %v951_v46, %v102_v26  ;;  %v392_v57 = vsub.f32 %v1392_v59, %v1490_v17  ;;  %v393_v42 = vsub.f32 %v1389_v58, %v1490_v17  ;;  %v406_v61 = vmul.f32 1.442695, %v389_v20 }
  0xb9   :  { %v1501_v33 = vsel %vm234_vm8, -1e+30, %v124_v27  ;;  %v408_v63 = vmul.f32 1.442695, %v390_v44  ;;  %v410_v58 = vmul.f32 1.442695, %v391_v45  ;;  %v394_v5 = vsub.f32 %v1410_v4, %v1490_v17 }
  0xba   :  { %v1503_v34 = vsel %vm233_vm9, -1e+30, %v123_v28  ;;  %v300_v36 = vsel %vm293_vm2, %v1501_v33, -inf  ;;  %v111_v38 = vpop.xlane.xlu1 %110  ;;  %v412_v6 = vmul.f32 1.442695, %v392_v57  ;;  %v395_v15 = vsub.f32 %v1407_v3, %v1490_v17 }
  0xbb   :  { %v298_v37 = vsel %vm293_vm2, %v1503_v34, -inf  ;;  %v108_v39 = vpop.xlane.xlu0 %107  ;;  %v126_v49 = vadd.f32 %v951_v46, %v111_v38  ;;  %v301_v54 = vmax.f32 %v295_v29, %v300_v36  ;;  %v414_v13 = vmul.f32 1.442695, %v393_v42 }
  0xbc   :  { %v125_v52 = vadd.f32 %v951_v46, %v108_v39  ;;  %v299_v2 = vmax.f32 %v294_v30, %v298_v37  ;;  %v404_v46 = vmul.f32 1.442695, %v388_v35  ;;  %v416_v16 = vmul.f32 1.442695, %v394_v5 }
  0xbd   :  { %v1524_v51 = vsel %vm236_vm10, -1e+30, %v126_v49  ;;  %v418_v25 = vmul.f32 1.442695, %v395_v15  ;;  %v396_v28 = vsub.f32 %v1420_v8, %v1490_v17  ;;  %v397_v3 = vsub.f32 %v1417_v7, %v1490_v17 }
  0xbe   :  { %v1527_v43 = vsel %vm235_vm11, -1e+30, %v125_v52  ;;  %v304_v1 = vsel %vm293_vm2, %v1524_v51, -inf  ;;  %1048 = vpow2.f32 %v404_v46  ;;  %v306_v9 = vmax.f32 %v299_v2, %v301_v54 }
  0xbf   :  { %v302_v60 = vsel %vm293_vm2, %v1527_v43, -inf  ;;  %v305_v59 = vmax.f32 %v297_v47, %v304_v1  ;;  %1050 = vpow2.f32 %v406_v61  ;;  %v399_v8 = vsub.f32 %v1423_v11, %v1490_v17 }
  0xc0   :  { %v303_v0 = vmax.f32 %v296_v53, %v302_v60  ;;  %1052 = vpow2.f32 %v408_v63  ;;  %v420_v36 = vmul.f32 1.442695, %v396_v28  ;;  %v422_v38 = vmul.f32 1.442695, %v397_v3 }
  0xc1   :  { %1054 = vpow2.f32 %v410_v58  ;;  %v400_v11 = vsub.f32 %v1446_v23, %v1490_v17  ;;  %v401_v45 = vsub.f32 %v1443_v22, %v1490_v17  ;;  %v426_v53 = vmul.f32 1.442695, %v399_v8 }
  0xc2   :  { %v307_v10 = vmax.f32 %v303_v0, %v305_v59  ;;  %1056 = vpow2.f32 %v412_v6 }
  0xc3   :  { %1058 = vpow2.f32 %v414_v13  ;;  %v428_v46 = vmul.f32 1.442695, %v400_v11  ;;  %v430_v63 = vmul.f32 1.442695, %v401_v45 }
  0xc4   :  { %v1535_v14 = vmax.f32 %v306_v9, %v307_v10  ;;  %1060 = vpow2.f32 %v416_v16 }
  0xc5   :  { %1062 = vpow2.f32 %v418_v25 }
  0xc6   :  { %v309_v21 = vsub.f32 %v237_v19, %v1535_v14  ;;  %v311_v24 = vsub.f32 %v239_v32, %v1535_v14  ;;  %v312_v4 = vsub.f32 %v240_v31, %v1535_v14  ;;  %v310_v27 = vsub.f32 %v1492_v18, %v1535_v14 }
  0xc7   :  { %v398_v19 = vsub.f32 %v1426_v12, %v1490_v17  ;;  %v313_v31 = vsub.f32 %v1503_v34, %v1535_v14  ;;  %v314_v12 = vsub.f32 %v1501_v33, %v1535_v14  ;;  %v315_v47 = vsub.f32 %v1527_v43, %v1535_v14 }
  0xc8   :  { %v317_v26 = vmul.f32 1.442695, %v309_v21  ;;  %v321_v29 = vmul.f32 1.442695, %v311_v24  ;;  %v323_v30 = vmul.f32 1.442695, %v312_v4  ;;  %v316_v23 = vsub.f32 %v1524_v51, %v1535_v14 }
  0xc9   :  { %v319_v18 = vmul.f32 1.442695, %v310_v27  ;;  %v424_v20 = vmul.f32 1.442695, %v398_v19  ;;  %v325_v49 = vmul.f32 1.442695, %v313_v31  ;;  %v402_v43 = vsub.f32 %v1463_v41, %v1490_v17 }
  0xca   :  { %1064 = vpow2.f32 %v317_v26  ;;  %v327_v57 = vmul.f32 1.442695, %v314_v12  ;;  %v329_v22 = vmul.f32 1.442695, %v315_v47  ;;  %v403_v51 = vsub.f32 %v1460_v40, %v1490_v17 }
  0xcb   :  { %v1550_v32 = vpop.eup %1048  ;;  %1066 = vpow2.f32 %v321_v29  ;;  %v331_v0 = vmul.f32 1.442695, %v316_v23  ;;  %v432_v58 = vmul.f32 1.442695, %v402_v43 }
  0xcc   :  { %v1554_v35 = vpop.eup %1050  ;;  %v436_v7 = vsel %vm293_vm2, %v1550_v32, 0.0  ;;  %1068 = vpow2.f32 %v323_v30  ;;  %v434_v40 = vmul.f32 1.442695, %v403_v51 }
  0xcd   :  { %v1560_v37 = vpop.eup %1052  ;;  %v437_v34 = vsel %vm293_vm2, %v1554_v35, 0.0  ;;  %1070 = vpow2.f32 %v319_v18 }
  0xce   :  { %v1566_v39 = vpop.eup %1054  ;;  %v438_v44 = vadd.f32 %v437_v34, %v436_v7  ;;  %v439_v33 = vsel %vm293_vm2, %v1560_v37, 0.0  ;;  %1072 = vpow2.f32 %v420_v36 }
  0xcf   :  { %v1574_v52 = vpop.eup %1056  ;;  %1074 = vpow2.f32 %v422_v38  ;;  %v441_v42 = vsel %vm293_vm2, %v1566_v39, 0.0 }
  0xd0   :  { %v440_v54 = vadd.f32 %v439_v33, %v438_v44  ;;  %v1582_v2 = vpop.eup %1058  ;;  %1076 = vpow2.f32 %v424_v20  ;;  %v443_v60 = vsel %vm293_vm2, %v1574_v52, 0.0 }
  0xd1   :  { %1078 = vpow2.f32 %v325_v49  ;;  %v1588_v61 = vpop.eup %1060  ;;  %v445_v41 = vsel %vm293_vm2, %v1582_v2, 0.0 }
  0xd2   :  { %v442_v1 = vadd.f32 %v441_v42, %v440_v54  ;;  %1080 = vpow2.f32 %v426_v53  ;;  %v1594_v6 = vpop.eup %1062  ;;  %v447_v9 = vsel %vm293_vm2, %v1588_v61, 0.0 }
  0xd3   :  { %1082 = vpow2.f32 %v327_v57  ;;  %v449_v14 = vsel %vm293_vm2, %v1594_v6, 0.0 }
  0xd4   :  { %v444_v59 = vadd.f32 %v443_v60, %v442_v1  ;;  %1084 = vpow2.f32 %v428_v46 }
  0xd5   :  { %1086 = vpow2.f32 %v329_v22 }
  0xd6   :  { %v446_v5 = vadd.f32 %v445_v41, %v444_v59  ;;  %1088 = vpow2.f32 %v430_v63 }
  0xd7   :  { %v1065_v10 = vpop.eup %1064  ;;  %1090 = vpow2.f32 %v331_v0 }
  0xd8   :  { %v448_v17 = vadd.f32 %v447_v9, %v446_v5  ;;  %v1067_v13 = vpop.eup %1066  ;;  %1092 = vpow2.f32 %v432_v58  ;;  %v333_v16 = vsel %vm293_vm2, %v1065_v10, 0.0 }
  0xd9   :  { %v1069_v15 = vpop.eup %1068  ;;  %1094 = vpow2.f32 %v434_v40  ;;  %v336_v3 = vsel %vm293_vm2, %v1067_v13, 0.0 }
  0xda   :  { %v450_v21 = vadd.f32 %v449_v14, %v448_v17  ;;  %v1071_v24 = vpop.eup %1070  ;;  %v338_v36 = vsel %vm293_vm2, %v1069_v15, 0.0 }
  0xdb   :  { %v1601_v4 = vpop.eup %1072  ;;  %v334_v25 = vsel %vm293_vm2, %v1071_v24, 0.0 }
  0xdc   :  { %v1075_v26 = vpop.eup %1074  ;;  %v335_v27 = vadd.f32 %v334_v25, %v333_v16  ;;  %v451_v28 = vsel %vm293_vm2, %v1601_v4, 0.0 }
  0xdd   :  { %v1077_v29 = vpop.eup %1076  ;;  %v452_v30 = vadd.f32 %v451_v28, %v450_v21  ;;  %v453_v18 = vsel %vm293_vm2, %v1075_v26, 0.0 }
  0xde   :  { %v1607_v19 = vpop.eup %1078  ;;  %v337_v31 = vadd.f32 %v336_v3, %v335_v27  ;;  %v455_v34 = vsel %vm293_vm2, %v1077_v29, 0.0 }
  0xdf   :  { %v1081_v8 = vpop.eup %1080  ;;  %v454_v7 = vadd.f32 %v453_v18, %v452_v30  ;;  %v340_v20 = vsel %vm293_vm2, %v1607_v19, 0.0 }
  0xe0   :  { %v1611_v12 = vpop.eup %1082  ;;  %v339_v38 = vadd.f32 %v338_v36, %v337_v31  ;;  %v457_v33 = vsel %vm293_vm2, %v1081_v8, 0.0 }
  0xe1   :  { %v1085_v11 = vpop.eup %1084  ;;  %v456_v44 = vadd.f32 %v455_v34, %v454_v7  ;;  %v342_v53 = vsel %vm293_vm2, %v1611_v12, 0.0  ;;  %v679_v34 = vld [vmem:[%s1851_s8 + $0x28] sm:$0xff] }
  0xe2   :  { %v1087_v47 = vpop.eup %1086  ;;  %v341_v49 = vadd.f32 %v340_v20, %v339_v38  ;;  %v459_v42 = vsel %vm293_vm2, %v1085_v11, 0.0  ;;  %v686_v38 = vld [vmem:[%s1850_s9 + $0x20] sm:$0xff] }
  0xe3   :  { %v1089_v45 = vpop.eup %1088  ;;  %v458_v54 = vadd.f32 %v457_v33, %v456_v44  ;;  %v344_v46 = vsel %vm293_vm2, %v1087_v47, 0.0  ;;  %v678_v20 = vld [vmem:[%s1851_s8 + $0x20] sm:$0xff]  ;;  %v684_v44 = vld [vmem:[%s1850_s9 + $0x10] sm:$0xff] }
  0xe4   :  { %v1091_v23 = vpop.eup %1090  ;;  %v343_v57 = vadd.f32 %v342_v53, %v341_v49  ;;  %v461_v60 = vsel %vm293_vm2, %v1089_v45, 0.0  ;;  %v683_v49 = vld [vmem:[%s1850_s9 + $0x8] sm:$0xff]  ;;  %v676_v33 = vld [vmem:[%s1851_s8 + $0x10] sm:$0xff] }
  0xe5   :  { %v1093_v43 = vpop.eup %1092  ;;  %v460_v1 = vadd.f32 %v459_v42, %v458_v54  ;;  %v346_v63 = vsel %vm293_vm2, %v1091_v23, 0.0  ;;  %v675_v53 = vld [vmem:[%s1851_s8 + $0x8] sm:$0xff]  ;;  %v674_v54 = vld [vmem:[%s1851_s8] sm:$0xff] }
  0xe6   :  { %v345_v22 = vadd.f32 %v344_v46, %v343_v57  ;;  %v1095_v51 = vpop.eup %1094  ;;  %v463_v0 = vsel %vm293_vm2, %v1093_v43, 0.0 }
  0xe7   :  { %v462_v59 = vadd.f32 %v461_v60, %v460_v1  ;;  %v465_v5 = vsel %vm293_vm2, %v1095_v51, 0.0  ;;  %vm1125_vm2 = vmmov 0  }
  0xe8   :  { %v347_v41 = vadd.f32 %v346_v63, %v345_v22 }
  0xe9   :  { %v464_v58 = vadd.f32 %v463_v0, %v462_v59  ;;  %v1104_v59 = vld [vmem:[%s1842_s1 + $0x8] sm:$0xff] }
  0xea   :  { %1096 = vrcp.f32 %v347_v41 }
  0xeb   :  { %v466_v9 = vadd.f32 %v465_v5, %v464_v58  ;;  %v1105_v58 = vld [vmem:[%s1842_s1] sm:$0xff] }
  0xed   :  { %1098 = vrcp.f32 %v466_v9  ;;  %v1106_v9 = vld [vmem:[%s1842_s1 + $0x10] sm:$0xff] }
  0xf7   :  { %v1097_v40 = vpop.eup %1096 }
  0xf8   :  { %v350_v17 = vmul.f32 %v1097_v40, %v1071_v24  ;;  %v349_v14 = vmul.f32 %v1097_v40, %v1065_v10  ;;  %v355_v16 = vmul.f32 %v1097_v40, %v1087_v47  ;;  %v1625_v21 = vmul.f32 %v1097_v40, %v1091_v23  ;;  %v677_v47 = vld [vmem:[%s1851_s8 + $0x18] sm:$0xff] }
  0xf9   :  { %v351_v27 = vmul.f32 %v1097_v40, %v1067_v13  ;;  %v352_v3 = vmul.f32 %v1097_v40, %v1069_v15  ;;  %v354_v7 = vmul.f32 %v1097_v40, %v1611_v12  ;;  %v680_v12 = vld [vmem:[%s1851_s8 + $0x30] sm:$0xff] }
  0xfa   :  { %v1099_v25 = vpop.eup %1098  ;;  %491 = vperm.xlu1 %1047, %v350_v17   ;;  %486 = vperm.xlu0 %1046, %v349_v14  }
  0xfb   :  { %v468_v28 = vmul.f32 %v1099_v25, %v1550_v32  ;;  %v477_v30 = vmul.f32 %v1099_v25, %v1075_v26  ;;  %v469_v31 = vmul.f32 %v1099_v25, %v1554_v35  ;;  %v478_v18 = vmul.f32 %v1099_v25, %v1077_v29 }
  0xfc   :  { %v470_v10 = vmul.f32 %v1099_v25, %v1560_v37  ;;  %v479_v24 = vmul.f32 %v1099_v25, %v1081_v8  ;;  %v471_v13 = vmul.f32 %v1099_v25, %v1566_v39  ;;  %v480_v36 = vmul.f32 %v1099_v25, %v1085_v11  ;;  %v685_v11 = vld [vmem:[%s1850_s9 + $0x18] sm:$0xff] }
  0xfd   :  { %v472_v32 = vmul.f32 %v1099_v25, %v1574_v52  ;;  %v481_v15 = vmul.f32 %v1099_v25, %v1089_v45  ;;  %v473_v35 = vmul.f32 %v1099_v25, %v1582_v2  ;;  %v482_v26 = vmul.f32 %v1099_v25, %v1093_v43  ;;  %v682_v45 = vld [vmem:[%s1850_s9] sm:$0xff] }
  0xfe   :  { %496 = vperm.xlu1 %1047, %v351_v27   ;;  %549 = vperm.xlu0 %1046, %v468_v28   ;;  %v474_v37 = vmul.f32 %v1099_v25, %v1588_v61  ;;  %v483_v29 = vmul.f32 %v1099_v25, %v1095_v51  ;;  %v475_v39 = vmul.f32 %v1099_v25, %v1594_v6  ;;  %v1124_v2 = vmov 0.0   ;;  %v689_v61 = vld [vmem:[%s1850_s9 + $0x38] sm:$0xff]  ;;  %v688_v6 = vld [vmem:[%s1850_s9 + $0x30] sm:$0xff] }
  0xff   :  { %v476_v8 = vmul.f32 %v1099_v25, %v1601_v4  ;;  %v353_v52 = vmul.f32 %v1097_v40, %v1607_v19  ;;  %986 = vmatprep.subr.mxu0 %v1124_v2  ;;  %v681_v4 = vld [vmem:[%s1851_s8 + $0x38] sm:$0xff]  ;;  %1005 = vmatprep.subr.mxu1 %v1124_v2  ;;  %v687_v19 = vld [vmem:[%s1850_s9 + $0x28] sm:$0xff] }
 0x100   :  { %987 = vmatpush3.msra.mxu0 %v689_v61  ;;  %1006 = vmatpush3.msra.mxu1 %v681_v4 }
 0x101   :  { %988 = vmatprep.subr.mxu0 %v1124_v2  ;;  %1007 = vmatprep.subr.mxu1 %v1124_v2 }
 0x102   :  { %501 = vperm.xlu1 %1047, %v352_v3   ;;  %594 = vperm.xlu0 %1046, %v477_v30   ;;  %v1108_v3 = vld [vmem:[%s1842_s1 + $0x20] sm:$0xff] }
 0x103   :  { %989 = vmatpush3.msra.mxu0 %v688_v6  ;;  %1008 = vmatpush3.msra.mxu1 %v680_v12 }
 0x104   :  { %990 = vmatprep.subr.mxu0 %v1124_v2  ;;  %1009 = vmatprep.subr.mxu1 %v1124_v2 }
 0x105   :  { %991 = vmatpush3.msra.mxu0 %v687_v19  ;;  %1010 = vmatpush3.msra.mxu1 %v679_v34 }
 0x106   :  { %554 = vperm.xlu1 %1047, %v469_v31   ;;  %599 = vperm.xlu0 %1046, %v478_v18  }
 0x107   :  { %992 = vmatprep.subr.mxu0 %v1124_v2  ;;  %1011 = vmatprep.subr.mxu1 %v1124_v2 }
 0x108   :  { %993 = vmatpush3.msra.mxu0 %v686_v38  ;;  %1012 = vmatpush3.msra.mxu1 %v678_v20  ;;  %v1112_v20 = vld [vmem:[%s1842_s1 + $0x48] sm:$0xff] }
 0x109   :  { %994 = vmatprep.subr.mxu0 %v1124_v2  ;;  %1013 = vmatprep.subr.mxu1 %v1124_v2 }
 0x10a   :  { %559 = vperm.xlu1 %1047, %v470_v10   ;;  %604 = vperm.xlu0 %1046, %v479_v24   ;;  %v1109_v10 = vld [vmem:[%s1842_s1 + $0x28] sm:$0xff] }
 0x10b   :  { %995 = vmatpush3.msra.mxu0 %v685_v11  ;;  %1014 = vmatpush3.msra.mxu1 %v677_v47  ;;  %v1113_v47 = vld [vmem:[%s1842_s1 + $0x40] sm:$0xff] }
 0x10c   :  { %996 = vmatprep.subr.mxu0 %v1124_v2  ;;  %1015 = vmatprep.subr.mxu1 %v1124_v2 }
 0x10d   :  { %997 = vmatpush3.msra.mxu0 %v684_v44  ;;  %1016 = vmatpush3.msra.mxu1 %v676_v33 }
 0x10e   :  { %564 = vperm.xlu1 %1047, %v471_v13   ;;  %609 = vperm.xlu0 %1046, %v480_v36  }
 0x10f   :  { %998 = vmatprep.subr.mxu0 %v1124_v2  ;;  %1017 = vmatprep.subr.mxu1 %v1124_v2 }
 0x110   :  { %999 = vmatpush3.msra.mxu0 %v683_v49  ;;  %1002 = vmatprep.mubr.msk.f32.mxu0 %vm1125_vm2, %v1124_v2 }
 0x111   :  { %1000 = vmatprep.subr.mxu0 %v1124_v2  ;;  %1018 = vmatpush3.msra.mxu1 %v675_v53 }
 0x112   :  { %569 = vperm.xlu1 %1047, %v472_v32   ;;  %614 = vperm.xlu0 %1046, %v481_v15  }
 0x113   :  { %1001 = vmatpush3.msra.mxu0 %v682_v45  ;;  %1019 = vmatprep.subr.mxu1 %v1124_v2 }
 0x114   :  { %1021 = vmatprep.mubr.msk.f32.mxu1 %vm1125_vm2, %v1124_v2  ;;  %1020 = vmatpush3.msra.mxu1 %v674_v54 }
 0x115   :  { %1024 = vmatprep.subr.mxu0 %v1124_v2 }
 0x116   :  { %574 = vperm.xlu1 %1047, %v473_v35   ;;  %619 = vperm.xlu0 %1046, %v482_v26   ;;  %v1110_v35 = vld [vmem:[%s1842_s1 + $0x30] sm:$0xff] }
 0x11a   :  { %579 = vperm.xlu1 %1047, %v474_v37   ;;  %624 = vperm.xlu0 %1046, %v483_v29  }
 0x11e   :  { %584 = vperm.xlu1 %1047, %v475_v39  }
 0x122   :  { %589 = vperm.xlu1 %1047, %v476_v8  }
 0x126   :  { %506 = vperm.xlu1 %1047, %v353_v52  }
 0x12a   :  { %511 = vperm.xlu1 %1047, %v354_v7   ;;  %v1111_v7 = vld [vmem:[%s1842_s1 + $0x38] sm:$0xff] }
 0x12e   :  { %516 = vperm.xlu1 %1047, %v355_v16   ;;  %v1107_v16 = vld [vmem:[%s1842_s1 + $0x18] sm:$0xff] }
 0x132   :  { %521 = vperm.xlu1 %1047, %v1625_v21  }
 0x175   :  { %v492_v23 = vpop.permute.xlu1 %491  ;;  %v487_v57 = vpop.permute.xlu0 %486 }
 0x176   :  { %v525_v12 = vmul.f32 %v492_v23, %v1267_v48  ;;  %v524_v11 = vmul.f32 %v487_v57, %v1275_v50  ;;  %v1114_v48 = vld [vmem:[%s1842_s1 + $0x50] sm:$0xff] }
 0x178   :  { %v533_v54 = vsel %vm87_vm0, %v525_v12, 0.0 }
 0x179   :  { %v497_v42 = vpop.permute.xlu1 %496  ;;  %v550_v43 = vpop.permute.xlu0 %549 }
 0x17a   :  { %v627_v5 = vmul.f32 %v1105_v58, %v550_v43  ;;  %v526_v45 = vmul.f32 %v497_v42, %v1289_v56  ;;  %v1115_v56 = vld [vmem:[%s1842_s1 + $0x58] sm:$0xff] }
 0x17c   :  { %v643_v27 = vsel %vm87_vm0, %v627_v5, 0.0 }
 0x17d   :  { %v502_v46 = vpop.permute.xlu1 %501  ;;  %v595_v22 = vpop.permute.xlu0 %594 }
 0x17e   :  { %v636_v44 = vmul.f32 %v1112_v20, %v595_v22  ;;  %v527_v22 = vmul.f32 %v502_v46, %v1284_v55 }
 0x181   :  { %v555_v1 = vpop.permute.xlu1 %554  ;;  %v600_v51 = vpop.permute.xlu0 %599 }
 0x182   :  { %v628_v0 = vmul.f32 %v1104_v59, %v555_v1  ;;  %v637_v53 = vmul.f32 %v1114_v48, %v600_v51  ;;  %v532_v1 = vsel %vm87_vm0, %v524_v11, 0.0  ;;  %v535_v51 = vsel %vm87_vm0, %v526_v45, 0.0  ;;  %v847_v45 = vld [vmem:[%s1852_s11 + $0x10] sm:$0xff]  ;;  %v846_v48 = vld [vmem:[%s1852_s11 + $0x8] sm:$0xff] }
 0x183   :  { %v534_v55 = vadd.f32 %v533_v54, %v532_v1 }
 0x184   :  { %v644_v14 = vsel %vm87_vm0, %v628_v0, 0.0  ;;  %v662_v59 = vsel %vm87_vm0, %v637_v53, 0.0  ;;  %v1116_v0 = vld [vmem:[%s1842_s1 + $0x60] sm:$0xff] }
 0x185   :  { %v560_v60 = vpop.permute.xlu1 %559  ;;  %v605_v17 = vpop.permute.xlu0 %604  ;;  %v645_v31 = vadd.f32 %v644_v14, %v643_v27  ;;  %v845_v53 = vld [vmem:[%s1852_s11] sm:$0xff] }
 0x186   :  { %v629_v40 = vmul.f32 %v1106_v9, %v560_v60  ;;  %v660_v60 = vsel %vm87_vm0, %v636_v44, 0.0  ;;  %v638_v42 = vmul.f32 %v1115_v56, %v605_v17  ;;  %v537_v9 = vsel %vm87_vm0, %v527_v22, 0.0  ;;  %v1117_v17 = vld [vmem:[%s1842_s1 + $0x68] sm:$0xff]  ;;  %v851_v44 = vld [vmem:[%s1852_s11 + $0x30] sm:$0xff]  ;;  %v957_v56 = vld [vmem:[%s1854_s12] ss:$0 sm:$0xff] }
 0x188   :  { %v646_v28 = vsel %vm87_vm0, %v629_v40, 0.0  ;;  %v664_v40 = vsel %vm87_vm0, %v638_v42, 0.0 }
 0x189   :  { %v565_v63 = vpop.permute.xlu1 %564  ;;  %v647_v13 = vadd.f32 %v646_v28, %v645_v31  ;;  %v610_v36 = vpop.permute.xlu0 %609 }
 0x18a   :  { %v630_v21 = vmul.f32 %v1107_v16, %v565_v63  ;;  %v1118_v16 = vld [vmem:[%s1845_s0 + $0x28] sm:$0xff] }
 0x18c   :  { %v648_v18 = vsel %vm87_vm0, %v630_v21, 0.0 }
 0x18d   :  { %v570_v41 = vpop.permute.xlu1 %569  ;;  %v649_v37 = vadd.f32 %v648_v18, %v647_v13  ;;  %v615_v6 = vpop.permute.xlu0 %614 }
 0x18e   :  { %v631_v30 = vmul.f32 %v1108_v3, %v570_v41  ;;  %v639_v41 = vmul.f32 %v1116_v0, %v610_v36  ;;  %v640_v14 = vmul.f32 %v1117_v17, %v615_v6  ;;  %v1119_v3 = vld [vmem:[%s1842_s1 + $0x70] sm:$0xff]  ;;  %v1120_v36 = vld [vmem:[%s1842_s1 + $0x78] sm:$0xff] }
 0x190   :  { %v650_v15 = vsel %vm87_vm0, %v631_v30, 0.0  ;;  %v666_v28 = vsel %vm87_vm0, %v639_v41, 0.0  ;;  %v668_v13 = vsel %vm87_vm0, %v640_v14, 0.0 }
 0x191   :  { %v575_v25 = vpop.permute.xlu1 %574  ;;  %v651_v39 = vadd.f32 %v650_v15, %v649_v37  ;;  %v620_v23 = vpop.permute.xlu0 %619 }
 0x192   :  { %v632_v24 = vmul.f32 %v1109_v10, %v575_v25  ;;  %v536_v25 = vadd.f32 %v535_v51, %v534_v55  ;;  %v641_v30 = vmul.f32 %v1119_v3, %v620_v23 }
 0x194   :  { %v652_v29 = vsel %vm87_vm0, %v632_v24, 0.0  ;;  %v538_v18 = vadd.f32 %v537_v9, %v536_v25 }
 0x195   :  { %v580_v32 = vpop.permute.xlu1 %579  ;;  %v653_v4 = vadd.f32 %v652_v29, %v651_v39  ;;  %v625_v27 = vpop.permute.xlu0 %624  ;;  %v670_v39 = vsel %vm87_vm0, %v641_v30, 0.0 }
 0x196   :  { %v633_v26 = vmul.f32 %v1110_v35, %v580_v32  ;;  %v642_v32 = vmul.f32 %v1120_v36, %v625_v27  ;;  %v1121_v35 = vld [vmem:[%s1845_s0 + $0x30] sm:$0xff] }
 0x198   :  { %v654_v52 = vsel %vm87_vm0, %v633_v26, 0.0  ;;  %v672_v6 = vsel %vm87_vm0, %v642_v32, 0.0 }
 0x199   :  { %v585_v8 = vpop.permute.xlu1 %584  ;;  %v655_v38 = vadd.f32 %v654_v52, %v653_v4  ;;  %v1122_v4 = vld [vmem:[%s1845_s0 + $0x38] sm:$0xff] }
 0x19a   :  { %v634_v61 = vmul.f32 %v1111_v7, %v585_v8 }
 0x19c   :  { %v656_v19 = vsel %vm87_vm0, %v634_v61, 0.0 }
 0x19d   :  { %v590_v34 = vpop.permute.xlu1 %589  ;;  %v657_v33 = vadd.f32 %v656_v19, %v655_v38 }
 0x19e   :  { %v635_v49 = vmul.f32 %v1113_v47, %v590_v34  ;;  %v852_v34 = vld [vmem:[%s1852_s11 + $0x38] sm:$0xff]  ;;  %v850_v47 = vld [vmem:[%s1852_s11 + $0x28] sm:$0xff] }
 0x1a0   :  { %v658_v50 = vsel %vm87_vm0, %v635_v49, 0.0  ;;  %v849_v49 = vld [vmem:[%s1852_s11 + $0x20] sm:$0xff] }
 0x1a1   :  { %v659_v57 = vadd.f32 %v658_v50, %v657_v33  ;;  %v507_v43 = vpop.permute.xlu1 %506  ;;  %v848_v33 = vld [vmem:[%s1852_s11 + $0x18] sm:$0xff] }
 0x1a2   :  { %v528_v58 = vmul.f32 %v507_v43, %v1301_v62 }
 0x1a3   :  { %v661_v63 = vadd.f32 %v660_v60, %v659_v57  ;;  %v956_v57 = vld [vmem:[%s1853_s10] ss:$0 sm:$0xff] }
 0x1a4   :  { %v539_v31 = vsel %vm87_vm0, %v528_v58, 0.0 }
 0x1a5   :  { %v663_v46 = vadd.f32 %v662_v59, %v661_v63  ;;  %v512_v5 = vpop.permute.xlu1 %511  ;;  %v540_v37 = vadd.f32 %v539_v31, %v538_v18 }
 0x1a6   :  { %v529_v21 = vmul.f32 %v1118_v16, %v512_v5 }
 0x1a7   :  { %v665_v62 = vadd.f32 %v664_v40, %v663_v46 }
 0x1a8   :  { %v541_v15 = vsel %vm87_vm0, %v529_v21, 0.0 }
 0x1a9   :  { %v667_v10 = vadd.f32 %v666_v28, %v665_v62  ;;  %v517_v24 = vpop.permute.xlu1 %516  ;;  %v542_v52 = vadd.f32 %v541_v15, %v540_v37 }
 0x1aa   :  { %v530_v26 = vmul.f32 %v1121_v35, %v517_v24 }
 0x1ab   :  { %v669_v29 = vadd.f32 %v668_v13, %v667_v10 }
 0x1ac   :  { %v543_v8 = vsel %vm87_vm0, %v530_v26, 0.0 }
 0x1ad   :  { %v522_v7 = vpop.permute.xlu1 %521  ;;  %v671_v61 = vadd.f32 %v670_v39, %v669_v29  ;;  %v544_v12 = vadd.f32 %v543_v8, %v542_v52 }
 0x1ae   :  { %v531_v19 = vmul.f32 %v1122_v4, %v522_v7 }
 0x1af   :  { %v673_v38 = vadd.f32 %v672_v6, %v671_v61 }
 0x1b0   :  { %v545_v11 = vsel %vm87_vm0, %v531_v19, 0.0 }
 0x1b1   :  { %v546_v20 = vadd.f32 %v545_v11, %v544_v12  ;;  %1003 = vmatmul.mubr.msk.f32.vlgmr.msra.gmra.mxu0 %vm87_vm0, %v673_v38 }
 0x1b2   :  { %1025 = vmatpush3.msra.mxu0 %v852_v34  ;;  %1040 = vmatprep.mubr.msk.f32.mxu0 %vm1125_vm2, %v1124_v2 }
 0x1b3   :  { %1022 = vmatmul.mubr.msk.f32.vlgmr.msra.gmra.mxu1 %vm87_vm0, %v546_v20  ;;  %1026 = vmatprep.subr.mxu0 %v1124_v2 }
 0x1b4   :  { %1027 = vmatpush3.msra.mxu0 %v851_v44 }
 0x1b5   :  { %1028 = vmatprep.subr.mxu0 %v1124_v2 }
 0x1b6   :  { %1029 = vmatpush3.msra.mxu0 %v850_v47 }
 0x1b7   :  { %1030 = vmatprep.subr.mxu0 %v1124_v2 }
 0x1b8   :  { %1031 = vmatpush3.msra.mxu0 %v849_v49 }
 0x1b9   :  { %1032 = vmatprep.subr.mxu0 %v1124_v2 }
 0x1ba   :  { %1033 = vmatpush3.msra.mxu0 %v848_v33 }
 0x1bb   :  { %1034 = vmatprep.subr.mxu0 %v1124_v2 }
 0x1bc   :  { %1035 = vmatpush3.msra.mxu0 %v847_v45 }
 0x1bd   :  { %1036 = vmatprep.subr.mxu0 %v1124_v2 }
 0x1be   :  { %1037 = vmatpush3.msra.mxu0 %v846_v48 }
 0x1bf   :  { %1038 = vmatprep.subr.mxu0 %v1124_v2 }
 0x1c0   :  { %1039 = vmatpush3.msra.mxu0 %v845_v53 }
 0x271   :  { %v759_v50 = vpop.f32.mrf.mxu0 }
 0x273   :  { %v1004_v54 = vpop.f32.mrf.mxu0  ;;  %v832_v23 = vpop.f32.mrf.mxu1 }
 0x274   :  { %v833_v43 = vadd.f32 %v832_v23, %v759_v50 }
 0x275   :  { %v1023_v1 = vpop.f32.mrf.mxu1 }
 0x276   :  { %v843_v22 = vadd.f32 %v956_v57, %v833_v43 }
 0x278   :  { %v844_v60 = vmax.f32 %v843_v22, 0.0 }
 0x27a   :  { %1041 = vmatmul.mubr.msk.f32.vlgmr.msra.gmra.mxu0 %vm87_vm0, %v844_v60 }
 0x33a   :  { %v929_v42 = vpop.f32.mrf.mxu0 }
 0x33b   :  { %v930_v2 = vadd.f32 %v957_v56, %v929_v42 }
 0x33c   :  { %v1042_v63 = vpop.f32.mrf.mxu0 }
 0x33d   :  { %v934_v51 = vsel %vm933_vm12, %v930_v2, -inf }
 0x33e   :  { %935 = vmax.xlane.f32.xlu1 %v934_v51 }
 0x3c7   :  { %v936_v59 = vpop.xlane.xlu1 %935 }
 0x3c8   :  { %v937_v0 = vsub.f32 %v930_v2, %v936_v59 }
 0x3ca   :  { %v938_v41 = vmul.f32 1.442695, %v937_v0 }
 0x3cc   :  { %1100 = vpow2.f32 %v938_v41 }
 0x3d9   :  { %v1101_v58 = vpop.eup %1100 }
 0x3da   :  { %v940_v55 = vsel %vm933_vm12, %v1101_v58, 0.0 }
 0x3db   :  { %941 = vadd.xlane.f32.xlu0 %v940_v55 }
 0x464   :  { %v942_v46 = vpop.xlane.xlu0 %941 }
 0x465   :  { %1102 = vrcp.f32 %v942_v46 }
 0x472   :  { %v1103_v5 = vpop.eup %1102 }
 0x473   :  { %v944_v9 = vmul.f32 %v1103_v5, %v1101_v58 }
 0x475   :  { %945 = vst.msk [vmem:[%s1855_s13] sm:$0xff] %vm933_vm12, %v944_v9 }

</bundles_post_ra>
